<compile_context>
chip_gen: v7x
topology: tpu7x:2x2x1
jax: 0.10.0
libtpu: 0.0.40
codegen_flags: <defaults>
</compile_context>

<pallas_src>
import functools

import jax
import jax.numpy as jnp
from jax.experimental import pallas as pl
from jax.experimental.pallas import tpu as pltpu


def _tpu_vmem_capacity_bytes():
    try:
        info = pltpu.get_tpu_info()
        for attr in ("vmem_capacity_bytes", "vmem_bytes", "vmem_size_bytes"):
            v = getattr(info, attr, None)
            if v:
                return int(v)
    except Exception:
        pass
    return 64 * 1024 * 1024          # conservative (v7x-sized) default


def _vmem_budget():
    """Returns (vmem_limit_bytes, tile_target) per TPU generation."""
    cap = _tpu_vmem_capacity_bytes()
    if cap >= 100 * 1024 * 1024:     # v5e / v6e: 128 MiB physical VMEM
        return 96 * 1024 * 1024, 1024
    return 40 * 1024 * 1024, 512     # v7x: 64 MiB physical VMEM


def _pick_tile(n, target, align):
    """Largest divisor of n that is <= target and a multiple of `align`.

    Falls back to the full axis (valid via the full-dim exemption of the
    (8,128) rule).
    # TODO(synk): a full-axis fallback on a huge non-aligned axis could exceed
    # the VMEM budget; unreachable for power-of-two VAE spatial dims.
    """
    t = min(n, max(target, align))
    t -= t % align
    while t >= align:
        if n % t == 0:
            return t
        t -= align
    return n


# ----------------------------------------------------------------------------
# Kernel 1: per-channel sum / sumsq over HW + fused NCHW->NHWC bf16 copy.
# ----------------------------------------------------------------------------
def _gn_stats_kernel(x_ref, sum_ref, sq_ref, xt_ref, acc_s, acc_q):
    t = pl.program_id(1)

    @pl.when(t == 0)
    def _():
        acc_s[...] = jnp.zeros_like(acc_s)
        acc_q[...] = jnp.zeros_like(acc_q)

    x = x_ref[...]                                  # (C, t_hw) f32, NCHW tile
    xt = jnp.transpose(x, (1, 0))                   # (t_hw, C): fused layout change
    xt_ref[...] = xt.astype(xt_ref.dtype)           # bf16 NHWC copy for kernel 2
    thw, c = xt.shape
    xr = xt.reshape(thw // 8, 8, c)                 # sublane-native split (free)
    acc_s[...] += jnp.sum(xr, axis=0)               # VPU-only partial sums
    acc_q[...] += jnp.sum(xr * xr, axis=0)

    @pl.when(t == pl.num_programs(1) - 1)
    def _():
        # single cross-sublane (XLU) reduce per batch, off the hot path
        sum_ref[...] = jnp.sum(acc_s[...], axis=0, keepdims=True)
        sq_ref[...] = jnp.sum(acc_q[...], axis=0, keepdims=True)


def gn_stats_nchw(x_nc, *, t_hw, vmem_limit):
    n, c, hw = x_nc.shape
    return pl.pallas_call(
        _gn_stats_kernel,
        out_shape=(jax.ShapeDtypeStruct((n, 1, c), jnp.float32),
                   jax.ShapeDtypeStruct((n, 1, c), jnp.float32),
                   jax.ShapeDtypeStruct((n, hw, c), jnp.bfloat16)),
        grid=(n, hw // t_hw),
        in_specs=[pl.BlockSpec((None, c, t_hw), lambda b, t: (b, 0, t))],
        out_specs=[pl.BlockSpec((None, 1, c), lambda b, t: (b, 0, 0)),
                   pl.BlockSpec((None, 1, c), lambda b, t: (b, 0, 0)),
                   pl.BlockSpec((None, t_hw, c), lambda b, t: (b, t, 0))],
        scratch_shapes=[pltpu.VMEM((8, c), jnp.float32),
                        pltpu.VMEM((8, c), jnp.float32)],
        compiler_params=pltpu.CompilerParams(
            dimension_semantics=("parallel", "arbitrary"),
            vmem_limit_bytes=vmem_limit),
    )(x_nc)


def gn_affine_coeffs(csum, csq, gamma, beta, hw, num_groups, eps):
    # O(N*C) glue: fold per-channel stats into per-group mean / inv_std, then
    # express GroupNorm as a per-(n, c) affine y = x * scale + shift.
    n, _, c = csum.shape
    cg = c // num_groups
    count = jnp.float32(hw * cg)
    gsum = csum.reshape(n, num_groups, cg).sum(axis=-1)
    gsq = csq.reshape(n, num_groups, cg).sum(axis=-1)
    mean = gsum / count
    # TODO(synk): E[x^2]-mean^2 can cancel for large-mean activations; switch
    # to a shifted/two-pass merge if VAE activations drift far from zero mean.
    var = gsq / count - mean * mean
    inv = jax.lax.rsqrt(var + eps)
    mean_c = jnp.repeat(mean, cg, axis=-1)          # (n, c)
    inv_c = jnp.repeat(inv, cg, axis=-1)
    scale = gamma[None, :] * inv_c
    shift = beta[None, :] - mean_c * scale
    return scale.reshape(n, 1, c), shift.reshape(n, 1, c)


# ----------------------------------------------------------------------------
# Kernel 2: fused GroupNorm-affine + packed QKV projection.
# ----------------------------------------------------------------------------
def _gn_qkv_kernel(x_ref, scale_ref, shift_ref, w_ref, b_ref, qkv_ref):
    x = x_ref[...].astype(jnp.float32)              # (tm, C) bf16 -> f32
    y = x * scale_ref[...] + shift_ref[...]         # GroupNorm as affine
    qkv_ref[...] = (jnp.dot(y.astype(jnp.bfloat16), w_ref[...],
                            preferred_element_type=jnp.float32)
                    + b_ref[...]).astype(qkv_ref.dtype)


def gn_qkv(x_nhwc, scale, shift, w_qkv_t, b_qkv, *, tm, vmem_limit):
    n, hw, c = x_nhwc.shape
    return pl.pallas_call(
        _gn_qkv_kernel,
        out_shape=jax.ShapeDtypeStruct((n, hw, 3 * c), jnp.bfloat16),
        grid=(n, hw // tm),
        in_specs=[
            pl.BlockSpec((None, tm, c), lambda b, t: (b, t, 0)),
            pl.BlockSpec((None, 1, c), lambda b, t: (b, 0, 0)),
            pl.BlockSpec((None, 1, c), lambda b, t: (b, 0, 0)),
            pl.BlockSpec((c, 3 * c), lambda b, t: (0, 0)),
            pl.BlockSpec((1, 3 * c), lambda b, t: (0, 0)),
        ],
        out_specs=pl.BlockSpec((None, tm, 3 * c), lambda b, t: (b, t, 0)),
        compiler_params=pltpu.CompilerParams(
            dimension_semantics=("parallel", "parallel"),
            vmem_limit_bytes=vmem_limit),
    )(x_nhwc, scale, shift, w_qkv_t, b_qkv)


# ----------------------------------------------------------------------------
# Kernel 3: flash attention with VMEM-resident K/V; out_proj + residual add +
# NHWC->NCHW write fused into the epilogue.
# ----------------------------------------------------------------------------
def _attn_out_kernel(q_ref, k_ref, v_ref, wo_ref, bo_ref, res_ref, o_ref,
                     m_sc, l_sc, acc_sc, *, tkv):
    hw = k_ref.shape[0]
    n_kv = hw // tkv

    m_sc[...] = jnp.full_like(m_sc, -jnp.inf)
    l_sc[...] = jnp.zeros_like(l_sc)
    acc_sc[...] = jnp.zeros_like(acc_sc)

    @pl.loop(0, n_kv)
    def _(step):
        off = pl.multiple_of(step * tkv, tkv)
        k = k_ref[pl.ds(off, tkv), :]               # (tkv, C) bf16, VMEM-resident
        v = v_ref[pl.ds(off, tkv), :]
        # scores (tq, tkv): contract channel dim directly (no transpose copy);
        # sm_scale is already folded into Q at the projection.
        s = jax.lax.dot_general(q_ref[...], k, (((1,), (1,)), ((), ())),
                                preferred_element_type=jnp.float32)
        m_prev = m_sc[...]                           # (tq, 128) lane-dense
        m_curr = jnp.max(s, axis=-1, keepdims=True)  # (tq, 1)
        m_next = jnp.maximum(m_prev, m_curr)         # (tq, 128)
        alpha = jnp.exp(m_prev - m_next)
        # TODO(synk): keep this exp in f32 on v5e (no bf16 EUP on that chip).
        p = jnp.exp((s - m_next[:, :1]).astype(jnp.bfloat16))    # (tq, tkv) bf16
        row_sum = jnp.sum(p.astype(jnp.float32), axis=-1, keepdims=True)
        l_sc[...] = alpha * l_sc[...] + row_sum
        acc_sc[...] = acc_sc[...] * alpha[:, :1] + jnp.dot(
            p, v, preferred_element_type=jnp.float32)
        m_sc[...] = m_next

    inv_l = pl.reciprocal(l_sc[...][:, :1], approx=True)          # (tq, 1)
    attn = (acc_sc[...] * inv_l).astype(jnp.bfloat16)             # (tq, C)
    out = jnp.dot(attn, wo_ref[...],
                  preferred_element_type=jnp.float32) + bo_ref[...]
    # fused NHWC->NCHW epilogue: transpose the tile and add the NCHW residual.
    o_ref[...] = (jnp.transpose(out, (1, 0)) + res_ref[...]).astype(o_ref.dtype)


def flash_attn_out(qkv, w_out_t, b_out, residual_nc, *, tq, tkv, vmem_limit):
    n, hw, c3 = qkv.shape
    c = c3 // 3
    kern = functools.partial(_attn_out_kernel, tkv=tkv)
    return pl.pallas_call(
        kern,
        out_shape=jax.ShapeDtypeStruct((n, c, hw), jnp.float32),
        grid=(n, hw // tq),
        in_specs=[
            pl.BlockSpec((None, tq, c), lambda b, qi: (b, qi, 0)),   # Q tile
            pl.BlockSpec((None, hw, c), lambda b, qi: (b, 0, 1)),    # K (resident)
            pl.BlockSpec((None, hw, c), lambda b, qi: (b, 0, 2)),    # V (resident)
            pl.BlockSpec((c, c), lambda b, qi: (0, 0)),
            pl.BlockSpec((1, c), lambda b, qi: (0, 0)),
            pl.BlockSpec((None, c, tq), lambda b, qi: (b, 0, qi)),   # residual NCHW
        ],
        out_specs=pl.BlockSpec((None, c, tq), lambda b, qi: (b, 0, qi)),
        scratch_shapes=[pltpu.VMEM((tq, 128), jnp.float32),
                        pltpu.VMEM((tq, 128), jnp.float32),
                        pltpu.VMEM((tq, c), jnp.float32)],
        compiler_params=pltpu.CompilerParams(
            dimension_semantics=("parallel", "parallel"),
            vmem_limit_bytes=vmem_limit),
    )(qkv, qkv, qkv, w_out_t, b_out, residual_nc)


# ----------------------------------------------------------------------------
# Full VAE_AttentionBlock forward (public API: NCHW in / NCHW out).
# ----------------------------------------------------------------------------
def vae_attention_block(x_nchw, params, *, num_groups=32, eps=1e-5):
    n, c, h, w = x_nchw.shape
    hw = h * w
    x_nc = x_nchw.reshape(n, c, hw)                 # contiguous view; no transpose

    vmem_limit, tile_target = _vmem_budget()
    t_hw = _pick_tile(hw, tile_target, 128)
    tm = _pick_tile(hw, tile_target, 8)
    tq = _pick_tile(hw, tile_target, 128)
    tkv = _pick_tile(hw, min(tile_target, 512), 128)
    # keep at least 2 parallel grid blocks so both v7x TensorCores get work
    if n * (hw // tq) < 2 and tq > 128:
        tq = _pick_tile(hw, tq // 2, 128)

    # 1) GroupNorm statistics + fused NCHW->NHWC bf16 copy of x.
    csum, csq, x_nhwc = gn_stats_nchw(x_nc, t_hw=t_hw, vmem_limit=vmem_limit)
    scale, shift = gn_affine_coeffs(csum, csq, params["gn_w"], params["gn_b"],
                                    hw, num_groups, eps)

    # 2) Fused GroupNorm-affine + packed QKV projection (y = x W^T + b).
    #    sm_scale folded into the Q columns of W/b -> zero kernel cost.
    sm_scale = 1.0 / (c ** 0.5)
    col_scale = jnp.concatenate([jnp.full((c,), sm_scale, jnp.float32),
                                 jnp.ones((2 * c,), jnp.float32)])
    w_qkv_t = (jnp.transpose(params["in_proj_w"]).astype(jnp.float32)
               * col_scale[None, :]).astype(jnp.bfloat16)              # (C, 3C)
    b_qkv = (params["in_proj_b"].reshape(1, 3 * c).astype(jnp.float32)
             * col_scale[None, :])
    qkv = gn_qkv(x_nhwc, scale, shift, w_qkv_t, b_qkv, tm=tm,
                 vmem_limit=vmem_limit)

    # 3) Flash attention (1 head, d_head = C) with VMEM-resident K/V,
    #    out_proj + residual add + NCHW write fused into the epilogue.
    w_out_t = jnp.transpose(params["out_proj_w"]).astype(jnp.bfloat16)  # (C, C)
    b_out = params["out_proj_b"].reshape(1, c).astype(jnp.float32)
    out_nc = flash_attn_out(qkv, w_out_t, b_out, x_nc,
                            tq=tq, tkv=tkv, vmem_limit=vmem_limit)
    return out_nc.reshape(n, c, h, w)


# ----------------------------------------------------------------------------
# Pure-JAX reference (sanity check of the Pallas path).
# ----------------------------------------------------------------------------
def _ref_forward(x, params, *, num_groups=32, eps=1e-5):
    n, c, h, w = x.shape
    xr = x.reshape(n, num_groups, c // num_groups, h, w)
    mu = xr.mean(axis=(2, 3, 4), keepdims=True)
    var = xr.var(axis=(2, 3, 4), keepdims=True)
    xn = ((xr - mu) / jnp.sqrt(var + eps)).reshape(n, c, h, w)
    xn = xn * params["gn_w"].reshape(1, c, 1, 1) + params["gn_b"].reshape(1, c, 1, 1)

    t = jnp.transpose(xn.reshape(n, c, h * w), (0, 2, 1))        # (n, hw, c)
    qkv = t @ params["in_proj_w"].T + params["in_proj_b"]
    q, k, v = jnp.split(qkv, 3, axis=-1)
    s = (q @ jnp.swapaxes(k, -1, -2)) / jnp.sqrt(jnp.float32(c))
    p = jax.nn.softmax(s, axis=-1)
    o = p @ v
    o = o @ params["out_proj_w"].T + params["out_proj_b"]
    o = jnp.transpose(o, (0, 2, 1)).reshape(n, c, h, w)
    return o + x


if __name__ == "__main__":
    # GroupNorm(32, C) requires C % 32 == 0; C=128 also keeps lanes dense.
    N, C, H, W = 2, 128, 16, 16

    key = jax.random.PRNGKey(0)
    ks = jax.random.split(key, 8)
    params = {
        "gn_w": 1.0 + 0.1 * jax.random.normal(ks[0], (C,), jnp.float32),
        "gn_b": 0.1 * jax.random.normal(ks[1], (C,), jnp.float32),
        "in_proj_w": 0.05 * jax.random.normal(ks[2], (3 * C, C), jnp.float32),
        "in_proj_b": 0.02 * jax.random.normal(ks[3], (3 * C,), jnp.float32),
        "out_proj_w": 0.05 * jax.random.normal(ks[4], (C, C), jnp.float32),
        "out_proj_b": 0.02 * jax.random.normal(ks[5], (C,), jnp.float32),
    }
    x = jax.random.normal(ks[6], (N, C, H, W), jnp.float32)

    out = jax.block_until_ready(jax.jit(vae_attention_block)(x, params))
    ref = jax.block_until_ready(_ref_forward(x, params))

    assert out.shape == (N, C, H, W), out.shape
    max_err = float(jnp.max(jnp.abs(out - ref)))
    assert jnp.allclose(out, ref, rtol=5e-2, atol=5e-2), max_err

    print("KERNEL_OK")
</pallas_src>

<mosaic_0001>
module attributes {stable_mosaic.version = 11 : i64} {
  func.func @_gn_stats_kernel(%arg0: i32, %arg1: i32, %arg2: memref<1x128x256xf32, #tpu.memory_space<vmem>>, %arg3: memref<1x1x128xf32, #tpu.memory_space<vmem>>, %arg4: memref<1x1x128xf32, #tpu.memory_space<vmem>>, %arg5: memref<1x256x128xbf16, #tpu.memory_space<vmem>>, %arg6: memref<8x128xf32, #tpu.memory_space<vmem>>, %arg7: memref<8x128xf32, #tpu.memory_space<vmem>>) attributes {dimension_semantics = [#tpu.dimension_semantics<parallel>, #tpu.dimension_semantics<arbitrary>], iteration_bounds = array<i64: 2, 1>, scalar_prefetch = 0 : i64, scratch_operands = 2 : i64, tpu.core_type = #tpu.core_type<tc>, window_params = [{transform_indices = @transform_0, window_bounds = array<i64: 1, 128, 256>}, {transform_indices = @transform_1, window_bounds = array<i64: 1, 1, 128>}, {transform_indices = @transform_2, window_bounds = array<i64: 1, 1, 128>}, {transform_indices = @transform_3, window_bounds = array<i64: 1, 256, 128>}]} {
    %c0_i32 = arith.constant 0 : i32
    %0 = arith.cmpi eq, %arg1, %c0_i32 : i32
    %1 = arith.extui %0 : i1 to i32
    %c0_i32_0 = arith.constant 0 : i32
    %2 = arith.cmpi ne, %1, %c0_i32_0 : i32
    scf.if %2 {
      %cst_17 = arith.constant 0.000000e+00 : f32
      %23 = vector.broadcast %cst_17 : f32 to vector<8x128xf32>
      %c0_18 = arith.constant 0 : index
      %c0_19 = arith.constant 0 : index
      %24 = vector.load %arg6[%c0_18, %c0_19] : memref<8x128xf32, #tpu.memory_space<vmem>>, vector<8x128xf32>
      tpu.vector_store %arg6[%c0_18, %c0_19], %23 {strides = array<i32>} : memref<8x128xf32, #tpu.memory_space<vmem>>, vector<8x128xf32>,
      %cst_20 = arith.constant 0.000000e+00 : f32
      %25 = vector.broadcast %cst_20 : f32 to vector<8x128xf32>
      %c0_21 = arith.constant 0 : index
      %c0_22 = arith.constant 0 : index
      %26 = vector.load %arg7[%c0_21, %c0_22] : memref<8x128xf32, #tpu.memory_space<vmem>>, vector<8x128xf32>
      tpu.vector_store %arg7[%c0_21, %c0_22], %25 {strides = array<i32>} : memref<8x128xf32, #tpu.memory_space<vmem>>, vector<8x128xf32>,
    } else {
    }
    %c0 = arith.constant 0 : index
    %c0_1 = arith.constant 0 : index
    %c0_2 = arith.constant 0 : index
    %3 = vector.load %arg2[%c0, %c0_1, %c0_2] : memref<1x128x256xf32, #tpu.memory_space<vmem>>, vector<1x128x256xf32>
    %4 = vector.shape_cast %3 : vector<1x128x256xf32> to vector<128x256xf32>
    %5 = tpu.transpose %4, [1, 0] : vector<128x256xf32> -> vector<256x128xf32>
    %6 = arith.truncf %5 : vector<256x128xf32> to vector<256x128xbf16>
    %c0_3 = arith.constant 0 : index
    %c0_4 = arith.constant 0 : index
    %c0_5 = arith.constant 0 : index
    %7 = vector.load %arg5[%c0_3, %c0_4, %c0_5] : memref<1x256x128xbf16, #tpu.memory_space<vmem>>, vector<1x256x128xbf16>
    %8 = vector.shape_cast %7 : vector<1x256x128xbf16> to vector<256x128xbf16>
    %9 = vector.shape_cast %6 : vector<256x128xbf16> to vector<1x256x128xbf16>
    tpu.vector_store %arg5[%c0_3, %c0_4, %c0_5], %9 {strides = array<i32>} : memref<1x256x128xbf16, #tpu.memory_space<vmem>>, vector<1x256x128xbf16>,
    %10 = vector.shape_cast %5 : vector<256x128xf32> to vector<32x8x128xf32>
    %c0_6 = arith.constant 0 : index
    %c0_7 = arith.constant 0 : index
    %11 = vector.load %arg6[%c0_6, %c0_7] : memref<8x128xf32, #tpu.memory_space<vmem>>, vector<8x128xf32>
    %cst = arith.constant dense<0.000000e+00> : vector<8x128xf32>
    %12 = vector.multi_reduction <add>, %10, %cst [0] : vector<32x8x128xf32> to vector<8x128xf32>
    %13 = arith.addf %11, %12 : vector<8x128xf32>
    %c0_8 = arith.constant 0 : index
    %c0_9 = arith.constant 0 : index
    %14 = vector.load %arg6[%c0_8, %c0_9] : memref<8x128xf32, #tpu.memory_space<vmem>>, vector<8x128xf32>
    tpu.vector_store %arg6[%c0_8, %c0_9], %13 {strides = array<i32>} : memref<8x128xf32, #tpu.memory_space<vmem>>, vector<8x128xf32>,
    %c0_10 = arith.constant 0 : index
    %c0_11 = arith.constant 0 : index
    %15 = vector.load %arg7[%c0_10, %c0_11] : memref<8x128xf32, #tpu.memory_space<vmem>>, vector<8x128xf32>
    %16 = arith.mulf %10, %10 : vector<32x8x128xf32>
    %cst_12 = arith.constant dense<0.000000e+00> : vector<8x128xf32>
    %17 = vector.multi_reduction <add>, %16, %cst_12 [0] : vector<32x8x128xf32> to vector<8x128xf32>
    %18 = arith.addf %15, %17 : vector<8x128xf32>
    %c0_13 = arith.constant 0 : index
    %c0_14 = arith.constant 0 : index
    %19 = vector.load %arg7[%c0_13, %c0_14] : memref<8x128xf32, #tpu.memory_space<vmem>>, vector<8x128xf32>
    tpu.vector_store %arg7[%c0_13, %c0_14], %18 {strides = array<i32>} : memref<8x128xf32, #tpu.memory_space<vmem>>, vector<8x128xf32>,
    %c0_i32_15 = arith.constant 0 : i32
    %20 = arith.cmpi eq, %arg1, %c0_i32_15 : i32
    %21 = arith.extui %20 : i1 to i32
    %c0_i32_16 = arith.constant 0 : i32
    %22 = arith.cmpi ne, %21, %c0_i32_16 : i32
    scf.if %22 {
      %c0_17 = arith.constant 0 : index
      %c0_18 = arith.constant 0 : index
      %23 = vector.load %arg6[%c0_17, %c0_18] : memref<8x128xf32, #tpu.memory_space<vmem>>, vector<8x128xf32>
      %cst_19 = arith.constant dense<0.000000e+00> : vector<128xf32>
      %24 = vector.multi_reduction <add>, %23, %cst_19 [0] : vector<8x128xf32> to vector<128xf32>
      %25 = vector.shape_cast %24 : vector<128xf32> to vector<1x128xf32>
      %c0_20 = arith.constant 0 : index
      %c0_21 = arith.constant 0 : index
      %c0_22 = arith.constant 0 : index
      %26 = vector.load %arg3[%c0_20, %c0_21, %c0_22] : memref<1x1x128xf32, #tpu.memory_space<vmem>>, vector<1x1x128xf32>
      %27 = vector.shape_cast %26 : vector<1x1x128xf32> to vector<1x128xf32>
      %28 = vector.shape_cast %25 : vector<1x128xf32> to vector<1x1x128xf32>
      tpu.vector_store %arg3[%c0_20, %c0_21, %c0_22], %28 {strides = array<i32>} : memref<1x1x128xf32, #tpu.memory_space<vmem>>, vector<1x1x128xf32>,
      %c0_23 = arith.constant 0 : index
      %c0_24 = arith.constant 0 : index
      %29 = vector.load %arg7[%c0_23, %c0_24] : memref<8x128xf32, #tpu.memory_space<vmem>>, vector<8x128xf32>
      %cst_25 = arith.constant dense<0.000000e+00> : vector<128xf32>
      %30 = vector.multi_reduction <add>, %29, %cst_25 [0] : vector<8x128xf32> to vector<128xf32>
      %31 = vector.shape_cast %30 : vector<128xf32> to vector<1x128xf32>
      %c0_26 = arith.constant 0 : index
      %c0_27 = arith.constant 0 : index
      %c0_28 = arith.constant 0 : index
      %32 = vector.load %arg4[%c0_26, %c0_27, %c0_28] : memref<1x1x128xf32, #tpu.memory_space<vmem>>, vector<1x1x128xf32>
      %33 = vector.shape_cast %32 : vector<1x1x128xf32> to vector<1x128xf32>
      %34 = vector.shape_cast %31 : vector<1x128xf32> to vector<1x1x128xf32>
      tpu.vector_store %arg4[%c0_26, %c0_27, %c0_28], %34 {strides = array<i32>} : memref<1x1x128xf32, #tpu.memory_space<vmem>>, vector<1x1x128xf32>,
    } else {
    }
    return
  }
  func.func @transform_0(%arg0: i32, %arg1: i32) -> (i32, i32, i32) {
    %c0_i32 = arith.constant 0 : i32
    %c0_i32_0 = arith.constant 0 : i32
    return %arg0, %c0_i32, %arg1 : i32, i32, i32
  }
  func.func @transform_1(%arg0: i32, %arg1: i32) -> (i32, i32, i32) {
    %c0_i32 = arith.constant 0 : i32
    %c0_i32_0 = arith.constant 0 : i32
    %c0_i32_1 = arith.constant 0 : i32
    return %arg0, %c0_i32, %c0_i32_0 : i32, i32, i32
  }
  func.func @transform_2(%arg0: i32, %arg1: i32) -> (i32, i32, i32) {
    %c0_i32 = arith.constant 0 : i32
    %c0_i32_0 = arith.constant 0 : i32
    %c0_i32_1 = arith.constant 0 : i32
    return %arg0, %c0_i32, %c0_i32_0 : i32, i32, i32
  }
  func.func @transform_3(%arg0: i32, %arg1: i32) -> (i32, i32, i32) {
    %c0_i32 = arith.constant 0 : i32
    %c0_i32_0 = arith.constant 0 : i32
    return %arg0, %arg1, %c0_i32 : i32, i32, i32
  }
}

module attributes {stable_mosaic.version = 11 : i64} {
  func.func @_attn_out_kernel(%arg0: i32, %arg1: i32, %arg2: memref<1x256x128xbf16, #tpu.memory_space<vmem>>, %arg3: memref<1x256x128xbf16, #tpu.memory_space<vmem>>, %arg4: memref<1x256x128xbf16, #tpu.memory_space<vmem>>, %arg5: memref<128x128xbf16, #tpu.memory_space<vmem>>, %arg6: memref<1x128xf32, #tpu.memory_space<vmem>>, %arg7: memref<1x128x256xf32, #tpu.memory_space<vmem>>, %arg8: memref<1x128x256xf32, #tpu.memory_space<vmem>>, %arg9: memref<256x128xf32, #tpu.memory_space<vmem>>, %arg10: memref<256x128xf32, #tpu.memory_space<vmem>>, %arg11: memref<256x128xf32, #tpu.memory_space<vmem>>) attributes {dimension_semantics = [#tpu.dimension_semantics<parallel>, #tpu.dimension_semantics<parallel>], iteration_bounds = array<i64: 2, 1>, scalar_prefetch = 0 : i64, scratch_operands = 3 : i64, tpu.core_type = #tpu.core_type<tc>, window_params = [{transform_indices = @transform_0, window_bounds = array<i64: 1, 256, 128>}, {transform_indices = @transform_1, window_bounds = array<i64: 1, 256, 128>}, {transform_indices = @transform_2, window_bounds = array<i64: 1, 256, 128>}, {pipeline_mode = #tpu.pipeline_mode<synchronous>, transform_indices = @transform_3, window_bounds = array<i64: 128, 128>}, {pipeline_mode = #tpu.pipeline_mode<synchronous>, transform_indices = @transform_4, window_bounds = array<i64: 1, 128>}, {transform_indices = @transform_5, window_bounds = array<i64: 1, 128, 256>}, {transform_indices = @transform_6, window_bounds = array<i64: 1, 128, 256>}]} {
    %cst = arith.constant 0xFF800000 : f32
    %0 = vector.broadcast %cst : f32 to vector<256x128xf32>
    %c0 = arith.constant 0 : index
    %c0_0 = arith.constant 0 : index
    %1 = vector.load %arg9[%c0, %c0_0] : memref<256x128xf32, #tpu.memory_space<vmem>>, vector<256x128xf32>
    tpu.vector_store %arg9[%c0, %c0_0], %0 {strides = array<i32>} : memref<256x128xf32, #tpu.memory_space<vmem>>, vector<256x128xf32>,
    %cst_1 = arith.constant 0.000000e+00 : f32
    %2 = vector.broadcast %cst_1 : f32 to vector<256x128xf32>
    %c0_2 = arith.constant 0 : index
    %c0_3 = arith.constant 0 : index
    %3 = vector.load %arg10[%c0_2, %c0_3] : memref<256x128xf32, #tpu.memory_space<vmem>>, vector<256x128xf32>
    tpu.vector_store %arg10[%c0_2, %c0_3], %2 {strides = array<i32>} : memref<256x128xf32, #tpu.memory_space<vmem>>, vector<256x128xf32>,
    %cst_4 = arith.constant 0.000000e+00 : f32
    %4 = vector.broadcast %cst_4 : f32 to vector<256x128xf32>
    %c0_5 = arith.constant 0 : index
    %c0_6 = arith.constant 0 : index
    %5 = vector.load %arg11[%c0_5, %c0_6] : memref<256x128xf32, #tpu.memory_space<vmem>>, vector<256x128xf32>
    tpu.vector_store %arg11[%c0_5, %c0_6], %4 {strides = array<i32>} : memref<256x128xf32, #tpu.memory_space<vmem>>, vector<256x128xf32>,
    %c0_i32 = arith.constant 0 : i32
    %c1_i32 = arith.constant 1 : i32
    %6 = arith.muli %c0_i32, %c1_i32 : i32
    %c0_i32_7 = arith.constant 0 : i32
    %7 = arith.addi %c0_i32_7, %6 : i32
    %c256_i32 = arith.constant 256 : i32
    %8 = arith.muli %7, %c256_i32 : i32
    %9 = tpu.assume_multiple %8, 256 : i32
    %c0_8 = arith.constant 0 : index
    %10 = arith.index_cast %9 : i32 to index
    %c0_9 = arith.constant 0 : index
    %11 = vector.load %arg3[%c0_8, %10, %c0_9] : memref<1x256x128xbf16, #tpu.memory_space<vmem>>, vector<1x256x128xbf16>
    %12 = vector.shape_cast %11 : vector<1x256x128xbf16> to vector<256x128xbf16>
    %c0_10 = arith.constant 0 : index
    %13 = arith.index_cast %9 : i32 to index
    %c0_11 = arith.constant 0 : index
    %14 = vector.load %arg4[%c0_10, %13, %c0_11] : memref<1x256x128xbf16, #tpu.memory_space<vmem>>, vector<1x256x128xbf16>
    %15 = vector.shape_cast %14 : vector<1x256x128xbf16> to vector<256x128xbf16>
    %c0_12 = arith.constant 0 : index
    %c0_13 = arith.constant 0 : index
    %c0_14 = arith.constant 0 : index
    %16 = vector.load %arg2[%c0_12, %c0_13, %c0_14] : memref<1x256x128xbf16, #tpu.memory_space<vmem>>, vector<1x256x128xbf16>
    %17 = vector.shape_cast %16 : vector<1x256x128xbf16> to vector<256x128xbf16>
    %cst_15 = arith.constant dense<0.000000e+00> : vector<256x256xf32>
    %18 = tpu.matmul %17, %12, %cst_15 {dimension_numbers = #tpu.dot_dimension_numbers<[1], [1], [0], [0], [0, 0, 1, 0], [], []>} : vector<256x128xbf16>, vector<256x128xbf16>, vector<256x256xf32> -> vector<256x256xf32>
    %c0_16 = arith.constant 0 : index
    %c0_17 = arith.constant 0 : index
    %19 = vector.load %arg9[%c0_16, %c0_17] : memref<256x128xf32, #tpu.memory_space<vmem>>, vector<256x128xf32>
    %cst_18 = arith.constant dense<0xFF800000> : vector<256xf32>
    %20 = vector.multi_reduction <maximumf>, %18, %cst_18 [1] : vector<256x256xf32> to vector<256xf32>
    %21 = vector.shape_cast %20 : vector<256xf32> to vector<256x1xf32>
    %22 = vector.broadcast %21 : vector<256x1xf32> to vector<256x128xf32>
    %23 = arith.maximumf %19, %22 : vector<256x128xf32>
    %24 = arith.subf %19, %23 : vector<256x128xf32>
    %25 = math.exp %24 : vector<256x128xf32>
    %26 = vector.extract_strided_slice %23 {offsets = [0, 0], sizes = [256, 1], strides = [1, 1]} : vector<256x128xf32> to vector<256x1xf32>
    %27 = vector.broadcast %26 : vector<256x1xf32> to vector<256x256xf32>
    %28 = arith.subf %18, %27 : vector<256x256xf32>
    %29 = arith.truncf %28 : vector<256x256xf32> to vector<256x256xbf16>
    %30 = math.exp %29 : vector<256x256xbf16>
    %31 = arith.extf %30 : vector<256x256xbf16> to vector<256x256xf32>
    %cst_19 = arith.constant dense<0.000000e+00> : vector<256xf32>
    %32 = vector.multi_reduction <add>, %31, %cst_19 [1] : vector<256x256xf32> to vector<256xf32>
    %33 = vector.shape_cast %32 : vector<256xf32> to vector<256x1xf32>
    %c0_20 = arith.constant 0 : index
    %c0_21 = arith.constant 0 : index
    %34 = vector.load %arg10[%c0_20, %c0_21] : memref<256x128xf32, #tpu.memory_space<vmem>>, vector<256x128xf32>
    %35 = arith.mulf %25, %34 : vector<256x128xf32>
    %36 = vector.broadcast %33 : vector<256x1xf32> to vector<256x128xf32>
    %37 = arith.addf %35, %36 : vector<256x128xf32>
    %c0_22 = arith.constant 0 : index
    %c0_23 = arith.constant 0 : index
    %38 = vector.load %arg10[%c0_22, %c0_23] : memref<256x128xf32, #tpu.memory_space<vmem>>, vector<256x128xf32>
    tpu.vector_store %arg10[%c0_22, %c0_23], %37 {strides = array<i32>} : memref<256x128xf32, #tpu.memory_space<vmem>>, vector<256x128xf32>,
    %c0_24 = arith.constant 0 : index
    %c0_25 = arith.constant 0 : index
    %39 = vector.load %arg11[%c0_24, %c0_25] : memref<256x128xf32, #tpu.memory_space<vmem>>, vector<256x128xf32>
    %40 = vector.extract_strided_slice %25 {offsets = [0, 0], sizes = [256, 1], strides = [1, 1]} : vector<256x128xf32> to vector<256x1xf32>
    %41 = vector.broadcast %40 : vector<256x1xf32> to vector<256x128xf32>
    %42 = arith.mulf %39, %41 : vector<256x128xf32>
    %cst_26 = arith.constant dense<0.000000e+00> : vector<256x128xf32>
    %43 = tpu.matmul %30, %15, %cst_26 {dimension_numbers = #tpu.dot_dimension_numbers<[1], [0], [0], [1], [0, 0, 1, 1], [], []>} : vector<256x256xbf16>, vector<256x128xbf16>, vector<256x128xf32> -> vector<256x128xf32>
    %44 = arith.addf %42, %43 : vector<256x128xf32>
    %c0_27 = arith.constant 0 : index
    %c0_28 = arith.constant 0 : index
    %45 = vector.load %arg11[%c0_27, %c0_28] : memref<256x128xf32, #tpu.memory_space<vmem>>, vector<256x128xf32>
    tpu.vector_store %arg11[%c0_27, %c0_28], %44 {strides = array<i32>} : memref<256x128xf32, #tpu.memory_space<vmem>>, vector<256x128xf32>,
    %c0_29 = arith.constant 0 : index
    %c0_30 = arith.constant 0 : index
    %46 = vector.load %arg9[%c0_29, %c0_30] : memref<256x128xf32, #tpu.memory_space<vmem>>, vector<256x128xf32>
    tpu.vector_store %arg9[%c0_29, %c0_30], %23 {strides = array<i32>} : memref<256x128xf32, #tpu.memory_space<vmem>>, vector<256x128xf32>,
    %c1_i32_31 = arith.constant 1 : i32
    %c0_32 = arith.constant 0 : index
    %c0_33 = arith.constant 0 : index
    %47 = vector.load %arg10[%c0_32, %c0_33] : memref<256x128xf32, #tpu.memory_space<vmem>>, vector<256x128xf32>
    %48 = vector.extract_strided_slice %47 {offsets = [0, 0], sizes = [256, 1], strides = [1, 1]} : vector<256x128xf32> to vector<256x1xf32>
    %49 = tpu.reciprocal %48 {approx = true} : vector<256x1xf32> -> vector<256x1xf32>
    %c0_34 = arith.constant 0 : index
    %c0_35 = arith.constant 0 : index
    %50 = vector.load %arg11[%c0_34, %c0_35] : memref<256x128xf32, #tpu.memory_space<vmem>>, vector<256x128xf32>
    %51 = vector.broadcast %49 : vector<256x1xf32> to vector<256x128xf32>
    %52 = arith.mulf %50, %51 : vector<256x128xf32>
    %53 = arith.truncf %52 : vector<256x128xf32> to vector<256x128xbf16>
    %c0_36 = arith.constant 0 : index
    %c0_37 = arith.constant 0 : index
    %54 = vector.load %arg5[%c0_36, %c0_37] : memref<128x128xbf16, #tpu.memory_space<vmem>>, vector<128x128xbf16>
    %cst_38 = arith.constant dense<0.000000e+00> : vector<256x128xf32>
    %55 = tpu.matmul %53, %54, %cst_38 {dimension_numbers = #tpu.dot_dimension_numbers<[1], [0], [0], [1], [0, 0, 1, 1], [], []>} : vector<256x128xbf16>, vector<128x128xbf16>, vector<256x128xf32> -> vector<256x128xf32>
    %c0_39 = arith.constant 0 : index
    %c0_40 = arith.constant 0 : index
    %56 = vector.load %arg6[%c0_39, %c0_40] : memref<1x128xf32, #tpu.memory_space<vmem>>, vector<1x128xf32>
    %57 = vector.broadcast %56 : vector<1x128xf32> to vector<256x128xf32>
    %58 = arith.addf %55, %57 : vector<256x128xf32>
    %59 = tpu.transpose %58, [1, 0] : vector<256x128xf32> -> vector<128x256xf32>
    %c0_41 = arith.constant 0 : index
    %c0_42 = arith.constant 0 : index
    %c0_43 = arith.constant 0 : index
    %60 = vector.load %arg7[%c0_41, %c0_42, %c0_43] : memref<1x128x256xf32, #tpu.memory_space<vmem>>, vector<1x128x256xf32>
    %61 = vector.shape_cast %60 : vector<1x128x256xf32> to vector<128x256xf32>
    %62 = arith.addf %59, %61 : vector<128x256xf32>
    %c0_44 = arith.constant 0 : index
    %c0_45 = arith.constant 0 : index
    %c0_46 = arith.constant 0 : index
    %63 = vector.load %arg8[%c0_44, %c0_45, %c0_46] : memref<1x128x256xf32, #tpu.memory_space<vmem>>, vector<1x128x256xf32>
    %64 = vector.shape_cast %63 : vector<1x128x256xf32> to vector<128x256xf32>
    %65 = vector.shape_cast %62 : vector<128x256xf32> to vector<1x128x256xf32>
    tpu.vector_store %arg8[%c0_44, %c0_45, %c0_46], %65 {strides = array<i32>} : memref<1x128x256xf32, #tpu.memory_space<vmem>>, vector<1x128x256xf32>,
    return
  }
  func.func @transform_0(%arg0: i32, %arg1: i32) -> (i32, i32, i32) {
    %c0_i32 = arith.constant 0 : i32
    %c0_i32_0 = arith.constant 0 : i32
    return %arg0, %arg1, %c0_i32 : i32, i32, i32
  }
  func.func @transform_1(%arg0: i32, %arg1: i32) -> (i32, i32, i32) {
    %c0_i32 = arith.constant 0 : i32
    %c1_i32 = arith.constant 1 : i32
    %c0_i32_0 = arith.constant 0 : i32
    return %arg0, %c0_i32, %c1_i32 : i32, i32, i32
  }
  func.func @transform_2(%arg0: i32, %arg1: i32) -> (i32, i32, i32) {
    %c0_i32 = arith.constant 0 : i32
    %c2_i32 = arith.constant 2 : i32
    %c0_i32_0 = arith.constant 0 : i32
    return %arg0, %c0_i32, %c2_i32 : i32, i32, i32
  }
  func.func @transform_3(%arg0: i32, %arg1: i32) -> (i32, i32) {
    %c0_i32 = arith.constant 0 : i32
    %c0_i32_0 = arith.constant 0 : i32
    %c0_i32_1 = arith.constant 0 : i32
    return %c0_i32, %c0_i32_0 : i32, i32
  }
  func.func @transform_4(%arg0: i32, %arg1: i32) -> (i32, i32) {
    %c0_i32 = arith.constant 0 : i32
    %c0_i32_0 = arith.constant 0 : i32
    %c0_i32_1 = arith.constant 0 : i32
    return %c0_i32, %c0_i32_0 : i32, i32
  }
  func.func @transform_5(%arg0: i32, %arg1: i32) -> (i32, i32, i32) {
    %c0_i32 = arith.constant 0 : i32
    %c0_i32_0 = arith.constant 0 : i32
    return %arg0, %c0_i32, %arg1 : i32, i32, i32
  }
  func.func @transform_6(%arg0: i32, %arg1: i32) -> (i32, i32, i32) {
    %c0_i32 = arith.constant 0 : i32
    %c0_i32_0 = arith.constant 0 : i32
    return %arg0, %c0_i32, %arg1 : i32, i32, i32
  }
}

module attributes {stable_mosaic.version = 11 : i64} {
  func.func @_gn_qkv_kernel(%arg0: i32, %arg1: i32, %arg2: memref<1x256x128xbf16, #tpu.memory_space<vmem>>, %arg3: memref<1x1x128xf32, #tpu.memory_space<vmem>>, %arg4: memref<1x1x128xf32, #tpu.memory_space<vmem>>, %arg5: memref<128x384xbf16, #tpu.memory_space<vmem>>, %arg6: memref<1x384xf32, #tpu.memory_space<vmem>>, %arg7: memref<1x256x384xbf16, #tpu.memory_space<vmem>>) attributes {dimension_semantics = [#tpu.dimension_semantics<parallel>, #tpu.dimension_semantics<parallel>], iteration_bounds = array<i64: 2, 1>, scalar_prefetch = 0 : i64, scratch_operands = 0 : i64, tpu.core_type = #tpu.core_type<tc>, window_params = [{transform_indices = @transform_0, window_bounds = array<i64: 1, 256, 128>}, {transform_indices = @transform_1, window_bounds = array<i64: 1, 1, 128>}, {transform_indices = @transform_2, window_bounds = array<i64: 1, 1, 128>}, {pipeline_mode = #tpu.pipeline_mode<synchronous>, transform_indices = @transform_3, window_bounds = array<i64: 128, 384>}, {pipeline_mode = #tpu.pipeline_mode<synchronous>, transform_indices = @transform_4, window_bounds = array<i64: 1, 384>}, {transform_indices = @transform_5, window_bounds = array<i64: 1, 256, 384>}]} {
    %c0 = arith.constant 0 : index
    %c0_0 = arith.constant 0 : index
    %c0_1 = arith.constant 0 : index
    %0 = vector.load %arg2[%c0, %c0_0, %c0_1] : memref<1x256x128xbf16, #tpu.memory_space<vmem>>, vector<1x256x128xbf16>
    %1 = vector.shape_cast %0 : vector<1x256x128xbf16> to vector<256x128xbf16>
    %2 = arith.extf %1 : vector<256x128xbf16> to vector<256x128xf32>
    %c0_2 = arith.constant 0 : index
    %c0_3 = arith.constant 0 : index
    %c0_4 = arith.constant 0 : index
    %3 = vector.load %arg3[%c0_2, %c0_3, %c0_4] : memref<1x1x128xf32, #tpu.memory_space<vmem>>, vector<1x1x128xf32>
    %4 = vector.shape_cast %3 : vector<1x1x128xf32> to vector<1x128xf32>
    %5 = vector.broadcast %4 : vector<1x128xf32> to vector<256x128xf32>
    %6 = arith.mulf %2, %5 : vector<256x128xf32>
    %c0_5 = arith.constant 0 : index
    %c0_6 = arith.constant 0 : index
    %c0_7 = arith.constant 0 : index
    %7 = vector.load %arg4[%c0_5, %c0_6, %c0_7] : memref<1x1x128xf32, #tpu.memory_space<vmem>>, vector<1x1x128xf32>
    %8 = vector.shape_cast %7 : vector<1x1x128xf32> to vector<1x128xf32>
    %9 = vector.broadcast %8 : vector<1x128xf32> to vector<256x128xf32>
    %10 = arith.addf %6, %9 : vector<256x128xf32>
    %11 = arith.truncf %10 : vector<256x128xf32> to vector<256x128xbf16>
    %c0_8 = arith.constant 0 : index
    %c0_9 = arith.constant 0 : index
    %12 = vector.load %arg5[%c0_8, %c0_9] : memref<128x384xbf16, #tpu.memory_space<vmem>>, vector<128x384xbf16>
    %cst = arith.constant dense<0.000000e+00> : vector<256x384xf32>
    %13 = tpu.matmul %11, %12, %cst {dimension_numbers = #tpu.dot_dimension_numbers<[1], [0], [0], [1], [0, 0, 1, 1], [], []>} : vector<256x128xbf16>, vector<128x384xbf16>, vector<256x384xf32> -> vector<256x384xf32>
    %c0_10 = arith.constant 0 : index
    %c0_11 = arith.constant 0 : index
    %14 = vector.load %arg6[%c0_10, %c0_11] : memref<1x384xf32, #tpu.memory_space<vmem>>, vector<1x384xf32>
    %15 = vector.broadcast %14 : vector<1x384xf32> to vector<256x384xf32>
    %16 = arith.addf %13, %15 : vector<256x384xf32>
    %17 = arith.truncf %16 : vector<256x384xf32> to vector<256x384xbf16>
    %c0_12 = arith.constant 0 : index
    %c0_13 = arith.constant 0 : index
    %c0_14 = arith.constant 0 : index
    %18 = vector.load %arg7[%c0_12, %c0_13, %c0_14] : memref<1x256x384xbf16, #tpu.memory_space<vmem>>, vector<1x256x384xbf16>
    %19 = vector.shape_cast %18 : vector<1x256x384xbf16> to vector<256x384xbf16>
    %20 = vector.shape_cast %17 : vector<256x384xbf16> to vector<1x256x384xbf16>
    tpu.vector_store %arg7[%c0_12, %c0_13, %c0_14], %20 {strides = array<i32>} : memref<1x256x384xbf16, #tpu.memory_space<vmem>>, vector<1x256x384xbf16>,
    return
  }
  func.func @transform_0(%arg0: i32, %arg1: i32) -> (i32, i32, i32) {
    %c0_i32 = arith.constant 0 : i32
    %c0_i32_0 = arith.constant 0 : i32
    return %arg0, %arg1, %c0_i32 : i32, i32, i32
  }
  func.func @transform_1(%arg0: i32, %arg1: i32) -> (i32, i32, i32) {
    %c0_i32 = arith.constant 0 : i32
    %c0_i32_0 = arith.constant 0 : i32
    %c0_i32_1 = arith.constant 0 : i32
    return %arg0, %c0_i32, %c0_i32_0 : i32, i32, i32
  }
  func.func @transform_2(%arg0: i32, %arg1: i32) -> (i32, i32, i32) {
    %c0_i32 = arith.constant 0 : i32
    %c0_i32_0 = arith.constant 0 : i32
    %c0_i32_1 = arith.constant 0 : i32
    return %arg0, %c0_i32, %c0_i32_0 : i32, i32, i32
  }
  func.func @transform_3(%arg0: i32, %arg1: i32) -> (i32, i32) {
    %c0_i32 = arith.constant 0 : i32
    %c0_i32_0 = arith.constant 0 : i32
    %c0_i32_1 = arith.constant 0 : i32
    return %c0_i32, %c0_i32_0 : i32, i32
  }
  func.func @transform_4(%arg0: i32, %arg1: i32) -> (i32, i32) {
    %c0_i32 = arith.constant 0 : i32
    %c0_i32_0 = arith.constant 0 : i32
    %c0_i32_1 = arith.constant 0 : i32
    return %c0_i32, %c0_i32_0 : i32, i32
  }
  func.func @transform_5(%arg0: i32, %arg1: i32) -> (i32, i32, i32) {
    %c0_i32 = arith.constant 0 : i32
    %c0_i32_0 = arith.constant 0 : i32
    return %arg0, %arg1, %c0_i32 : i32, i32, i32
  }
}

</mosaic_0001>

<bundles_post_ra>
// kernel: mul.0
= control target key start
LH: loop header
LB: loop body
LE: loop exit
PB: predicated region body
PF: predicated region fallthrough
CT: control target
= control target key end

     0   :  { %s34_s0 = inlined_call_operand.vmem [shape: f32[384], index: 0, kind: input, shape index: {}]   ;;  %s35_s1 = inlined_call_operand.vmem [shape: f32[384], index: 1, kind: input, shape index: {}]   ;;  %s36_s2 = inlined_call_operand.vmem [shape: f32[384], index: 2, kind: output, shape index: {}]  }
   0x1   :  { %v3_v0 = vld [vmem:[%s34_s0] sm:$0x7] }
   0x2   :  { %v4_v1 = vld [vmem:[%s35_s1] sm:$0x7] }
   0x3   :  { %v7_v2 = vmul.f32 %v4_v1, %v3_v0 }
   0x5   :  { %9 = vst [vmem:[%s36_s2] sm:$0xf] %v7_v2 }

// kernel: vae_attention_block.3
= control target key start
LH: loop header
LB: loop body
LE: loop exit
PB: predicated region body
PF: predicated region fallthrough
CT: control target
= control target key end

     0   :  { %s985_s12 = smov 0   ;;  %s987_s13 = smov 0   ;;  %s1166_s0 = inlined_call_operand.vmem [shape: f32[2,128,256], index: 0, kind: input, shape index: {}]   ;;  %s1167_s1 = inlined_call_operand.vmem [shape: f32[2,1,128], index: 1, kind: output, shape index: {0}]   ;;  %s1168_s2 = inlined_call_operand.vmem [shape: f32[2,1,128], index: 2, kind: output, shape index: {1}]   ;;  %s1169_s3 = inlined_call_operand.vmem [shape: bf16[2,256,128], index: 3, kind: output, shape index: {2}]  }
   0x1   :  { %s989_s14 = smov 0  }
   0x2 LB: > { %s26_s15 = sadd.s32 1, %s959_s13  ;;  %p749_p0 = scmp.ge.s32.totalorder %s963_s14, 1  ;;  %s963_s14 = sphi %s989_s14, %s14_s14   ;;  %s959_s13 = sphi %s987_s13, %s1171_s13   ;;  %s955_s12 = sphi %s985_s12, %s1170_s12  }
   0x3   : > { %p28_p1 = scmp.ge.s32.totalorder %s26_s15, 2  ;;  %p163_p2 = scmp.lt.s32.totalorder %s963_s14, 3 }
   0x5   : > { %s1173_s15 = smov (%p28_p1, %s26_s15), 0  ;;  %p164_p3 = pnand %p749_p0, %p163_p2 }
   0x6   : > { %p202_p4 = scmp.lt.s32.totalorder (!%p164_p3), %s955_s12, 1 }
   0x7   : > { %167 = sbr.rel (%p164_p3) target bundleno = 256 (0x100), region = 24 }
   0xe   : > { %s1175_s12 = smov (!%p202_p4, %s955_s12), 1 }
   0xf   : > { %s788_s16 = sshll.u32 %s1175_s12, 8  ;;  %s789_s20 = sshll.u32 %s1175_s12, 7 }
  0x10   : > { %s1009_s19 = scalar_lea.vmem %s1166_s0, %s788_s16  ;;  %s1049_s23 = scalar_lea.vmem %s1169_s3, %s789_s20 }
  0x11   : > { %v233_v0 = vld [vmem:[%s1009_s19] sm:$0xff]  ;;  %v235_v1 = vld [vmem:[%s1009_s19 + $0x10] sm:$0xff]  ;;  %v234_v2 = vld [vmem:[%s1009_s19 + $0x8] sm:$0xff]  ;;  %s213_s26 = scalar_lea.vmem %s1167_s1, %s1175_s12  ;;  %s216_s29 = scalar_lea.vmem %s1168_s2, %s1175_s12 }
  0x12   : > { %265 = vxpose.xlu0.b32.start [1/16] %v233_v0, 128  ;;  %297 = vxpose.xlu1.b32.start [1/16] %v234_v2, 128  ;;  %v236_v3 = vld [vmem:[%s1009_s19 + $0x18] sm:$0xff]  ;;  %v237_v4 = vld [vmem:[%s1009_s19 + $0x20] sm:$0xff]  ;;  %v238_v5 = vld [vmem:[%s1009_s19 + $0x28] sm:$0xff] }
  0x13   : > { %v239_v6 = vld [vmem:[%s1009_s19 + $0x30] sm:$0xff]  ;;  %v240_v7 = vld [vmem:[%s1009_s19 + $0x38] sm:$0xff]  ;;  %v241_v8 = vld [vmem:[%s1009_s19 + $0x40] sm:$0xff] }
  0x14   : > { %v242_v9 = vld [vmem:[%s1009_s19 + $0x48] sm:$0xff]  ;;  %v243_v10 = vld [vmem:[%s1009_s19 + $0x50] sm:$0xff]  ;;  %v244_v11 = vld [vmem:[%s1009_s19 + $0x58] sm:$0xff] }
  0x15   : > { %v245_v12 = vld [vmem:[%s1009_s19 + $0x60] sm:$0xff]  ;;  %v246_v13 = vld [vmem:[%s1009_s19 + $0x68] sm:$0xff]  ;;  %v247_v14 = vld [vmem:[%s1009_s19 + $0x70] sm:$0xff] }
  0x16   : > { %266 = vxpose.xlu0.b32.cont [2/16] %v235_v1, 128  ;;  %298 = vxpose.xlu1.b32.cont [2/16] %v236_v3, 128  ;;  %v248_v15 = vld [vmem:[%s1009_s19 + $0x78] sm:$0xff]  ;;  %v249_v16 = vld [vmem:[%s1009_s19 + $0x80] sm:$0xff]  ;;  %v250_v17 = vld [vmem:[%s1009_s19 + $0x88] sm:$0xff] }
  0x17   : > { %v251_v18 = vld [vmem:[%s1009_s19 + $0x90] sm:$0xff]  ;;  %v252_v19 = vld [vmem:[%s1009_s19 + $0x98] sm:$0xff]  ;;  %v253_v20 = vld [vmem:[%s1009_s19 + $0xa0] sm:$0xff] }
  0x18   : > { %v254_v21 = vld [vmem:[%s1009_s19 + $0xa8] sm:$0xff]  ;;  %v255_v22 = vld [vmem:[%s1009_s19 + $0xb0] sm:$0xff]  ;;  %v256_v23 = vld [vmem:[%s1009_s19 + $0xb8] sm:$0xff] }
  0x19   : > { %v257_v24 = vld [vmem:[%s1009_s19 + $0xc0] sm:$0xff]  ;;  %v258_v25 = vld [vmem:[%s1009_s19 + $0xc8] sm:$0xff]  ;;  %v259_v26 = vld [vmem:[%s1009_s19 + $0xd0] sm:$0xff] }
  0x1a   : > { %267 = vxpose.xlu0.b32.cont [3/16] %v237_v4, 128  ;;  %299 = vxpose.xlu1.b32.cont [3/16] %v238_v5, 128  ;;  %v260_v27 = vld [vmem:[%s1009_s19 + $0xd8] sm:$0xff]  ;;  %v261_v28 = vld [vmem:[%s1009_s19 + $0xe0] sm:$0xff]  ;;  %v262_v29 = vld [vmem:[%s1009_s19 + $0xe8] sm:$0xff] }
  0x1b   : > { %v263_v30 = vld [vmem:[%s1009_s19 + $0xf0] sm:$0xff]  ;;  %v264_v31 = vld [vmem:[%s1009_s19 + $0xf8] sm:$0xff] }
  0x1e   : > { %268 = vxpose.xlu0.b32.cont [4/16] %v239_v6, 128  ;;  %300 = vxpose.xlu1.b32.cont [4/16] %v240_v7, 128 }
  0x22   : > { %269 = vxpose.xlu0.b32.cont [5/16] %v241_v8, 128  ;;  %301 = vxpose.xlu1.b32.cont [5/16] %v242_v9, 128 }
  0x26   : > { %270 = vxpose.xlu0.b32.cont [6/16] %v243_v10, 128  ;;  %302 = vxpose.xlu1.b32.cont [6/16] %v244_v11, 128 }
  0x2a   : > { %271 = vxpose.xlu0.b32.cont [7/16] %v245_v12, 128  ;;  %303 = vxpose.xlu1.b32.cont [7/16] %v246_v13, 128 }
  0x2e   : > { %272 = vxpose.xlu0.b32.cont [8/16] %v247_v14, 128  ;;  %304 = vxpose.xlu1.b32.cont [8/16] %v248_v15, 128 }
  0x32   : > { %273 = vxpose.xlu0.b32.cont [9/16] %v249_v16, 128  ;;  %305 = vxpose.xlu1.b32.cont [9/16] %v250_v17, 128 }
  0x36   : > { %274 = vxpose.xlu0.b32.cont [10/16] %v251_v18, 128  ;;  %306 = vxpose.xlu1.b32.cont [10/16] %v252_v19, 128 }
  0x3a   : > { %275 = vxpose.xlu0.b32.cont [11/16] %v253_v20, 128  ;;  %307 = vxpose.xlu1.b32.cont [11/16] %v254_v21, 128 }
  0x3e   : > { %276 = vxpose.xlu0.b32.cont [12/16] %v255_v22, 128  ;;  %308 = vxpose.xlu1.b32.cont [12/16] %v256_v23, 128 }
  0x42   : > { %277 = vxpose.xlu0.b32.cont [13/16] %v257_v24, 128  ;;  %309 = vxpose.xlu1.b32.cont [13/16] %v258_v25, 128 }
  0x46   : > { %278 = vxpose.xlu0.b32.cont [14/16] %v259_v26, 128  ;;  %310 = vxpose.xlu1.b32.cont [14/16] %v260_v27, 128 }
  0x4a   : > { %279 = vxpose.xlu0.b32.cont [15/16] %v261_v28, 128  ;;  %311 = vxpose.xlu1.b32.cont [15/16] %v262_v29, 128 }
  0x4e   : > { %280 = vxpose.xlu0.b32.end [16/16] %v263_v30, 128  ;;  %312 = vxpose.xlu1.b32.end [16/16] %v264_v31, 128 }
  0x92   : > { %v281_v32 = vpop.trf.xlu0  ;;  %v1044_v33 = vpop.trf.xlu1 }
  0x93   : > { %v524_v58 = vmul.f32 %v281_v32, %v281_v32 }
  0x96   : > { %v282_v34 = vpop.trf.xlu0  ;;  %v1051_v36 = vpop.trf.xlu1 }
  0x97   : > { %v825_v35 = vpack.c.bf16 %v282_v34, %v281_v32  ;;  %v865_v37 = vpack.c.bf16 %v1051_v36, %v1044_v33  ;;  %v525_v55 = vmul.f32 %v282_v34, %v282_v34  ;;  %v490_v59 = vadd.f32 %v282_v34, %v281_v32 }
  0x99   : > { %826 = vst [vmem:[%s1049_s23] sm:$0xff] %v825_v35   ;;  %909 = vst [vmem:[%s1049_s23 + $0x40] sm:$0xff] %v865_v37   ;;  %v556_v62 = vadd.f32 %v525_v55, %v524_v58 }
  0x9a   : > { %v283_v38 = vpop.trf.xlu0  ;;  %v1057_v39 = vpop.trf.xlu1 }
  0x9b   : > { %v526_v60 = vmul.f32 %v283_v38, %v283_v38  ;;  %v491_v63 = vadd.f32 %v490_v59, %v283_v38 }
  0x9d   : > { %v557_v2 = vadd.f32 %v556_v62, %v526_v60 }
  0x9e   : > { %v284_v40 = vpop.trf.xlu0  ;;  %v1059_v42 = vpop.trf.xlu1 }
  0x9f   : > { %v830_v41 = vpack.c.bf16 %v284_v40, %v283_v38  ;;  %v870_v43 = vpack.c.bf16 %v1059_v42, %v1057_v39  ;;  %v527_v0 = vmul.f32 %v284_v40, %v284_v40  ;;  %v492_v3 = vadd.f32 %v491_v63, %v284_v40 }
  0xa1   : > { %902 = vst [vmem:[%s1049_s23 + $0x8] sm:$0xff] %v830_v41   ;;  %910 = vst [vmem:[%s1049_s23 + $0x48] sm:$0xff] %v870_v43   ;;  %v558_v7 = vadd.f32 %v557_v2, %v527_v0 }
  0xa2   : > { %v285_v44 = vpop.trf.xlu0  ;;  %v1065_v45 = vpop.trf.xlu1 }
  0xa3   : > { %v528_v4 = vmul.f32 %v285_v44, %v285_v44  ;;  %v493_v8 = vadd.f32 %v492_v3, %v285_v44 }
  0xa5   : > { %v559_v12 = vadd.f32 %v558_v7, %v528_v4 }
  0xa6   : > { %v286_v46 = vpop.trf.xlu0  ;;  %v1067_v48 = vpop.trf.xlu1 }
  0xa7   : > { %v835_v47 = vpack.c.bf16 %v286_v46, %v285_v44  ;;  %v875_v49 = vpack.c.bf16 %v1067_v48, %v1065_v45  ;;  %v529_v9 = vmul.f32 %v286_v46, %v286_v46  ;;  %v494_v13 = vadd.f32 %v493_v8, %v286_v46 }
  0xa9   : > { %903 = vst [vmem:[%s1049_s23 + $0x10] sm:$0xff] %v835_v47   ;;  %911 = vst [vmem:[%s1049_s23 + $0x50] sm:$0xff] %v875_v49   ;;  %v560_v16 = vadd.f32 %v559_v12, %v529_v9 }
  0xaa   : > { %v287_v50 = vpop.trf.xlu0  ;;  %v1073_v51 = vpop.trf.xlu1 }
  0xab   : > { %v530_v14 = vmul.f32 %v287_v50, %v287_v50  ;;  %v495_v17 = vadd.f32 %v494_v13, %v287_v50  ;;  %v542_v13 = vmul.f32 %v1057_v39, %v1057_v39 }
  0xad   : > { %v561_v20 = vadd.f32 %v560_v16, %v530_v14 }
  0xae   : > { %v288_v52 = vpop.trf.xlu0  ;;  %v1075_v54 = vpop.trf.xlu1 }
  0xaf   : > { %v840_v53 = vpack.c.bf16 %v288_v52, %v287_v50  ;;  %v880_v56 = vpack.c.bf16 %v1075_v54, %v1073_v51  ;;  %v531_v18 = vmul.f32 %v288_v52, %v288_v52  ;;  %v496_v21 = vadd.f32 %v495_v17, %v288_v52 }
  0xb0   : > { %v543_v17 = vmul.f32 %v1059_v42, %v1059_v42 }
  0xb1   : > { %904 = vst [vmem:[%s1049_s23 + $0x18] sm:$0xff] %v840_v53   ;;  %912 = vst [vmem:[%s1049_s23 + $0x58] sm:$0xff] %v880_v56   ;;  %v562_v25 = vadd.f32 %v561_v20, %v531_v18 }
  0xb2   : > { %v289_v57 = vpop.trf.xlu0  ;;  %v1081_v61 = vpop.trf.xlu1 }
  0xb3   : > { %v532_v22 = vmul.f32 %v289_v57, %v289_v57  ;;  %v497_v26 = vadd.f32 %v496_v21, %v289_v57  ;;  %v545_v21 = vmul.f32 %v1067_v48, %v1067_v48 }
  0xb5   : > { %v563_v30 = vadd.f32 %v562_v25, %v532_v22 }
  0xb6   : > { %v290_v1 = vpop.trf.xlu0  ;;  %v1083_v6 = vpop.trf.xlu1 }
  0xb7   : > { %v845_v5 = vpack.c.bf16 %v290_v1, %v289_v57  ;;  %v885_v10 = vpack.c.bf16 %v1083_v6, %v1081_v61  ;;  %v533_v27 = vmul.f32 %v290_v1, %v290_v1  ;;  %v498_v31 = vadd.f32 %v497_v26, %v290_v1 }
  0xb9   : > { %905 = vst [vmem:[%s1049_s23 + $0x20] sm:$0xff] %v845_v5   ;;  %913 = vst [vmem:[%s1049_s23 + $0x60] sm:$0xff] %v885_v10   ;;  %v564_v35 = vadd.f32 %v563_v30, %v533_v27  ;;  %v540_v5 = vmul.f32 %v1044_v33, %v1044_v33  ;;  %v541_v10 = vmul.f32 %v1051_v36, %v1051_v36 }
  0xba   : > { %v291_v11 = vpop.trf.xlu0  ;;  %v1089_v15 = vpop.trf.xlu1 }
  0xbb   : > { %v534_v32 = vmul.f32 %v291_v11, %v291_v11  ;;  %v499_v37 = vadd.f32 %v498_v31, %v291_v11  ;;  %v549_v31 = vmul.f32 %v1083_v6, %v1083_v6 }
  0xbd   : > { %v565_v41 = vadd.f32 %v564_v35, %v534_v32 }
  0xbe   : > { %v292_v19 = vpop.trf.xlu0  ;;  %v1091_v24 = vpop.trf.xlu1 }
  0xbf   : > { %v850_v23 = vpack.c.bf16 %v292_v19, %v291_v11  ;;  %v890_v28 = vpack.c.bf16 %v1091_v24, %v1089_v15  ;;  %v535_v38 = vmul.f32 %v292_v19, %v292_v19  ;;  %v500_v43 = vadd.f32 %v499_v37, %v292_v19 }
  0xc0   : > { %v544_v19 = vmul.f32 %v1065_v45, %v1065_v45  ;;  %v550_v37 = vmul.f32 %v1089_v15, %v1089_v15 }
  0xc1   : > { %906 = vst [vmem:[%s1049_s23 + $0x28] sm:$0xff] %v850_v23   ;;  %914 = vst [vmem:[%s1049_s23 + $0x68] sm:$0xff] %v890_v28   ;;  %v566_v49 = vadd.f32 %v565_v41, %v535_v38 }
  0xc2   : > { %v293_v29 = vpop.trf.xlu0  ;;  %v1097_v34 = vpop.trf.xlu1 }
  0xc3   : > { %v536_v44 = vmul.f32 %v293_v29, %v293_v29  ;;  %v501_v50 = vadd.f32 %v500_v43, %v293_v29  ;;  %v552_v43 = vmul.f32 %v1097_v34, %v1097_v34 }
  0xc5   : > { %v567_v56 = vadd.f32 %v566_v49, %v536_v44 }
  0xc6   : > { %v294_v40 = vpop.trf.xlu0  ;;  %v1099_v47 = vpop.trf.xlu1 }
  0xc7   : > { %v855_v46 = vpack.c.bf16 %v294_v40, %v293_v29  ;;  %v537_v52 = vmul.f32 %v294_v40, %v294_v40  ;;  %v895_v53 = vpack.c.bf16 %v1099_v47, %v1097_v34  ;;  %v502_v57 = vadd.f32 %v501_v50, %v294_v40 }
  0xc8   : > { %v551_v40 = vmul.f32 %v1091_v24, %v1091_v24 }
  0xc9   : > { %907 = vst [vmem:[%s1049_s23 + $0x30] sm:$0xff] %v855_v46   ;;  %915 = vst [vmem:[%s1049_s23 + $0x70] sm:$0xff] %v895_v53   ;;  %v568_v60 = vadd.f32 %v567_v56, %v537_v52  ;;  %v553_v46 = vmul.f32 %v1099_v47, %v1099_v47 }
  0xca   : > { %v295_v55 = vpop.trf.xlu0  ;;  %v327_v59 = vpop.trf.xlu1 }
  0xcb   : > { %v538_v58 = vmul.f32 %v295_v55, %v295_v55  ;;  %v503_v62 = vadd.f32 %v502_v57, %v295_v55  ;;  %v554_v50 = vmul.f32 %v327_v59, %v327_v59 }
  0xcd   : > { %v569_v0 = vadd.f32 %v568_v60, %v538_v58 }
  0xce   : > { %v296_v63 = vpop.trf.xlu0  ;;  %v328_v4 = vpop.trf.xlu1 }
  0xcf   : > { %v860_v1 = vpack.c.bf16 %v296_v63, %v295_v55  ;;  %v504_v2 = vadd.f32 %v503_v62, %v296_v63  ;;  %v539_v3 = vmul.f32 %v296_v63, %v296_v63  ;;  %v900_v9 = vpack.c.bf16 %v328_v4, %v327_v59 }
  0xd0   : > { %v555_v52 = vmul.f32 %v328_v4, %v328_v4 }
  0xd1   : > { %908 = vst [vmem:[%s1049_s23 + $0x38] sm:$0xff] %v860_v1   ;;  %v505_v7 = vadd.f32 %v504_v2, %v1044_v33  ;;  %v570_v8 = vadd.f32 %v569_v0, %v539_v3  ;;  %916 = vst [vmem:[%s1049_s23 + $0x78] sm:$0xff] %v900_v9  }
  0xd3   : > { %v506_v11 = vadd.f32 %v505_v7, %v1051_v36  ;;  %v571_v12 = vadd.f32 %v570_v8, %v540_v5 }
  0xd5   : > { %v507_v14 = vadd.f32 %v506_v11, %v1057_v39  ;;  %v572_v16 = vadd.f32 %v571_v12, %v541_v10  ;;  %v546_v39 = vmul.f32 %v1073_v51, %v1073_v51 }
  0xd7   : > { %v508_v33 = vadd.f32 %v507_v14, %v1059_v42  ;;  %v573_v18 = vadd.f32 %v572_v16, %v542_v13  ;;  %v547_v42 = vmul.f32 %v1075_v54, %v1075_v54 }
  0xd9   : > { %v509_v20 = vadd.f32 %v508_v33, %v1065_v45  ;;  %v574_v36 = vadd.f32 %v573_v18, %v543_v17  ;;  %v548_v45 = vmul.f32 %v1081_v61, %v1081_v61 }
  0xdb   : > { %v575_v22 = vadd.f32 %v574_v36, %v544_v19  ;;  %v510_v23 = vadd.f32 %v509_v20, %v1067_v48 }
  0xdd   : > { %v511_v25 = vadd.f32 %v510_v23, %v1073_v51  ;;  %v576_v26 = vadd.f32 %v575_v22, %v545_v21 }
  0xdf   : > { %v512_v27 = vadd.f32 %v511_v25, %v1075_v54  ;;  %v577_v28 = vadd.f32 %v576_v26, %v546_v39 }
  0xe1   : > { %v513_v29 = vadd.f32 %v512_v27, %v1081_v61  ;;  %v578_v30 = vadd.f32 %v577_v28, %v547_v42 }
  0xe3   : > { %v514_v48 = vadd.f32 %v513_v29, %v1083_v6  ;;  %v579_v32 = vadd.f32 %v578_v30, %v548_v45 }
  0xe5   : > { %v580_v51 = vadd.f32 %v579_v32, %v549_v31  ;;  %v515_v35 = vadd.f32 %v514_v48, %v1089_v15 }
  0xe7   : > { %v581_v54 = vadd.f32 %v580_v51, %v550_v37  ;;  %v516_v38 = vadd.f32 %v515_v35, %v1091_v24 }
  0xe9   : > { %v582_v61 = vadd.f32 %v581_v54, %v551_v40  ;;  %v517_v41 = vadd.f32 %v516_v38, %v1097_v34 }
  0xeb   : > { %v583_v6 = vadd.f32 %v582_v61, %v552_v43  ;;  %v518_v44 = vadd.f32 %v517_v41, %v1099_v47 }
  0xed   : > { %v584_v49 = vadd.f32 %v583_v6, %v553_v46  ;;  %v519_v15 = vadd.f32 %v518_v44, %v327_v59 }
  0xef   : > { %v585_v53 = vadd.f32 %v584_v49, %v554_v50  ;;  %v520_v24 = vadd.f32 %v519_v15, %v328_v4 }
  0xf1   : > { %v586_v55 = vadd.f32 %v585_v53, %v555_v52  ;;  %v593_v56 = vrot.slane %v520_v24, 4 }
  0xf3   : > { %v594_v57 = vadd.f32 %v593_v56, %v520_v24  ;;  %v601_v58 = vrot.slane %v586_v55, 4 }
  0xf5   : > { %v595_v60 = vrot.slane %v594_v57, 2  ;;  %v602_v34 = vadd.f32 %v601_v58, %v586_v55 }
  0xf7   : > { %v596_v62 = vadd.f32 %v595_v60, %v594_v57  ;;  %v603_v63 = vrot.slane %v602_v34, 2 }
  0xf9   : > { %v597_v0 = vrot.slane %v596_v62, 1  ;;  %v604_v1 = vadd.f32 %v603_v63, %v602_v34 }
  0xfb   : > { %v598_v47 = vadd.f32 %v597_v0, %v596_v62  ;;  %v605_v59 = vrot.slane %v604_v1, 1 }
  0xfd   : > { %599 = vst [vmem:[%s213_s26] sm:$0x1] %v598_v47  ;;  %v606_v2 = vadd.f32 %v605_v59, %v604_v1 }
  0xff   : > { %607 = vst [vmem:[%s216_s29] sm:$0x1] %v606_v2 }
 0x100 PF: > { %s14_s14 = sadd.s32 1, %s963_s14   ;;  %s1170_s12 = smov %s959_s13 }
 0x101   : > { %p11_p5 = scmp.ge.s32.totalorder %s14_s14, 4   ;;  %s1171_s13 = smov %s1173_s15 }
 0x103   :  { %13 = sbr.rel (!%p11_p5) target bundleno = 2 (0x2), region = 86 }

// kernel: vae_attention_block.4
= control target key start
LH: loop header
LB: loop body
LE: loop exit
PB: predicated region body
PF: predicated region fallthrough
CT: control target
= control target key end

     0   :  { %s1924_s18 = smov 0   ;;  %s1926_s19 = smov 0   ;;  %s2361_s0 = inlined_call_operand.vmem [shape: bf16[2,256,128], index: 0, kind: input, shape index: {}]   ;;  %s2362_s1 = inlined_call_operand.vmem [shape: f32[2,1,128], index: 1, kind: input, shape index: {}]   ;;  %s2363_s2 = inlined_call_operand.vmem [shape: f32[2,1,128], index: 2, kind: input, shape index: {}]   ;;  %s2364_s3 = inlined_call_operand.vmem [shape: bf16[128,384], index: 3, kind: input, shape index: {}]   ;;  %s2365_s4 = inlined_call_operand.vmem [shape: f32[1,384], index: 4, kind: input, shape index: {}]   ;;  %s2366_s5 = inlined_call_operand.vmem [shape: bf16[2,256,384], index: 5, kind: output, shape index: {}]  }
   0x1   :  { %s1928_s20 = smov 0  }
   0x2 LB: > { %s27_s21 = sadd.s32 1, %s1887_s19  ;;  %p1483_p0 = scmp.ge.s32.totalorder %s1891_s20, 1  ;;  %s1891_s20 = sphi %s1928_s20, %s15_s20   ;;  %s1887_s19 = sphi %s1926_s19, %s2368_s19   ;;  %s1883_s18 = sphi %s1924_s18, %s2367_s18  }
   0x3   : > { %p29_p1 = scmp.ge.s32.totalorder %s27_s21, 2  ;;  %p224_p2 = scmp.lt.s32.totalorder %s1891_s20, 3 }
   0x5   : > { %s2370_s21 = smov (%p29_p1, %s27_s21), 0  ;;  %p225_p3 = pnand %p1483_p0, %p224_p2 }
   0x6   : > { %v1837_v0 = vld [vmem:[%s2364_s3 + $0x4] ss:$12 sps:$4 sm:$0xff] (!%p225_p3)   ;;  %p268_p4 = scmp.lt.s32.totalorder (!%p225_p3), %s1883_s18, 1  ;;  %v1839_v1 = vld [vmem:[%s2364_s3] ss:$12 sps:$4 sm:$0xff] (!%p225_p3)   ;;  %v1893_v2 = vmov (!%p225_p3), 0  }
   0x7   : > { %228 = sbr.rel (%p225_p3) target bundleno = 348 (0x15c), region = 40  ;;  %662 = vmatprep.mubr.bf16.mxu0 (!%p225_p3), %v1893_v2  ;;  %782 = vmatprep.mubr.bf16.mxu1 (!%p225_p3), %v1893_v2  ;;  %v1840_v3 = vld [vmem:[%s2364_s3 + $0x1c] ss:$12 sps:$4 sm:$0xff] (!%p225_p3)   ;;  %v1842_v4 = vld [vmem:[%s2364_s3 + $0x18] ss:$12 sps:$4 sm:$0xff] (!%p225_p3)  }
   0x8   : > { %630 = vmatprep.subr.bf16.mxu0 (!%p225_p3), %v1837_v0  ;;  %1795 = vmatprep.subr.bf16.mxu1 (!%p225_p3), %v1837_v0  ;;  %v1843_v5 = vld [vmem:[%s2364_s3 + $0x34] ss:$12 sps:$4 sm:$0xff] (!%p225_p3)   ;;  %v1845_v6 = vld [vmem:[%s2364_s3 + $0x30] ss:$12 sps:$4 sm:$0xff] (!%p225_p3)   ;;  %v1846_v7 = vld [vmem:[%s2364_s3 + $0x4c] ss:$12 sps:$4 sm:$0xff] (!%p225_p3)  }
   0x9   : > { %631 = vmatpush1.bf16.msra.mxu0 (!%p225_p3), %v1839_v1  ;;  %1803 = vmatpush1.bf16.msra.mxu1 (!%p225_p3), %v1839_v1  ;;  %v1848_v8 = vld [vmem:[%s2364_s3 + $0x48] ss:$12 sps:$4 sm:$0xff] (!%p225_p3)   ;;  %v1849_v9 = vld [vmem:[%s2364_s3 + $0x64] ss:$12 sps:$4 sm:$0xff] (!%p225_p3)   ;;  %v1851_v10 = vld [vmem:[%s2364_s3 + $0x60] ss:$12 sps:$4 sm:$0xff] (!%p225_p3)  }
   0xa   : > { %632 = vmatprep.subr.bf16.mxu0 (!%p225_p3), %v1840_v3  ;;  %1796 = vmatprep.subr.bf16.mxu1 (!%p225_p3), %v1840_v3  ;;  %v1852_v13 = vld [vmem:[%s2364_s3 + $0x7c] ss:$12 sps:$4 sm:$0xff] (!%p225_p3)   ;;  %v1854_v19 = vld [vmem:[%s2364_s3 + $0x78] ss:$12 sps:$4 sm:$0xff] (!%p225_p3)   ;;  %v1855_v20 = vld [vmem:[%s2364_s3 + $0x94] ss:$12 sps:$4 sm:$0xff] (!%p225_p3)  }
   0xb   : > { %v1857_v27 = vld [vmem:[%s2364_s3 + $0x90] ss:$12 sps:$4 sm:$0xff] (!%p225_p3)   ;;  %v1858_v29 = vld [vmem:[%s2364_s3 + $0xac] ss:$12 sps:$4 sm:$0xff] (!%p225_p3)   ;;  %v1860_v38 = vld [vmem:[%s2364_s3 + $0xa8] ss:$12 sps:$4 sm:$0xff] (!%p225_p3)  }
   0xc   : > { %v1861_v39 = vld [vmem:[%s2364_s3 + $0x8] ss:$12 sps:$4 sm:$0xff] (!%p225_p3)   ;;  %v1862_v51 = vld [vmem:[%s2364_s3 + $0x20] ss:$12 sps:$4 sm:$0xff] (!%p225_p3)  }
   0xd   : > { %633 = vmatpush1.bf16.msra.mxu0 (!%p225_p3), %v1842_v4  ;;  %1804 = vmatpush1.bf16.msra.mxu1 (!%p225_p3), %v1842_v4  ;;  %v1863_v4 = vld [vmem:[%s2364_s3 + $0x38] ss:$12 sps:$4 sm:$0xff] (!%p225_p3)  }
   0xe   : > { %s2372_s18 = smov (!%p268_p4, %s1883_s18), 1  ;;  %634 = vmatprep.subr.bf16.mxu0 %v1843_v5  ;;  %1797 = vmatprep.subr.bf16.mxu1 %v1843_v5 }
   0xf   : > { %s1579_s11 = sshll.u32 %s2372_s18, 7  ;;  %s279_s27 = scalar_lea.vmem %s2362_s1, %s2372_s18 }
  0x10   : > { %s1975_s16 = scalar_lea.vmem %s2361_s0, %s1579_s11  ;;  %v1992_v16 = vld [vmem:[%s279_s27] ss:$0 sm:$0xff]  ;;  %s282_s9 = scalar_lea.vmem %s2363_s2, %s2372_s18 }
  0x11   : > { %635 = vmatpush1.bf16.msra.mxu0 %v1845_v6  ;;  %1805 = vmatpush1.bf16.msra.mxu1 %v1845_v6  ;;  %v1645_v11 = vld [vmem:[%s1975_s16] sm:$0xff]   ;;  %v1708_v23 = vld [vmem:[%s1975_s16 + $0x8] sm:$0xff]   ;;  %v1709_v42 = vld [vmem:[%s1975_s16 + $0x10] sm:$0xff]   ;;  %s1811_s15 = smul.u32 384, %s2372_s18 }
  0x12   : > { %636 = vmatprep.subr.bf16.mxu0 %v1846_v7  ;;  %1798 = vmatprep.subr.bf16.mxu1 %v1846_v7  ;;  %v1719_v12 = vld [vmem:[%s1975_s16 + $0x60] sm:$0xff]   ;;  %v1646_v14 = vunpack.c.l.bf16 %v1645_v11  ;;  %v1647_v15 = vunpack.c.h.bf16 %v1645_v11  ;;  %v1720_v28 = vld [vmem:[%s1975_s16 + $0x68] sm:$0xff]   ;;  %v1650_v30 = vunpack.c.l.bf16 %v1708_v23  ;;  %v1651_v31 = vunpack.c.h.bf16 %v1708_v23  ;;  %v1721_v43 = vld [vmem:[%s1975_s16 + $0x70] sm:$0xff]  }
  0x13   : > { %v1694_v17 = vunpack.c.l.bf16 %v1719_v12  ;;  %v1695_v18 = vunpack.c.h.bf16 %v1719_v12  ;;  %v2007_v24 = vld [vmem:[%s282_s9] ss:$0 sm:$0xff]  ;;  %v1698_v36 = vunpack.c.l.bf16 %v1720_v28  ;;  %v1699_v37 = vunpack.c.h.bf16 %v1720_v28  ;;  %v1716_v48 = vld [vmem:[%s1975_s16 + $0x48] sm:$0xff]   ;;  %v1717_v55 = vld [vmem:[%s1975_s16 + $0x50] sm:$0xff]   ;;  %s2190_s23 = scalar_lea.vmem %s2366_s5, %s1811_s15 }
  0x14   : > { %v366_v21 = vmul.f32 %v1646_v14, %v1992_v16  ;;  %v367_v22 = vmul.f32 %v1647_v15, %v1992_v16  ;;  %v368_v40 = vmul.f32 %v1650_v30, %v1992_v16  ;;  %v369_v41 = vmul.f32 %v1651_v31, %v1992_v16  ;;  %v1718_v61 = vld [vmem:[%s1975_s16 + $0x58] sm:$0xff]  }
  0x15   : > { %637 = vmatpush1.bf16.msra.mxu0 %v1848_v8  ;;  %1806 = vmatpush1.bf16.msra.mxu1 %v1848_v8  ;;  %v390_v25 = vmul.f32 %v1694_v17, %v1992_v16  ;;  %v391_v26 = vmul.f32 %v1695_v18, %v1992_v16  ;;  %v392_v46 = vmul.f32 %v1698_v36, %v1992_v16  ;;  %v1654_v49 = vunpack.c.l.bf16 %v1709_v42  ;;  %v1710_v8 = vld [vmem:[%s1975_s16 + $0x18] sm:$0xff]  }
  0x16   : > { %638 = vmatprep.subr.bf16.mxu0 %v1849_v9  ;;  %1799 = vmatprep.subr.bf16.mxu1 %v1849_v9  ;;  %v405_v32 = vadd.f32 %v2007_v24, %v366_v21  ;;  %v406_v33 = vadd.f32 %v2007_v24, %v367_v22  ;;  %v393_v47 = vmul.f32 %v1699_v37, %v1992_v16  ;;  %v1655_v50 = vunpack.c.h.bf16 %v1709_v42  ;;  %v1864_v23 = vld [vmem:[%s2364_s3 + $0x50] ss:$12 sps:$4 sm:$0xff]  }
  0x17   : > { %v429_v34 = vadd.f32 %v2007_v24, %v390_v25  ;;  %v430_v35 = vadd.f32 %v2007_v24, %v391_v26  ;;  %v407_v52 = vadd.f32 %v2007_v24, %v368_v40  ;;  %v408_v53 = vadd.f32 %v2007_v24, %v369_v41 }
  0x18   : > { %v2032_v44 = vpack.c.bf16 %v406_v33, %v405_v32  ;;  %v1702_v54 = vunpack.c.l.bf16 %v1721_v43  ;;  %v1682_v56 = vunpack.c.l.bf16 %v1716_v48  ;;  %v431_v57 = vadd.f32 %v2007_v24, %v392_v46 }
  0x19   : > { %639 = vmatpush1.bf16.msra.mxu0 %v1851_v10  ;;  %1807 = vmatpush1.bf16.msra.mxu1 %v1851_v10  ;;  %v2034_v45 = vpack.c.bf16 %v430_v35, %v429_v34  ;;  %v432_v58 = vadd.f32 %v2007_v24, %v393_v47  ;;  %v1703_v59 = vunpack.c.h.bf16 %v1721_v43  ;;  %v1683_v60 = vunpack.c.h.bf16 %v1716_v48  ;;  %v1711_v47 = vld [vmem:[%s1975_s16 + $0x20] sm:$0xff]  }
  0x1a   : > { %640 = vmatprep.subr.bf16.mxu0 %v1852_v13  ;;  %1800 = vmatprep.subr.bf16.mxu1 %v1852_v13  ;;  %v370_v62 = vmul.f32 %v1654_v49, %v1992_v16  ;;  %v371_v63 = vmul.f32 %v1655_v50, %v1992_v16  ;;  %v384_v0 = vmul.f32 %v1682_v56, %v1992_v16  ;;  %v1686_v1 = vunpack.c.l.bf16 %v1717_v55  ;;  %v1866_v48 = vld [vmem:[%s2364_s3 + $0x80] ss:$12 sps:$4 sm:$0xff]  }
  0x1b   : > { %v2055_v3 = vpack.c.bf16 %v408_v53, %v407_v52  ;;  %v394_v5 = vmul.f32 %v1702_v54, %v1992_v16  ;;  %v385_v6 = vmul.f32 %v1683_v60, %v1992_v16  ;;  %v1687_v7 = vunpack.c.h.bf16 %v1717_v55  ;;  %v1867_v55 = vld [vmem:[%s2364_s3 + $0x98] ss:$12 sps:$4 sm:$0xff]   ;;  %v1712_v60 = vld [vmem:[%s1975_s16 + $0x28] sm:$0xff]  }
  0x1c   : > { %v423_v9 = vadd.f32 %v2007_v24, %v384_v0  ;;  %v386_v10 = vmul.f32 %v1686_v1, %v1992_v16  ;;  %v1690_v11 = vunpack.c.l.bf16 %v1718_v61  ;;  %v1691_v12 = vunpack.c.h.bf16 %v1718_v61  ;;  %v1868_v61 = vld [vmem:[%s2364_s3 + $0xb0] ss:$12 sps:$4 sm:$0xff]  }
  0x1d   : > { %641 = vmatpush1.bf16.msra.mxu0 %v1854_v19  ;;  %1808 = vmatpush1.bf16.msra.mxu1 %v1854_v19  ;;  %v2065_v13 = vpack.c.bf16 %v432_v58, %v431_v57  ;;  %v395_v14 = vmul.f32 %v1703_v59, %v1992_v16  ;;  %v424_v15 = vadd.f32 %v2007_v24, %v385_v6  ;;  %v1722_v19 = vld [vmem:[%s1975_s16 + $0x78] sm:$0xff]   ;;  %v1658_v26 = vunpack.c.l.bf16 %v1710_v8 }
  0x1e   : > { %642 = vmatprep.subr.bf16.mxu0 %v1855_v20  ;;  %1801 = vmatprep.subr.bf16.mxu1 %v1855_v20  ;;  %v387_v17 = vmul.f32 %v1687_v7, %v1992_v16  ;;  %v409_v18 = vadd.f32 %v2007_v24, %v370_v62  ;;  %v425_v20 = vadd.f32 %v2007_v24, %v386_v10  ;;  %v1659_v30 = vunpack.c.h.bf16 %v1710_v8  ;;  %v1713_v7 = vld [vmem:[%s1975_s16 + $0x30] sm:$0xff]  }
  0x1f   : > { %v388_v21 = vmul.f32 %v1690_v11, %v1992_v16  ;;  %v389_v22 = vmul.f32 %v1691_v12, %v1992_v16  ;;  %v410_v25 = vadd.f32 %v2007_v24, %v371_v63  ;;  %v434_v33 = vadd.f32 %v2007_v24, %v395_v14 }
  0x20   : > { %v426_v28 = vadd.f32 %v2007_v24, %v387_v17  ;;  %v1706_v34 = vunpack.c.l.bf16 %v1722_v19  ;;  %v1707_v35 = vunpack.c.h.bf16 %v1722_v19  ;;  %v372_v40 = vmul.f32 %v1658_v26, %v1992_v16  ;;  %v1715_v17 = vld [vmem:[%s1975_s16 + $0x40] sm:$0xff]  }
  0x21   : > { %643 = vmatpush1.bf16.msra.mxu0 %v1857_v27  ;;  %1809 = vmatpush1.bf16.msra.mxu1 %v1857_v27  ;;  %v2079_v27 = vpack.c.bf16 %v424_v15, %v423_v9  ;;  %v427_v31 = vadd.f32 %v2007_v24, %v388_v21  ;;  %v428_v32 = vadd.f32 %v2007_v24, %v389_v22  ;;  %v1662_v50 = vunpack.c.l.bf16 %v1711_v47  ;;  %v1714_v15 = vld [vmem:[%s1975_s16 + $0x38] sm:$0xff]  }
  0x22   : > { %644 = vmatprep.subr.bf16.mxu0 %v1858_v29  ;;  %1802 = vmatprep.subr.bf16.mxu1 %v1858_v29  ;;  %v433_v29 = vadd.f32 %v2007_v24, %v394_v5  ;;  %v2088_v36 = vpack.c.bf16 %v426_v28, %v425_v20  ;;  %v373_v42 = vmul.f32 %v1659_v30, %v1992_v16  ;;  %v1663_v54 = vunpack.c.h.bf16 %v1711_v47 }
  0x23   : > { %v2091_v37 = vpack.c.bf16 %v428_v32, %v427_v31  ;;  %v396_v43 = vmul.f32 %v1706_v34, %v1992_v16  ;;  %v397_v46 = vmul.f32 %v1707_v35, %v1992_v16  ;;  %v411_v49 = vadd.f32 %v2007_v24, %v372_v40 }
  0x24   : > { %v2098_v41 = vpack.c.bf16 %v434_v33, %v433_v29  ;;  %v374_v58 = vmul.f32 %v1662_v50, %v1992_v16  ;;  %v375_v59 = vmul.f32 %v1663_v54, %v1992_v16  ;;  %v1666_v0 = vunpack.c.l.bf16 %v1712_v60 }
  0x25   : > { %645 = vmatpush1.bf16.msra.mxu0 %v1860_v38  ;;  %1810 = vmatpush1.bf16.msra.mxu1 %v1860_v38  ;;  %v1865_v38 = vld [vmem:[%s2364_s3 + $0x68] ss:$12 sps:$4 sm:$0xff]   ;;  %v435_v52 = vadd.f32 %v2007_v24, %v396_v43  ;;  %v436_v53 = vadd.f32 %v2007_v24, %v397_v46  ;;  %v1667_v1 = vunpack.c.h.bf16 %v1712_v60  ;;  %v1670_v10 = vunpack.c.l.bf16 %v1713_v7 }
  0x26   : > { %1747 = vmatprep.subr.bf16.mxu1 %v1861_v39  ;;  %v413_v62 = vadd.f32 %v2007_v24, %v374_v58  ;;  %v414_v63 = vadd.f32 %v2007_v24, %v375_v59  ;;  %v376_v5 = vmul.f32 %v1666_v0, %v1992_v16  ;;  %v1671_v11 = vunpack.c.h.bf16 %v1713_v7 }
  0x27   : > { %v2117_v57 = vpack.c.bf16 %v436_v53, %v435_v52  ;;  %v377_v6 = vmul.f32 %v1667_v1, %v1992_v16  ;;  %v378_v12 = vmul.f32 %v1670_v10, %v1992_v16  ;;  %v1674_v19 = vunpack.c.l.bf16 %v1714_v15 }
  0x28   : > { %663 = vmatmul.mubr.bf16.vlgmr.msra.gmra.mrb[0].mxu0 %v2032_v44  ;;  %783 = vmatmul.mubr.bf16.vlgmr.msra.gmra.mrb[0].mxu1 %v2034_v45  ;;  %v415_v8 = vadd.f32 %v2007_v24, %v376_v5  ;;  %v379_v14 = vmul.f32 %v1671_v11, %v1992_v16  ;;  %v1675_v20 = vunpack.c.h.bf16 %v1714_v15  ;;  %v1678_v21 = vunpack.c.l.bf16 %v1715_v17 }
  0x29   : > { %1748 = vmatpush3.bf16.msra.mxu1 %v1861_v39  ;;  %672 = vmatprep.mubr.bf16.mxu0 %v1893_v2  ;;  %v439_v39 = vpack.c.bf16 %v410_v25, %v409_v18  ;;  %v416_v9 = vadd.f32 %v2007_v24, %v377_v6  ;;  %v1679_v22 = vunpack.c.h.bf16 %v1715_v17  ;;  %v380_v25 = vmul.f32 %v1674_v19, %v1992_v16 }
  0x2a   : > { %1749 = vmatprep.subr.bf16.mxu1 %v1862_v51  ;;  %792 = vmatprep.mubr.bf16.mxu1 %v1893_v2  ;;  %v418_v18 = vadd.f32 %v2007_v24, %v379_v14  ;;  %v381_v26 = vmul.f32 %v1675_v20, %v1992_v16  ;;  %v382_v28 = vmul.f32 %v1678_v21, %v1992_v16 }
  0x2b   : > { %v383_v29 = vmul.f32 %v1679_v22, %v1992_v16  ;;  %v419_v30 = vadd.f32 %v2007_v24, %v380_v25  ;;  %v487_v16 = vlaneseq }
  0x2c   : > { %v420_v31 = vadd.f32 %v2007_v24, %v381_v26  ;;  %v421_v32 = vadd.f32 %v2007_v24, %v382_v28 }
  0x2d   : > { %1750 = vmatpush3.bf16.msra.mxu1 %v1862_v51  ;;  %v412_v51 = vadd.f32 %v2007_v24, %v373_v42  ;;  %v422_v33 = vadd.f32 %v2007_v24, %v383_v29 }
  0x2e   : > { %1751 = vmatprep.subr.bf16.mxu1 %v1863_v4  ;;  %v444_v34 = vpack.c.bf16 %v420_v31, %v419_v30 }
  0x2f   : > { %v440_v56 = vpack.c.bf16 %v412_v51, %v411_v49  ;;  %v445_v35 = vpack.c.bf16 %v422_v33, %v421_v32 }
  0x30   : > { %673 = vmatmul.mubr.bf16.gmra.mrb[4].mxu0 %v2055_v3  ;;  %793 = vmatmul.mubr.bf16.gmra.mrb[4].mxu1 %v2065_v13 }
  0x31   : > { %1752 = vmatpush3.bf16.msra.mxu1 %v1863_v4  ;;  %682 = vmatprep.mubr.bf16.mxu0 %v1893_v2  ;;  %v441_v4 = vpack.c.bf16 %v414_v63, %v413_v62 }
  0x32   : > { %1753 = vmatprep.subr.bf16.mxu1 %v1864_v23  ;;  %802 = vmatprep.mubr.bf16.mxu1 %v1893_v2 }
  0x35   : > { %1754 = vmatpush3.bf16.msra.mxu1 %v1864_v23 }
  0x36   : > { %1755 = vmatprep.subr.bf16.mxu1 %v1865_v38 }
  0x38   : > { %683 = vmatmul.mubr.bf16.gmra.mrb[8].mxu0 %v439_v39  ;;  %803 = vmatmul.mubr.bf16.gmra.mrb[8].mxu1 %v2098_v41 }
  0x39   : > { %1756 = vmatpush3.bf16.msra.mxu1 %v1865_v38  ;;  %692 = vmatprep.mubr.bf16.mxu0 %v1893_v2 }
  0x3a   : > { %1757 = vmatprep.subr.bf16.mxu1 %v1866_v48  ;;  %812 = vmatprep.mubr.bf16.mxu1 %v1893_v2 }
  0x3d   : > { %1758 = vmatpush3.bf16.msra.mxu1 %v1866_v48 }
  0x3e   : > { %1759 = vmatprep.subr.bf16.mxu1 %v1867_v55 }
  0x40   : > { %693 = vmatmul.mubr.bf16.gmra.mrb[12].mxu0 %v440_v56  ;;  %813 = vmatmul.mubr.bf16.gmra.mrb[12].mxu1 %v2117_v57 }
  0x41   : > { %1760 = vmatpush3.bf16.msra.mxu1 %v1867_v55  ;;  %702 = vmatprep.mubr.bf16.mxu0 %v1893_v2 }
  0x42   : > { %1761 = vmatprep.subr.bf16.mxu1 %v1868_v61  ;;  %1763 = vmatprep.mubr.bf16.mxu1 %v2032_v44  ;;  %v442_v44 = vpack.c.bf16 %v416_v9, %v415_v8 }
  0x45   : > { %1762 = vmatpush3.bf16.msra.mxu1 %v1868_v61 }
  0x48   : > { %703 = vmatmul.mubr.bf16.gmra.mrb[16].mxu0 %v441_v4  ;;  %1764 = vmatmul.mubr.bf16.vlgmr.msra.gmra.mrb[16].mxu1 %v2055_v3  ;;  %v417_v3 = vadd.f32 %v2007_v24, %v378_v12  ;;  %v2167_v24 = vshrl.u32 %v487_v16, 7 }
  0x49   : > { %712 = vmatprep.mubr.bf16.mxu0 %v1893_v2  ;;  %1767 = vmatprep.mubr.bf16.mxu1 %v439_v39 }
  0x4a   : > { %v443_v23 = vpack.c.bf16 %v418_v18, %v417_v3 }
  0x50   : > { %713 = vmatmul.mubr.bf16.gmra.mrb[20].mxu0 %v442_v44  ;;  %1768 = vmatmul.mubr.bf16.gmra.mrb[20].mxu1 %v440_v56 }
  0x51   : > { %722 = vmatprep.mubr.bf16.mxu0 %v1893_v2  ;;  %1771 = vmatprep.mubr.bf16.mxu1 %v441_v4 }
  0x58   : > { %723 = vmatmul.mubr.bf16.gmra.mrb[24].mxu0 %v443_v23  ;;  %1772 = vmatmul.mubr.bf16.gmra.mrb[24].mxu1 %v442_v44 }
  0x59   : > { %732 = vmatprep.mubr.bf16.mxu0 %v1893_v2  ;;  %1775 = vmatprep.mubr.bf16.mxu1 %v443_v23 }
  0x60   : > { %733 = vmatmul.mubr.bf16.gmra.mrb[28].mxu0 %v444_v34  ;;  %1776 = vmatmul.mubr.bf16.gmra.mrb[28].mxu1 %v444_v34 }
  0x61   : > { %742 = vmatprep.mubr.bf16.mxu0 %v1893_v2  ;;  %1779 = vmatprep.mubr.bf16.mxu1 %v445_v35 }
  0x68   : > { %743 = vmatmul.mubr.bf16.gmra.mrb[32].mxu0 %v445_v35  ;;  %1780 = vmatmul.mubr.bf16.gmra.mrb[32].mxu1 %v2079_v27 }
  0x69   : > { %752 = vmatprep.mubr.bf16.mxu0 %v1893_v2  ;;  %1783 = vmatprep.mubr.bf16.mxu1 %v2088_v36 }
  0x70   : > { %753 = vmatmul.mubr.bf16.gmra.mrb[36].mxu0 %v2079_v27  ;;  %1784 = vmatmul.mubr.bf16.gmra.mrb[36].mxu1 %v2091_v37  ;;  %v489_v27 = vsub.s32 0, %v2167_v24 }
  0x71   : > { %762 = vmatprep.mubr.bf16.mxu0 %v1893_v2  ;;  %1787 = vmatprep.mubr.bf16.mxu1 %v2034_v45  ;;  %v2173_v45 = vld [vmem:[%s2365_s4] sm:$0x7] }
  0x78   : > { %763 = vmatmul.mubr.bf16.gmra.mrb[40].mxu0 %v2088_v36  ;;  %1788 = vmatmul.mubr.bf16.gmra.mrb[40].mxu1 %v2065_v13  ;;  %v493_v13 = vsub.s32 1, %v2167_v24 }
  0x79   : > { %772 = vmatprep.mubr.bf16.mxu0 %v1893_v2  ;;  %1791 = vmatprep.mubr.bf16.mxu1 %v2098_v41  ;;  %v2177_v2 = vrot.slane %v2173_v45, %v489_v27 }
  0x7a   : > { %v2180_v36 = vrot.slane %v2173_v45, %v493_v13 }
  0x80   : > { %773 = vmatmul.mubr.bf16.gmra.mrb[44].mxu0 %v2091_v37  ;;  %1792 = vmatmul.mubr.bf16.gmra.mrb[44].mxu1 %v2117_v57 }
  0xfb   : > { %v664_v37 = vpop.f32.mrb[0].mxu0  ;;  %v784_v38 = vpop.f32.mrb[0].mxu1 }
  0xfc   : > { %v665_v39 = vadd.f32 %v664_v37, %v2177_v2  ;;  %v785_v40 = vadd.f32 %v784_v38, %v2177_v2  ;;  %v666_v41 = vpop.f32.mrb[1].mxu0  ;;  %v786_v42 = vpop.f32.mrb[1].mxu1 }
  0xfd   : > { %v667_v43 = vadd.f32 %v666_v41, %v2180_v36  ;;  %v787_v46 = vadd.f32 %v786_v42, %v2180_v36  ;;  %v668_v47 = vpop.f32.mrb[2].mxu0  ;;  %v788_v48 = vpop.f32.mrb[2].mxu1 }
  0xfe   : > { %v669_v49 = vadd.f32 %v668_v47, %v2177_v2  ;;  %v789_v50 = vadd.f32 %v788_v48, %v2177_v2  ;;  %v670_v51 = vpop.f32.mrb[3].mxu0  ;;  %v790_v52 = vpop.f32.mrb[3].mxu1 }
  0xff   : > { %v1580_v53 = vpack.c.bf16 %v667_v43, %v665_v39  ;;  %v1628_v54 = vpack.c.bf16 %v787_v46, %v785_v40  ;;  %v671_v55 = vadd.f32 %v670_v51, %v2180_v36  ;;  %v791_v56 = vadd.f32 %v790_v52, %v2180_v36 }
 0x100   : > { %v497_v43 = vsub.s32 2, %v2167_v24 }
 0x101   : > { %1304 = vst [vmem:[%s2190_s23] sm:$0xff] %v1580_v53  ;;  %1352 = vst [vmem:[%s2190_s23 + $0x120] sm:$0xff] %v1628_v54  ;;  %v1582_v57 = vpack.c.bf16 %v671_v55, %v669_v49  ;;  %v1630_v58 = vpack.c.bf16 %v791_v56, %v789_v50 }
 0x103   : > { %1306 = vst [vmem:[%s2190_s23 + $0xc] sm:$0xff] %v1582_v57  ;;  %1354 = vst [vmem:[%s2190_s23 + $0x12c] sm:$0xff] %v1630_v58  ;;  %v674_v59 = vpop.f32.mrb[4].mxu0  ;;  %v794_v60 = vpop.f32.mrb[4].mxu1  ;;  %v2234_v57 = vrot.slane %v2173_v45, %v497_v43 }
 0x104   : > { %v675_v61 = vadd.f32 %v674_v59, %v2177_v2  ;;  %v795_v62 = vadd.f32 %v794_v60, %v2177_v2  ;;  %v676_v63 = vpop.f32.mrb[5].mxu0  ;;  %v796_v0 = vpop.f32.mrb[5].mxu1 }
 0x105   : > { %v677_v1 = vadd.f32 %v676_v63, %v2180_v36  ;;  %v797_v4 = vadd.f32 %v796_v0, %v2180_v36  ;;  %v678_v5 = vpop.f32.mrb[6].mxu0  ;;  %v798_v6 = vpop.f32.mrb[6].mxu1 }
 0x106   : > { %v679_v7 = vadd.f32 %v678_v5, %v2177_v2  ;;  %v799_v8 = vadd.f32 %v798_v6, %v2177_v2  ;;  %v680_v9 = vpop.f32.mrb[7].mxu0  ;;  %v800_v10 = vpop.f32.mrb[7].mxu1 }
 0x107   : > { %v1584_v11 = vpack.c.bf16 %v677_v1, %v675_v61  ;;  %v1632_v44 = vpack.c.bf16 %v797_v4, %v795_v62  ;;  %v681_v12 = vadd.f32 %v680_v9, %v2180_v36  ;;  %v801_v14 = vadd.f32 %v800_v10, %v2180_v36 }
 0x109   : > { %1308 = vst [vmem:[%s2190_s23 + $0x18] sm:$0xff] %v1584_v11  ;;  %1356 = vst [vmem:[%s2190_s23 + $0x138] sm:$0xff] %v1632_v44  ;;  %v1586_v15 = vpack.c.bf16 %v681_v12, %v679_v7  ;;  %v1634_v17 = vpack.c.bf16 %v801_v14, %v799_v8 }
 0x10b   : > { %1310 = vst [vmem:[%s2190_s23 + $0x24] sm:$0xff] %v1586_v15  ;;  %1358 = vst [vmem:[%s2190_s23 + $0x144] sm:$0xff] %v1634_v17  ;;  %v684_v3 = vpop.f32.mrb[8].mxu0  ;;  %v804_v18 = vpop.f32.mrb[8].mxu1 }
 0x10c   : > { %v685_v19 = vadd.f32 %v684_v3, %v2177_v2  ;;  %v805_v20 = vadd.f32 %v804_v18, %v2177_v2  ;;  %v686_v21 = vpop.f32.mrb[9].mxu0  ;;  %v806_v22 = vpop.f32.mrb[9].mxu1 }
 0x10d   : > { %v687_v23 = vadd.f32 %v686_v21, %v2180_v36  ;;  %v807_v25 = vadd.f32 %v806_v22, %v2180_v36  ;;  %v688_v26 = vpop.f32.mrb[10].mxu0  ;;  %v808_v28 = vpop.f32.mrb[10].mxu1 }
 0x10e   : > { %v689_v29 = vadd.f32 %v688_v26, %v2177_v2  ;;  %v809_v30 = vadd.f32 %v808_v28, %v2177_v2  ;;  %v690_v31 = vpop.f32.mrb[11].mxu0  ;;  %v810_v32 = vpop.f32.mrb[11].mxu1 }
 0x10f   : > { %v1588_v33 = vpack.c.bf16 %v687_v23, %v685_v19  ;;  %v1636_v34 = vpack.c.bf16 %v807_v25, %v805_v20  ;;  %v691_v35 = vadd.f32 %v690_v31, %v2180_v36  ;;  %v811_v16 = vadd.f32 %v810_v32, %v2180_v36 }
 0x111   : > { %1312 = vst [vmem:[%s2190_s23 + $0x30] sm:$0xff] %v1588_v33  ;;  %1360 = vst [vmem:[%s2190_s23 + $0x150] sm:$0xff] %v1636_v34  ;;  %v1590_v27 = vpack.c.bf16 %v691_v35, %v689_v29  ;;  %v1638_v13 = vpack.c.bf16 %v811_v16, %v809_v30 }
 0x113   : > { %1314 = vst [vmem:[%s2190_s23 + $0x3c] sm:$0xff] %v1590_v27  ;;  %1362 = vst [vmem:[%s2190_s23 + $0x15c] sm:$0xff] %v1638_v13  ;;  %v694_v37 = vpop.f32.mrb[12].mxu0  ;;  %v814_v38 = vpop.f32.mrb[12].mxu1 }
 0x114   : > { %v695_v39 = vadd.f32 %v694_v37, %v2177_v2  ;;  %v815_v40 = vadd.f32 %v814_v38, %v2177_v2  ;;  %v696_v41 = vpop.f32.mrb[13].mxu0  ;;  %v816_v42 = vpop.f32.mrb[13].mxu1 }
 0x115   : > { %v697_v46 = vadd.f32 %v696_v41, %v2180_v36  ;;  %v817_v47 = vadd.f32 %v816_v42, %v2180_v36  ;;  %v698_v48 = vpop.f32.mrb[14].mxu0  ;;  %v818_v49 = vpop.f32.mrb[14].mxu1 }
 0x116   : > { %v699_v50 = vadd.f32 %v698_v48, %v2177_v2  ;;  %v819_v51 = vadd.f32 %v818_v49, %v2177_v2  ;;  %v700_v52 = vpop.f32.mrb[15].mxu0  ;;  %v820_v53 = vpop.f32.mrb[15].mxu1 }
 0x117   : > { %v1592_v54 = vpack.c.bf16 %v697_v46, %v695_v39  ;;  %v1640_v55 = vpack.c.bf16 %v817_v47, %v815_v40  ;;  %v701_v56 = vadd.f32 %v700_v52, %v2180_v36  ;;  %v821_v24 = vadd.f32 %v820_v53, %v2180_v36 }
 0x119   : > { %1316 = vst [vmem:[%s2190_s23 + $0x48] sm:$0xff] %v1592_v54  ;;  %1364 = vst [vmem:[%s2190_s23 + $0x168] sm:$0xff] %v1640_v55  ;;  %v1594_v58 = vpack.c.bf16 %v701_v56, %v699_v50  ;;  %v1642_v59 = vpack.c.bf16 %v821_v24, %v819_v51 }
 0x11b   : > { %1318 = vst [vmem:[%s2190_s23 + $0x54] sm:$0xff] %v1594_v58  ;;  %1366 = vst [vmem:[%s2190_s23 + $0x174] sm:$0xff] %v1642_v59  ;;  %v704_v60 = vpop.f32.mrb[16].mxu0  ;;  %v1765_v61 = vpop.f32.mrb[16].mxu1 }
 0x11c   : > { %v705_v62 = vadd.f32 %v704_v60, %v2177_v2  ;;  %v866_v63 = vadd.f32 %v1765_v61, %v2234_v57  ;;  %v706_v0 = vpop.f32.mrb[17].mxu0  ;;  %v857_v1 = vpop.f32.mrb[17].mxu1 }
 0x11d   : > { %v707_v4 = vadd.f32 %v706_v0, %v2180_v36  ;;  %v858_v45 = vadd.f32 %v857_v1, %v2234_v57  ;;  %v708_v5 = vpop.f32.mrb[18].mxu0  ;;  %v1766_v6 = vpop.f32.mrb[18].mxu1 }
 0x11e   : > { %v1585_v7 = vpack.c.bf16 %v866_v63, %v866_v63  ;;  %v709_v8 = vadd.f32 %v708_v5, %v2177_v2  ;;  %v869_v9 = vadd.f32 %v1766_v6, %v2234_v57  ;;  %v710_v10 = vpop.f32.mrb[19].mxu0  ;;  %v860_v11 = vpop.f32.mrb[19].mxu1 }
 0x11f   : > { %v1596_v44 = vpack.c.bf16 %v707_v4, %v705_v62  ;;  %v1581_v12 = vpack.c.bf16 %v858_v45, %v858_v45  ;;  %v711_v14 = vadd.f32 %v710_v10, %v2180_v36  ;;  %v861_v15 = vadd.f32 %v860_v11, %v2234_v57 }
 0x120   : > { %1309 = vst [vmem:[%s2190_s23 + $0x20] sm:$0xf] %v1585_v7  ;;  %v1587_v17 = vpack.c.bf16 %v869_v9, %v869_v9 }
 0x121   : > { %1320 = vst [vmem:[%s2190_s23 + $0x60] sm:$0xff] %v1596_v44  ;;  %1305 = vst [vmem:[%s2190_s23 + $0x8] sm:$0xf] %v1581_v12  ;;  %v1598_v3 = vpack.c.bf16 %v711_v14, %v709_v8  ;;  %v1583_v18 = vpack.c.bf16 %v861_v15, %v861_v15 }
 0x122   : > { %1311 = vst [vmem:[%s2190_s23 + $0x2c] sm:$0xf] %v1587_v17 }
 0x123   : > { %1322 = vst [vmem:[%s2190_s23 + $0x6c] sm:$0xff] %v1598_v3  ;;  %1307 = vst [vmem:[%s2190_s23 + $0x14] sm:$0xf] %v1583_v18  ;;  %v714_v19 = vpop.f32.mrb[20].mxu0  ;;  %v1769_v20 = vpop.f32.mrb[20].mxu1 }
 0x124   : > { %v715_v21 = vadd.f32 %v714_v19, %v2177_v2  ;;  %v882_v22 = vadd.f32 %v1769_v20, %v2234_v57  ;;  %v716_v23 = vpop.f32.mrb[21].mxu0  ;;  %v873_v25 = vpop.f32.mrb[21].mxu1 }
 0x125   : > { %v717_v26 = vadd.f32 %v716_v23, %v2180_v36  ;;  %v874_v28 = vadd.f32 %v873_v25, %v2234_v57  ;;  %v718_v29 = vpop.f32.mrb[22].mxu0  ;;  %v1770_v30 = vpop.f32.mrb[22].mxu1 }
 0x126   : > { %v1593_v31 = vpack.c.bf16 %v882_v22, %v882_v22  ;;  %v719_v32 = vadd.f32 %v718_v29, %v2177_v2  ;;  %v885_v33 = vadd.f32 %v1770_v30, %v2234_v57  ;;  %v720_v34 = vpop.f32.mrb[23].mxu0  ;;  %v876_v35 = vpop.f32.mrb[23].mxu1 }
 0x127   : > { %v1600_v16 = vpack.c.bf16 %v717_v26, %v715_v21  ;;  %v1589_v27 = vpack.c.bf16 %v874_v28, %v874_v28  ;;  %v721_v13 = vadd.f32 %v720_v34, %v2180_v36  ;;  %v877_v37 = vadd.f32 %v876_v35, %v2234_v57 }
 0x128   : > { %1317 = vst [vmem:[%s2190_s23 + $0x50] sm:$0xf] %v1593_v31  ;;  %v1595_v38 = vpack.c.bf16 %v885_v33, %v885_v33 }
 0x129   : > { %1324 = vst [vmem:[%s2190_s23 + $0x78] sm:$0xff] %v1600_v16  ;;  %1313 = vst [vmem:[%s2190_s23 + $0x38] sm:$0xf] %v1589_v27  ;;  %v1602_v39 = vpack.c.bf16 %v721_v13, %v719_v32  ;;  %v1591_v40 = vpack.c.bf16 %v877_v37, %v877_v37 }
 0x12a   : > { %1319 = vst [vmem:[%s2190_s23 + $0x5c] sm:$0xf] %v1595_v38 }
 0x12b   : > { %1326 = vst [vmem:[%s2190_s23 + $0x84] sm:$0xff] %v1602_v39  ;;  %1315 = vst [vmem:[%s2190_s23 + $0x44] sm:$0xf] %v1591_v40  ;;  %v724_v41 = vpop.f32.mrb[24].mxu0  ;;  %v1773_v42 = vpop.f32.mrb[24].mxu1 }
 0x12c   : > { %v725_v43 = vadd.f32 %v724_v41, %v2177_v2  ;;  %v898_v46 = vadd.f32 %v1773_v42, %v2234_v57  ;;  %v726_v47 = vpop.f32.mrb[25].mxu0  ;;  %v889_v48 = vpop.f32.mrb[25].mxu1 }
 0x12d   : > { %v727_v49 = vadd.f32 %v726_v47, %v2180_v36  ;;  %v890_v50 = vadd.f32 %v889_v48, %v2234_v57  ;;  %v728_v51 = vpop.f32.mrb[26].mxu0  ;;  %v1774_v52 = vpop.f32.mrb[26].mxu1 }
 0x12e   : > { %v1601_v53 = vpack.c.bf16 %v898_v46, %v898_v46  ;;  %v729_v54 = vadd.f32 %v728_v51, %v2177_v2  ;;  %v901_v55 = vadd.f32 %v1774_v52, %v2234_v57  ;;  %v730_v56 = vpop.f32.mrb[27].mxu0  ;;  %v892_v24 = vpop.f32.mrb[27].mxu1 }
 0x12f   : > { %v1604_v58 = vpack.c.bf16 %v727_v49, %v725_v43  ;;  %v1597_v59 = vpack.c.bf16 %v890_v50, %v890_v50  ;;  %v731_v60 = vadd.f32 %v730_v56, %v2180_v36  ;;  %v893_v61 = vadd.f32 %v892_v24, %v2234_v57 }
 0x130   : > { %1325 = vst [vmem:[%s2190_s23 + $0x80] sm:$0xf] %v1601_v53  ;;  %v1603_v62 = vpack.c.bf16 %v901_v55, %v901_v55 }
 0x131   : > { %1328 = vst [vmem:[%s2190_s23 + $0x90] sm:$0xff] %v1604_v58  ;;  %1321 = vst [vmem:[%s2190_s23 + $0x68] sm:$0xf] %v1597_v59  ;;  %v1606_v63 = vpack.c.bf16 %v731_v60, %v729_v54  ;;  %v1599_v0 = vpack.c.bf16 %v893_v61, %v893_v61 }
 0x132   : > { %1327 = vst [vmem:[%s2190_s23 + $0x8c] sm:$0xf] %v1603_v62 }
 0x133   : > { %1330 = vst [vmem:[%s2190_s23 + $0x9c] sm:$0xff] %v1606_v63  ;;  %1323 = vst [vmem:[%s2190_s23 + $0x74] sm:$0xf] %v1599_v0  ;;  %v734_v1 = vpop.f32.mrb[28].mxu0  ;;  %v1777_v4 = vpop.f32.mrb[28].mxu1 }
 0x134   : > { %v735_v45 = vadd.f32 %v734_v1, %v2177_v2  ;;  %v914_v5 = vadd.f32 %v1777_v4, %v2234_v57  ;;  %v736_v6 = vpop.f32.mrb[29].mxu0  ;;  %v905_v7 = vpop.f32.mrb[29].mxu1 }
 0x135   : > { %v737_v8 = vadd.f32 %v736_v6, %v2180_v36  ;;  %v906_v9 = vadd.f32 %v905_v7, %v2234_v57  ;;  %v738_v10 = vpop.f32.mrb[30].mxu0  ;;  %v1778_v11 = vpop.f32.mrb[30].mxu1 }
 0x136   : > { %v1609_v44 = vpack.c.bf16 %v914_v5, %v914_v5  ;;  %v739_v12 = vadd.f32 %v738_v10, %v2177_v2  ;;  %v917_v14 = vadd.f32 %v1778_v11, %v2234_v57  ;;  %v740_v15 = vpop.f32.mrb[31].mxu0  ;;  %v908_v17 = vpop.f32.mrb[31].mxu1 }
 0x137   : > { %v1608_v3 = vpack.c.bf16 %v737_v8, %v735_v45  ;;  %v1605_v18 = vpack.c.bf16 %v906_v9, %v906_v9  ;;  %v741_v19 = vadd.f32 %v740_v15, %v2180_v36  ;;  %v909_v20 = vadd.f32 %v908_v17, %v2234_v57 }
 0x138   : > { %1333 = vst [vmem:[%s2190_s23 + $0xb0] sm:$0xf] %v1609_v44  ;;  %v1611_v21 = vpack.c.bf16 %v917_v14, %v917_v14 }
 0x139   : > { %1332 = vst [vmem:[%s2190_s23 + $0xa8] sm:$0xff] %v1608_v3  ;;  %1329 = vst [vmem:[%s2190_s23 + $0x98] sm:$0xf] %v1605_v18  ;;  %v1610_v22 = vpack.c.bf16 %v741_v19, %v739_v12  ;;  %v1607_v23 = vpack.c.bf16 %v909_v20, %v909_v20 }
 0x13a   : > { %1335 = vst [vmem:[%s2190_s23 + $0xbc] sm:$0xf] %v1611_v21 }
 0x13b   : > { %1334 = vst [vmem:[%s2190_s23 + $0xb4] sm:$0xff] %v1610_v22  ;;  %1331 = vst [vmem:[%s2190_s23 + $0xa4] sm:$0xf] %v1607_v23  ;;  %v744_v25 = vpop.f32.mrb[32].mxu0  ;;  %v1781_v26 = vpop.f32.mrb[32].mxu1 }
 0x13c   : > { %v745_v28 = vadd.f32 %v744_v25, %v2177_v2  ;;  %v930_v29 = vadd.f32 %v1781_v26, %v2234_v57  ;;  %v746_v30 = vpop.f32.mrb[33].mxu0  ;;  %v921_v31 = vpop.f32.mrb[33].mxu1 }
 0x13d   : > { %v747_v32 = vadd.f32 %v746_v30, %v2180_v36  ;;  %v922_v33 = vadd.f32 %v921_v31, %v2234_v57  ;;  %v748_v34 = vpop.f32.mrb[34].mxu0  ;;  %v1782_v35 = vpop.f32.mrb[34].mxu1 }
 0x13e   : > { %v1617_v16 = vpack.c.bf16 %v930_v29, %v930_v29  ;;  %v749_v27 = vadd.f32 %v748_v34, %v2177_v2  ;;  %v933_v13 = vadd.f32 %v1782_v35, %v2234_v57  ;;  %v750_v37 = vpop.f32.mrb[35].mxu0  ;;  %v924_v38 = vpop.f32.mrb[35].mxu1 }
 0x13f   : > { %v1612_v39 = vpack.c.bf16 %v747_v32, %v745_v28  ;;  %v1613_v40 = vpack.c.bf16 %v922_v33, %v922_v33  ;;  %v751_v41 = vadd.f32 %v750_v37, %v2180_v36  ;;  %v925_v42 = vadd.f32 %v924_v38, %v2234_v57 }
 0x140   : > { %1341 = vst [vmem:[%s2190_s23 + $0xe0] sm:$0xf] %v1617_v16  ;;  %v1619_v43 = vpack.c.bf16 %v933_v13, %v933_v13 }
 0x141   : > { %1336 = vst [vmem:[%s2190_s23 + $0xc0] sm:$0xff] %v1612_v39  ;;  %1337 = vst [vmem:[%s2190_s23 + $0xc8] sm:$0xf] %v1613_v40  ;;  %v1614_v46 = vpack.c.bf16 %v751_v41, %v749_v27  ;;  %v1615_v47 = vpack.c.bf16 %v925_v42, %v925_v42 }
 0x142   : > { %1343 = vst [vmem:[%s2190_s23 + $0xec] sm:$0xf] %v1619_v43 }
 0x143   : > { %1338 = vst [vmem:[%s2190_s23 + $0xcc] sm:$0xff] %v1614_v46  ;;  %1339 = vst [vmem:[%s2190_s23 + $0xd4] sm:$0xf] %v1615_v47  ;;  %v754_v48 = vpop.f32.mrb[36].mxu0  ;;  %v1785_v49 = vpop.f32.mrb[36].mxu1 }
 0x144   : > { %v755_v50 = vadd.f32 %v754_v48, %v2177_v2  ;;  %v946_v51 = vadd.f32 %v1785_v49, %v2234_v57  ;;  %v756_v52 = vpop.f32.mrb[37].mxu0  ;;  %v937_v53 = vpop.f32.mrb[37].mxu1 }
 0x145   : > { %v757_v54 = vadd.f32 %v756_v52, %v2180_v36  ;;  %v938_v55 = vadd.f32 %v937_v53, %v2234_v57  ;;  %v758_v56 = vpop.f32.mrb[38].mxu0  ;;  %v1786_v24 = vpop.f32.mrb[38].mxu1 }
 0x146   : > { %v1625_v58 = vpack.c.bf16 %v946_v51, %v946_v51  ;;  %v759_v59 = vadd.f32 %v758_v56, %v2177_v2  ;;  %v949_v60 = vadd.f32 %v1786_v24, %v2234_v57  ;;  %v760_v61 = vpop.f32.mrb[39].mxu0  ;;  %v940_v62 = vpop.f32.mrb[39].mxu1 }
 0x147   : > { %v1616_v63 = vpack.c.bf16 %v757_v54, %v755_v50  ;;  %v1621_v0 = vpack.c.bf16 %v938_v55, %v938_v55  ;;  %v761_v1 = vadd.f32 %v760_v61, %v2180_v36  ;;  %v941_v4 = vadd.f32 %v940_v62, %v2234_v57 }
 0x148   : > { %1349 = vst [vmem:[%s2190_s23 + $0x110] sm:$0xf] %v1625_v58  ;;  %v1627_v45 = vpack.c.bf16 %v949_v60, %v949_v60 }
 0x149   : > { %1340 = vst [vmem:[%s2190_s23 + $0xd8] sm:$0xff] %v1616_v63  ;;  %1345 = vst [vmem:[%s2190_s23 + $0xf8] sm:$0xf] %v1621_v0  ;;  %v1618_v5 = vpack.c.bf16 %v761_v1, %v759_v59  ;;  %v1623_v6 = vpack.c.bf16 %v941_v4, %v941_v4 }
 0x14a   : > { %1351 = vst [vmem:[%s2190_s23 + $0x11c] sm:$0xf] %v1627_v45 }
 0x14b   : > { %1342 = vst [vmem:[%s2190_s23 + $0xe4] sm:$0xff] %v1618_v5  ;;  %1347 = vst [vmem:[%s2190_s23 + $0x104] sm:$0xf] %v1623_v6  ;;  %v764_v7 = vpop.f32.mrb[40].mxu0  ;;  %v1789_v8 = vpop.f32.mrb[40].mxu1 }
 0x14c   : > { %v765_v9 = vadd.f32 %v764_v7, %v2177_v2  ;;  %v962_v10 = vadd.f32 %v1789_v8, %v2234_v57  ;;  %v766_v11 = vpop.f32.mrb[41].mxu0  ;;  %v953_v44 = vpop.f32.mrb[41].mxu1 }
 0x14d   : > { %v767_v12 = vadd.f32 %v766_v11, %v2180_v36  ;;  %v954_v14 = vadd.f32 %v953_v44, %v2234_v57  ;;  %v768_v15 = vpop.f32.mrb[42].mxu0  ;;  %v1790_v17 = vpop.f32.mrb[42].mxu1 }
 0x14e   : > { %v1633_v3 = vpack.c.bf16 %v962_v10, %v962_v10  ;;  %v769_v18 = vadd.f32 %v768_v15, %v2177_v2  ;;  %v965_v19 = vadd.f32 %v1790_v17, %v2234_v57  ;;  %v770_v20 = vpop.f32.mrb[43].mxu0  ;;  %v956_v21 = vpop.f32.mrb[43].mxu1 }
 0x14f   : > { %v1620_v22 = vpack.c.bf16 %v767_v12, %v765_v9  ;;  %v1629_v23 = vpack.c.bf16 %v954_v14, %v954_v14  ;;  %v771_v25 = vadd.f32 %v770_v20, %v2180_v36  ;;  %v957_v26 = vadd.f32 %v956_v21, %v2234_v57 }
 0x150   : > { %1357 = vst [vmem:[%s2190_s23 + $0x140] sm:$0xf] %v1633_v3  ;;  %v1635_v28 = vpack.c.bf16 %v965_v19, %v965_v19 }
 0x151   : > { %1344 = vst [vmem:[%s2190_s23 + $0xf0] sm:$0xff] %v1620_v22  ;;  %1353 = vst [vmem:[%s2190_s23 + $0x128] sm:$0xf] %v1629_v23  ;;  %v1622_v29 = vpack.c.bf16 %v771_v25, %v769_v18  ;;  %v1631_v30 = vpack.c.bf16 %v957_v26, %v957_v26 }
 0x152   : > { %1359 = vst [vmem:[%s2190_s23 + $0x14c] sm:$0xf] %v1635_v28 }
 0x153   : > { %1346 = vst [vmem:[%s2190_s23 + $0xfc] sm:$0xff] %v1622_v29  ;;  %1355 = vst [vmem:[%s2190_s23 + $0x134] sm:$0xf] %v1631_v30  ;;  %v774_v31 = vpop.f32.mrb[44].mxu0  ;;  %v1793_v32 = vpop.f32.mrb[44].mxu1 }
 0x154   : > { %v775_v33 = vadd.f32 %v774_v31, %v2177_v2  ;;  %v978_v34 = vadd.f32 %v1793_v32, %v2234_v57  ;;  %v776_v35 = vpop.f32.mrb[45].mxu0  ;;  %v969_v16 = vpop.f32.mrb[45].mxu1 }
 0x155   : > { %v777_v27 = vadd.f32 %v776_v35, %v2180_v36  ;;  %v970_v13 = vadd.f32 %v969_v16, %v2234_v57  ;;  %v778_v37 = vpop.f32.mrb[46].mxu0  ;;  %v1794_v38 = vpop.f32.mrb[46].mxu1 }
 0x156   : > { %v1641_v39 = vpack.c.bf16 %v978_v34, %v978_v34  ;;  %v779_v40 = vadd.f32 %v778_v37, %v2177_v2  ;;  %v981_v41 = vadd.f32 %v1794_v38, %v2234_v57  ;;  %v780_v42 = vpop.f32.mrb[47].mxu0  ;;  %v972_v43 = vpop.f32.mrb[47].mxu1 }
 0x157   : > { %v1624_v46 = vpack.c.bf16 %v777_v27, %v775_v33  ;;  %v1637_v47 = vpack.c.bf16 %v970_v13, %v970_v13  ;;  %v781_v48 = vadd.f32 %v780_v42, %v2180_v36  ;;  %v973_v49 = vadd.f32 %v972_v43, %v2234_v57 }
 0x158   : > { %1365 = vst [vmem:[%s2190_s23 + $0x170] sm:$0xf] %v1641_v39  ;;  %v1643_v50 = vpack.c.bf16 %v981_v41, %v981_v41 }
 0x159   : > { %1348 = vst [vmem:[%s2190_s23 + $0x108] sm:$0xff] %v1624_v46  ;;  %1361 = vst [vmem:[%s2190_s23 + $0x158] sm:$0xf] %v1637_v47  ;;  %v1626_v51 = vpack.c.bf16 %v781_v48, %v779_v40  ;;  %v1639_v52 = vpack.c.bf16 %v973_v49, %v973_v49 }
 0x15a   : > { %1367 = vst [vmem:[%s2190_s23 + $0x17c] sm:$0xf] %v1643_v50 }
 0x15b   : > { %1350 = vst [vmem:[%s2190_s23 + $0x114] sm:$0xff] %v1626_v51  ;;  %1363 = vst [vmem:[%s2190_s23 + $0x164] sm:$0xf] %v1639_v52 }
 0x15c PF: > { %s15_s20 = sadd.s32 1, %s1891_s20   ;;  %s2367_s18 = smov %s1887_s19 }
 0x15d   : > { %p12_p5 = scmp.ge.s32.totalorder %s15_s20, 4   ;;  %s2368_s19 = smov %s2370_s21 }
 0x15f   :  { %14 = sbr.rel (!%p12_p5) target bundleno = 2 (0x2), region = 76 }

// kernel: vae_attention_block.5
= control target key start
LH: loop header
LB: loop body
LE: loop exit
PB: predicated region body
PF: predicated region fallthrough
CT: control target
= control target key end

     0   :  { %s4511_s21 = smov 0   ;;  %s4513_s22 = smov 0   ;;  %s5794_s0 = inlined_call_operand.vmem [shape: bf16[2,256,384], index: 0, kind: input, shape index: {}, may-alias: {0,1,2}]   ;;  %s5795_s1 = inlined_call_operand.vmem [shape: bf16[2,256,384], index: 1, kind: input, shape index: {}, may-alias: {0,1,2}]   ;;  %s5796_s2 = inlined_call_operand.vmem [shape: bf16[2,256,384], index: 2, kind: input, shape index: {}, may-alias: {0,1,2}]   ;;  %s5797_s3 = inlined_call_operand.vmem [shape: bf16[128,128], index: 3, kind: input, shape index: {}]   ;;  %s5798_s4 = inlined_call_operand.vmem [shape: f32[1,128], index: 4, kind: input, shape index: {}]   ;;  %s5799_s5 = inlined_call_operand.vmem [shape: f32[2,128,256], index: 5, kind: input, shape index: {}]   ;;  %s5800_s6 = inlined_call_operand.vmem [shape: f32[2,128,256], index: 6, kind: output, shape index: {}]  }
   0x1   :  { %s4515_s23 = smov 0   ;;  %s4517_s24 = smov 0  }
   0x2   :  { %s4519_s25 = smov 0  }
   0x3 LB: > { %s28_s26 = sadd.s32 1, %s4469_s24  ;;  %p44_p1 = scmp.ne.s32.totalorder %s4461_s22, %s4457_s21  ;;  %s4473_s25 = sphi %s4519_s25, %s16_s25   ;;  %s4469_s24 = sphi %s4517_s24, %s5997_s24   ;;  %s4465_s23 = sphi %s4515_s23, %s5996_s23   ;;  %s4461_s22 = sphi %s4513_s22, %s5995_s22   ;;  %s4457_s21 = sphi %s4511_s21, %s5994_s21  }
   0x4   : > { %p30_p0 = scmp.ge.s32.totalorder %s28_s26, 2  ;;  %p45_p2 = scmp.eq.s32.totalorder %s4473_s25, 0 }
   0x5   : > { %s37_s29 = sadd.s32 1, %s4461_s22  ;;  %p3755_p5 = scmp.ge.s32.totalorder %s4473_s25, 2 }
   0x6   : > { %s5999_s26 = smov (%p30_p0, %s28_s26), 0  ;;  %p4542_p3 = por %p45_p2, %p44_p1 }
   0x7   : > { %s32_s28 = ssub.s32 %s4469_s24, %s5999_s26  ;;  %226 = sbr.rel (%p3755_p5) target bundleno = 92 (0x5c), region = 24 }
   0x8   : > { %p35_p4 = scmp.eq.s32.totalorder %s32_s28, 0 }
   0xa   : > { %s4550_s30 = scalar_select %p35_p4, %s4461_s22, %s37_s29  }
   0xe   : > { %229 = sbr.rel (!%p4542_p3) target bundleno = 40 (0x28), region = 28  ;;  %s231_s7 = sand.u32 (%p4542_p3), 1, %s4461_s22  }
   0xf   : > { %s4143_s8 = smul.u32 (%p4542_p3), 384, %s4469_s24  ;;  %s3756_s9 = sshll.u32 (%p4542_p3), %s231_s7, 7 }
  0x10   : > { %s4565_s13 = scalar_lea.vmem (%p4542_p3), [#allocation5], %s3756_s9 }
  0x11   : > { %s4560_s12 = scalar_lea.vmem (%p4542_p3), %s5794_s0, %s4143_s8 }
  0x12   : > { %v255_v0 = vld [vmem:[%s4560_s12] sm:$0xf] (%p4542_p3)  ;;  %v257_v1 = vld [vmem:[%s4560_s12 + $0xc] sm:$0xf] (%p4542_p3)  ;;  %v259_v2 = vld [vmem:[%s4560_s12 + $0x18] sm:$0xf] (%p4542_p3) }
  0x13   : > { %256 = vst [vmem:[%s4565_s13] sm:$0xf] (%p4542_p3), %v255_v0  ;;  %258 = vst [vmem:[%s4565_s13 + $0x4] sm:$0xf] (%p4542_p3), %v257_v1  ;;  %v261_v3 = vld [vmem:[%s4560_s12 + $0x24] sm:$0xf] (%p4542_p3) }
  0x14   : > { %260 = vst [vmem:[%s4565_s13 + $0x8] sm:$0xf] (%p4542_p3), %v259_v2  ;;  %v263_v4 = vld [vmem:[%s4560_s12 + $0x30] sm:$0xf] (%p4542_p3)  ;;  %v265_v5 = vld [vmem:[%s4560_s12 + $0x3c] sm:$0xf] (%p4542_p3) }
  0x15   : > { %262 = vst [vmem:[%s4565_s13 + $0xc] sm:$0xf] %v261_v3  ;;  %264 = vst [vmem:[%s4565_s13 + $0x10] sm:$0xf] %v263_v4  ;;  %v267_v6 = vld [vmem:[%s4560_s12 + $0x48] sm:$0xf] }
  0x16   : > { %266 = vst [vmem:[%s4565_s13 + $0x14] sm:$0xf] %v265_v5  ;;  %v269_v7 = vld [vmem:[%s4560_s12 + $0x54] sm:$0xf]  ;;  %v271_v8 = vld [vmem:[%s4560_s12 + $0x60] sm:$0xf] }
  0x17   : > { %268 = vst [vmem:[%s4565_s13 + $0x18] sm:$0xf] %v267_v6  ;;  %270 = vst [vmem:[%s4565_s13 + $0x1c] sm:$0xf] %v269_v7  ;;  %v273_v9 = vld [vmem:[%s4560_s12 + $0x6c] sm:$0xf] }
  0x18   : > { %272 = vst [vmem:[%s4565_s13 + $0x20] sm:$0xf] %v271_v8  ;;  %v275_v10 = vld [vmem:[%s4560_s12 + $0x78] sm:$0xf]  ;;  %v277_v11 = vld [vmem:[%s4560_s12 + $0x84] sm:$0xf] }
  0x19   : > { %274 = vst [vmem:[%s4565_s13 + $0x24] sm:$0xf] %v273_v9  ;;  %276 = vst [vmem:[%s4565_s13 + $0x28] sm:$0xf] %v275_v10  ;;  %v279_v12 = vld [vmem:[%s4560_s12 + $0x90] sm:$0xf] }
  0x1a   : > { %278 = vst [vmem:[%s4565_s13 + $0x2c] sm:$0xf] %v277_v11  ;;  %v281_v13 = vld [vmem:[%s4560_s12 + $0x9c] sm:$0xf]  ;;  %v283_v14 = vld [vmem:[%s4560_s12 + $0xa8] sm:$0xf] }
  0x1b   : > { %280 = vst [vmem:[%s4565_s13 + $0x30] sm:$0xf] %v279_v12  ;;  %282 = vst [vmem:[%s4565_s13 + $0x34] sm:$0xf] %v281_v13  ;;  %v285_v15 = vld [vmem:[%s4560_s12 + $0xb4] sm:$0xf] }
  0x1c   : > { %284 = vst [vmem:[%s4565_s13 + $0x38] sm:$0xf] %v283_v14  ;;  %v287_v16 = vld [vmem:[%s4560_s12 + $0xc0] sm:$0xf]  ;;  %v289_v17 = vld [vmem:[%s4560_s12 + $0xcc] sm:$0xf] }
  0x1d   : > { %286 = vst [vmem:[%s4565_s13 + $0x3c] sm:$0xf] %v285_v15  ;;  %288 = vst [vmem:[%s4565_s13 + $0x40] sm:$0xf] %v287_v16  ;;  %v291_v18 = vld [vmem:[%s4560_s12 + $0xd8] sm:$0xf] }
  0x1e   : > { %290 = vst [vmem:[%s4565_s13 + $0x44] sm:$0xf] %v289_v17  ;;  %v293_v19 = vld [vmem:[%s4560_s12 + $0xe4] sm:$0xf]  ;;  %v295_v20 = vld [vmem:[%s4560_s12 + $0xf0] sm:$0xf] }
  0x1f   : > { %292 = vst [vmem:[%s4565_s13 + $0x48] sm:$0xf] %v291_v18  ;;  %294 = vst [vmem:[%s4565_s13 + $0x4c] sm:$0xf] %v293_v19  ;;  %v297_v21 = vld [vmem:[%s4560_s12 + $0xfc] sm:$0xf] }
  0x20   : > { %296 = vst [vmem:[%s4565_s13 + $0x50] sm:$0xf] %v295_v20  ;;  %v299_v22 = vld [vmem:[%s4560_s12 + $0x108] sm:$0xf]  ;;  %v301_v23 = vld [vmem:[%s4560_s12 + $0x114] sm:$0xf] }
  0x21   : > { %298 = vst [vmem:[%s4565_s13 + $0x54] sm:$0xf] %v297_v21  ;;  %300 = vst [vmem:[%s4565_s13 + $0x58] sm:$0xf] %v299_v22  ;;  %v303_v24 = vld [vmem:[%s4560_s12 + $0x120] sm:$0xf] }
  0x22   : > { %302 = vst [vmem:[%s4565_s13 + $0x5c] sm:$0xf] %v301_v23  ;;  %v305_v25 = vld [vmem:[%s4560_s12 + $0x12c] sm:$0xf]  ;;  %v307_v26 = vld [vmem:[%s4560_s12 + $0x138] sm:$0xf] }
  0x23   : > { %304 = vst [vmem:[%s4565_s13 + $0x60] sm:$0xf] %v303_v24  ;;  %306 = vst [vmem:[%s4565_s13 + $0x64] sm:$0xf] %v305_v25  ;;  %v309_v27 = vld [vmem:[%s4560_s12 + $0x144] sm:$0xf] }
  0x24   : > { %308 = vst [vmem:[%s4565_s13 + $0x68] sm:$0xf] %v307_v26  ;;  %v311_v28 = vld [vmem:[%s4560_s12 + $0x150] sm:$0xf]  ;;  %v313_v29 = vld [vmem:[%s4560_s12 + $0x15c] sm:$0xf] }
  0x25   : > { %310 = vst [vmem:[%s4565_s13 + $0x6c] sm:$0xf] %v309_v27  ;;  %312 = vst [vmem:[%s4565_s13 + $0x70] sm:$0xf] %v311_v28  ;;  %v315_v30 = vld [vmem:[%s4560_s12 + $0x168] sm:$0xf] }
  0x26   : > { %314 = vst [vmem:[%s4565_s13 + $0x74] sm:$0xf] %v313_v29  ;;  %v317_v31 = vld [vmem:[%s4560_s12 + $0x174] sm:$0xf]  ;;  %316 = vst [vmem:[%s4565_s13 + $0x78] sm:$0xf] %v315_v30 }
  0x27   : > { %318 = vst [vmem:[%s4565_s13 + $0x7c] sm:$0xf] %v317_v31 }
  0x28 PF: > { %405 = sbr.rel (!%p4542_p3) target bundleno = 66 (0x42), region = 69  ;;  %s407_s14 = sand.u32 (%p4542_p3), 1, %s4461_s22  }
  0x29   : > { %s3759_s15 = smul.u32 (%p4542_p3), 384, %s4469_s24  ;;  %s3758_s16 = sshll.u32 (%p4542_p3), %s407_s14, 7 }
  0x2a   : > { %s4640_s20 = scalar_lea.vmem (%p4542_p3), [#allocation6], %s3758_s16 }
  0x2b   : > { %s4635_s19 = scalar_lea.vmem (%p4542_p3), %s5795_s1, %s3759_s15 }
  0x2c   : > { %v3760_v32 = vld [vmem:[%s4635_s19 + $0x4] sm:$0xf] (%p4542_p3)  ;;  %v3761_v33 = vld [vmem:[%s4635_s19 + $0x10] sm:$0xf] (%p4542_p3)  ;;  %v3762_v34 = vld [vmem:[%s4635_s19 + $0x1c] sm:$0xf] (%p4542_p3) }
  0x2d   : > { %430 = vst [vmem:[%s4640_s20] sm:$0xf] (%p4542_p3), %v3760_v32  ;;  %432 = vst [vmem:[%s4640_s20 + $0x4] sm:$0xf] (%p4542_p3), %v3761_v33  ;;  %v3763_v35 = vld [vmem:[%s4635_s19 + $0x28] sm:$0xf] (%p4542_p3) }
  0x2e   : > { %434 = vst [vmem:[%s4640_s20 + $0x8] sm:$0xf] (%p4542_p3), %v3762_v34  ;;  %v3764_v36 = vld [vmem:[%s4635_s19 + $0x34] sm:$0xf] (%p4542_p3)  ;;  %v3765_v37 = vld [vmem:[%s4635_s19 + $0x40] sm:$0xf] (%p4542_p3) }
  0x2f   : > { %436 = vst [vmem:[%s4640_s20 + $0xc] sm:$0xf] %v3763_v35  ;;  %438 = vst [vmem:[%s4640_s20 + $0x10] sm:$0xf] %v3764_v36  ;;  %v3766_v38 = vld [vmem:[%s4635_s19 + $0x4c] sm:$0xf] }
  0x30   : > { %440 = vst [vmem:[%s4640_s20 + $0x14] sm:$0xf] %v3765_v37  ;;  %v3767_v39 = vld [vmem:[%s4635_s19 + $0x58] sm:$0xf]  ;;  %v3768_v40 = vld [vmem:[%s4635_s19 + $0x64] sm:$0xf] }
  0x31   : > { %442 = vst [vmem:[%s4640_s20 + $0x18] sm:$0xf] %v3766_v38  ;;  %444 = vst [vmem:[%s4640_s20 + $0x1c] sm:$0xf] %v3767_v39  ;;  %v3769_v41 = vld [vmem:[%s4635_s19 + $0x70] sm:$0xf] }
  0x32   : > { %446 = vst [vmem:[%s4640_s20 + $0x20] sm:$0xf] %v3768_v40  ;;  %v3770_v42 = vld [vmem:[%s4635_s19 + $0x7c] sm:$0xf]  ;;  %v3771_v43 = vld [vmem:[%s4635_s19 + $0x88] sm:$0xf] }
  0x33   : > { %448 = vst [vmem:[%s4640_s20 + $0x24] sm:$0xf] %v3769_v41  ;;  %450 = vst [vmem:[%s4640_s20 + $0x28] sm:$0xf] %v3770_v42  ;;  %v3772_v44 = vld [vmem:[%s4635_s19 + $0x94] sm:$0xf] }
  0x34   : > { %452 = vst [vmem:[%s4640_s20 + $0x2c] sm:$0xf] %v3771_v43  ;;  %v3773_v45 = vld [vmem:[%s4635_s19 + $0xa0] sm:$0xf]  ;;  %v3774_v46 = vld [vmem:[%s4635_s19 + $0xac] sm:$0xf] }
  0x35   : > { %454 = vst [vmem:[%s4640_s20 + $0x30] sm:$0xf] %v3772_v44  ;;  %456 = vst [vmem:[%s4640_s20 + $0x34] sm:$0xf] %v3773_v45  ;;  %v3775_v47 = vld [vmem:[%s4635_s19 + $0xb8] sm:$0xf] }
  0x36   : > { %458 = vst [vmem:[%s4640_s20 + $0x38] sm:$0xf] %v3774_v46  ;;  %v3776_v48 = vld [vmem:[%s4635_s19 + $0xc4] sm:$0xf]  ;;  %v3777_v49 = vld [vmem:[%s4635_s19 + $0xd0] sm:$0xf] }
  0x37   : > { %460 = vst [vmem:[%s4640_s20 + $0x3c] sm:$0xf] %v3775_v47  ;;  %462 = vst [vmem:[%s4640_s20 + $0x40] sm:$0xf] %v3776_v48  ;;  %v3778_v50 = vld [vmem:[%s4635_s19 + $0xdc] sm:$0xf] }
  0x38   : > { %464 = vst [vmem:[%s4640_s20 + $0x44] sm:$0xf] %v3777_v49  ;;  %v3779_v51 = vld [vmem:[%s4635_s19 + $0xe8] sm:$0xf]  ;;  %v3780_v52 = vld [vmem:[%s4635_s19 + $0xf4] sm:$0xf] }
  0x39   : > { %466 = vst [vmem:[%s4640_s20 + $0x48] sm:$0xf] %v3778_v50  ;;  %468 = vst [vmem:[%s4640_s20 + $0x4c] sm:$0xf] %v3779_v51  ;;  %v3781_v53 = vld [vmem:[%s4635_s19 + $0x100] sm:$0xf] }
  0x3a   : > { %470 = vst [vmem:[%s4640_s20 + $0x50] sm:$0xf] %v3780_v52  ;;  %v3782_v54 = vld [vmem:[%s4635_s19 + $0x10c] sm:$0xf]  ;;  %v3783_v55 = vld [vmem:[%s4635_s19 + $0x118] sm:$0xf] }
  0x3b   : > { %472 = vst [vmem:[%s4640_s20 + $0x54] sm:$0xf] %v3781_v53  ;;  %474 = vst [vmem:[%s4640_s20 + $0x58] sm:$0xf] %v3782_v54  ;;  %v3784_v56 = vld [vmem:[%s4635_s19 + $0x124] sm:$0xf] }
  0x3c   : > { %476 = vst [vmem:[%s4640_s20 + $0x5c] sm:$0xf] %v3783_v55  ;;  %v3785_v57 = vld [vmem:[%s4635_s19 + $0x130] sm:$0xf]  ;;  %v3786_v58 = vld [vmem:[%s4635_s19 + $0x13c] sm:$0xf] }
  0x3d   : > { %478 = vst [vmem:[%s4640_s20 + $0x60] sm:$0xf] %v3784_v56  ;;  %480 = vst [vmem:[%s4640_s20 + $0x64] sm:$0xf] %v3785_v57  ;;  %v3787_v59 = vld [vmem:[%s4635_s19 + $0x148] sm:$0xf] }
  0x3e   : > { %482 = vst [vmem:[%s4640_s20 + $0x68] sm:$0xf] %v3786_v58  ;;  %v3788_v60 = vld [vmem:[%s4635_s19 + $0x154] sm:$0xf]  ;;  %v3789_v61 = vld [vmem:[%s4635_s19 + $0x160] sm:$0xf] }
  0x3f   : > { %484 = vst [vmem:[%s4640_s20 + $0x6c] sm:$0xf] %v3787_v59  ;;  %486 = vst [vmem:[%s4640_s20 + $0x70] sm:$0xf] %v3788_v60  ;;  %v3790_v62 = vld [vmem:[%s4635_s19 + $0x16c] sm:$0xf] }
  0x40   : > { %488 = vst [vmem:[%s4640_s20 + $0x74] sm:$0xf] %v3789_v61  ;;  %v3791_v63 = vld [vmem:[%s4635_s19 + $0x178] sm:$0xf]  ;;  %490 = vst [vmem:[%s4640_s20 + $0x78] sm:$0xf] %v3790_v62 }
  0x41   : > { %492 = vst [vmem:[%s4640_s20 + $0x7c] sm:$0xf] %v3791_v63 }
  0x42 PF: > { %579 = sbr.rel (!%p4542_p3) target bundleno = 92 (0x5c), region = 110  ;;  %s581_s28 = sand.u32 (%p4542_p3), 1, %s4461_s22  }
  0x43   : > { %s3793_s29 = smul.u32 (%p4542_p3), 384, %s4469_s24  ;;  %s3792_s7 = sshll.u32 (%p4542_p3), %s581_s28, 7 }
  0x44   : > { %s4715_s27 = scalar_lea.vmem (%p4542_p3), [#allocation7], %s3792_s7 }
  0x45   : > { %s4710_s10 = scalar_lea.vmem (%p4542_p3), %s5796_s2, %s3793_s29 }
  0x46   : > { %v3794_v0 = vld [vmem:[%s4710_s10 + $0x8] sm:$0xf] (%p4542_p3)  ;;  %v3795_v1 = vld [vmem:[%s4710_s10 + $0x14] sm:$0xf] (%p4542_p3)  ;;  %v3796_v2 = vld [vmem:[%s4710_s10 + $0x20] sm:$0xf] (%p4542_p3) }
  0x47   : > { %604 = vst [vmem:[%s4715_s27] sm:$0xf] (%p4542_p3), %v3794_v0  ;;  %606 = vst [vmem:[%s4715_s27 + $0x4] sm:$0xf] (%p4542_p3), %v3795_v1  ;;  %v3797_v3 = vld [vmem:[%s4710_s10 + $0x2c] sm:$0xf] (%p4542_p3) }
  0x48   : > { %608 = vst [vmem:[%s4715_s27 + $0x8] sm:$0xf] (%p4542_p3), %v3796_v2  ;;  %v3798_v4 = vld [vmem:[%s4710_s10 + $0x38] sm:$0xf] (%p4542_p3)  ;;  %v3799_v5 = vld [vmem:[%s4710_s10 + $0x44] sm:$0xf] (%p4542_p3) }
  0x49   : > { %610 = vst [vmem:[%s4715_s27 + $0xc] sm:$0xf] %v3797_v3  ;;  %612 = vst [vmem:[%s4715_s27 + $0x10] sm:$0xf] %v3798_v4  ;;  %v3800_v6 = vld [vmem:[%s4710_s10 + $0x50] sm:$0xf] }
  0x4a   : > { %614 = vst [vmem:[%s4715_s27 + $0x14] sm:$0xf] %v3799_v5  ;;  %v3801_v7 = vld [vmem:[%s4710_s10 + $0x5c] sm:$0xf]  ;;  %v3802_v8 = vld [vmem:[%s4710_s10 + $0x68] sm:$0xf] }
  0x4b   : > { %616 = vst [vmem:[%s4715_s27 + $0x18] sm:$0xf] %v3800_v6  ;;  %618 = vst [vmem:[%s4715_s27 + $0x1c] sm:$0xf] %v3801_v7  ;;  %v3803_v9 = vld [vmem:[%s4710_s10 + $0x74] sm:$0xf] }
  0x4c   : > { %620 = vst [vmem:[%s4715_s27 + $0x20] sm:$0xf] %v3802_v8  ;;  %v3804_v10 = vld [vmem:[%s4710_s10 + $0x80] sm:$0xf]  ;;  %v3805_v11 = vld [vmem:[%s4710_s10 + $0x8c] sm:$0xf] }
  0x4d   : > { %622 = vst [vmem:[%s4715_s27 + $0x24] sm:$0xf] %v3803_v9  ;;  %624 = vst [vmem:[%s4715_s27 + $0x28] sm:$0xf] %v3804_v10  ;;  %v3806_v12 = vld [vmem:[%s4710_s10 + $0x98] sm:$0xf] }
  0x4e   : > { %626 = vst [vmem:[%s4715_s27 + $0x2c] sm:$0xf] %v3805_v11  ;;  %v3807_v13 = vld [vmem:[%s4710_s10 + $0xa4] sm:$0xf]  ;;  %v3808_v14 = vld [vmem:[%s4710_s10 + $0xb0] sm:$0xf] }
  0x4f   : > { %628 = vst [vmem:[%s4715_s27 + $0x30] sm:$0xf] %v3806_v12  ;;  %630 = vst [vmem:[%s4715_s27 + $0x34] sm:$0xf] %v3807_v13  ;;  %v3809_v15 = vld [vmem:[%s4710_s10 + $0xbc] sm:$0xf] }
  0x50   : > { %632 = vst [vmem:[%s4715_s27 + $0x38] sm:$0xf] %v3808_v14  ;;  %v3810_v16 = vld [vmem:[%s4710_s10 + $0xc8] sm:$0xf]  ;;  %v3811_v17 = vld [vmem:[%s4710_s10 + $0xd4] sm:$0xf] }
  0x51   : > { %634 = vst [vmem:[%s4715_s27 + $0x3c] sm:$0xf] %v3809_v15  ;;  %636 = vst [vmem:[%s4715_s27 + $0x40] sm:$0xf] %v3810_v16  ;;  %v3812_v18 = vld [vmem:[%s4710_s10 + $0xe0] sm:$0xf] }
  0x52   : > { %638 = vst [vmem:[%s4715_s27 + $0x44] sm:$0xf] %v3811_v17  ;;  %v3813_v19 = vld [vmem:[%s4710_s10 + $0xec] sm:$0xf]  ;;  %v3814_v20 = vld [vmem:[%s4710_s10 + $0xf8] sm:$0xf] }
  0x53   : > { %640 = vst [vmem:[%s4715_s27 + $0x48] sm:$0xf] %v3812_v18  ;;  %642 = vst [vmem:[%s4715_s27 + $0x4c] sm:$0xf] %v3813_v19  ;;  %v3815_v21 = vld [vmem:[%s4710_s10 + $0x104] sm:$0xf] }
  0x54   : > { %644 = vst [vmem:[%s4715_s27 + $0x50] sm:$0xf] %v3814_v20  ;;  %v3816_v22 = vld [vmem:[%s4710_s10 + $0x110] sm:$0xf]  ;;  %v3817_v23 = vld [vmem:[%s4710_s10 + $0x11c] sm:$0xf] }
  0x55   : > { %646 = vst [vmem:[%s4715_s27 + $0x54] sm:$0xf] %v3815_v21  ;;  %648 = vst [vmem:[%s4715_s27 + $0x58] sm:$0xf] %v3816_v22  ;;  %v3818_v24 = vld [vmem:[%s4710_s10 + $0x128] sm:$0xf] }
  0x56   : > { %650 = vst [vmem:[%s4715_s27 + $0x5c] sm:$0xf] %v3817_v23  ;;  %v3819_v25 = vld [vmem:[%s4710_s10 + $0x134] sm:$0xf]  ;;  %v3820_v26 = vld [vmem:[%s4710_s10 + $0x140] sm:$0xf] }
  0x57   : > { %652 = vst [vmem:[%s4715_s27 + $0x60] sm:$0xf] %v3818_v24  ;;  %654 = vst [vmem:[%s4715_s27 + $0x64] sm:$0xf] %v3819_v25  ;;  %v3821_v27 = vld [vmem:[%s4710_s10 + $0x14c] sm:$0xf] }
  0x58   : > { %656 = vst [vmem:[%s4715_s27 + $0x68] sm:$0xf] %v3820_v26  ;;  %v3822_v28 = vld [vmem:[%s4710_s10 + $0x158] sm:$0xf]  ;;  %v3823_v29 = vld [vmem:[%s4710_s10 + $0x164] sm:$0xf] }
  0x59   : > { %658 = vst [vmem:[%s4715_s27 + $0x6c] sm:$0xf] %v3821_v27  ;;  %660 = vst [vmem:[%s4715_s27 + $0x70] sm:$0xf] %v3822_v28  ;;  %v3824_v30 = vld [vmem:[%s4710_s10 + $0x170] sm:$0xf] }
  0x5a   : > { %662 = vst [vmem:[%s4715_s27 + $0x74] sm:$0xf] %v3823_v29  ;;  %v3825_v31 = vld [vmem:[%s4710_s10 + $0x17c] sm:$0xf]  ;;  %664 = vst [vmem:[%s4715_s27 + $0x78] sm:$0xf] %v3824_v30 }
  0x5b   : > { %666 = vst [vmem:[%s4715_s27 + $0x7c] sm:$0xf] %v3825_v31 }
  0x5c PF: > { %p3826_p6 = scmp.ge.s32.totalorder %s4473_s25, 1  ;;  %p765_p7 = scmp.lt.s32.totalorder %s4473_s25, 3 }
  0x5e   : > { %p766_p8 = pnand %p3826_p6, %p765_p7 }
  0x60   : > { %769 = sbr.rel (%p766_p8) target bundleno = 1576 (0x628), region = 155 }
  0x67   : > { %s772_s11 = sand.u32 1, %s4457_s21   ;;  %v4475_v26 = vmov 0   ;;  %p838_p9 = scmp.lt.s32.totalorder %s4465_s23, 1 }
  0x68   : > { %s4781_s12 = sshll.u32 %s772_s11, 7  ;;  %4185 = vset.pattern.permute.xlu0 %v4475_v26  ;;  %4186 = vset.pattern.permute.xlu1 %v4475_v26 }
  0x69   : > { %s4784_s13 = scalar_lea.vmem [#allocation6], %s4781_s12  ;;  %s4794_s21 = scalar_lea.vmem [#allocation5], %s4781_s12 }
  0x6a   : > { %v4187_v32 = vld [vmem:[%s4784_s13 + $0x40] sm:$0xff]   ;;  %v4189_v34 = vld [vmem:[%s4784_s13 + $0x48] sm:$0xff]   ;;  %v4191_v36 = vld [vmem:[%s4784_s13 + $0x50] sm:$0xff]   ;;  %s5014_s14 = scalar_lea.vmem [#allocation7], %s4781_s12  ;;  %s6001_s23 = smov (!%p838_p9, %s4465_s23), 1 }
  0x6b   : > { %v4188_v33 = vld [vmem:[%s4784_s13] sm:$0xff]   ;;  %3895 = vmatprep.subr.bf16.mxu0 %v4187_v32  ;;  %v4190_v35 = vld [vmem:[%s4784_s13 + $0x8] sm:$0xff]   ;;  %v4192_v37 = vld [vmem:[%s4784_s13 + $0x10] sm:$0xff]   ;;  %s3893_s15 = sshll.u32 %s6001_s23, 8 }
  0x6c   : > { %3896 = vmatpush3.bf16.xpose.msra.mxu0 %v4188_v33  ;;  %v4193_v38 = vld [vmem:[%s4784_s13 + $0x58] sm:$0xff]   ;;  %v4203_v39 = vld [vmem:[%s4794_s21] sm:$0xff]   ;;  %v4197_v43 = vld [vmem:[%s4784_s13 + $0x68] sm:$0xff]   ;;  %s5708_s18 = scalar_lea.vmem %s5799_s5, %s3893_s15  ;;  %s5714_s28 = scalar_lea.vmem %s5800_s6, %s3893_s15 }
  0x6d   : > { %3897 = vmatprep.subr.bf16.mxu0 %v4189_v34  ;;  %3911 = vmatprep.mubr.bf16.mxu0 %v4203_v39  ;;  %v4194_v40 = vld [vmem:[%s4784_s13 + $0x18] sm:$0xff]   ;;  %v4195_v41 = vld [vmem:[%s4784_s13 + $0x60] sm:$0xff]   ;;  %v4198_v44 = vld [vmem:[%s4784_s13 + $0x28] sm:$0xff]  }
  0x6e   : > { %v4196_v42 = vld [vmem:[%s4784_s13 + $0x20] sm:$0xff]   ;;  %v4199_v45 = vld [vmem:[%s4784_s13 + $0x70] sm:$0xff]   ;;  %v4201_v47 = vld [vmem:[%s4784_s13 + $0x78] sm:$0xff]  }
  0x6f   : > { %v4200_v46 = vld [vmem:[%s4784_s13 + $0x30] sm:$0xff]   ;;  %v4202_v48 = vld [vmem:[%s4784_s13 + $0x38] sm:$0xff]   ;;  %v4204_v49 = vld [vmem:[%s4794_s21 + $0x8] sm:$0xff]  }
  0x70   : > { %v4205_v50 = vld [vmem:[%s4794_s21 + $0x10] sm:$0xff]   ;;  %v4206_v51 = vld [vmem:[%s4794_s21 + $0x18] sm:$0xff]   ;;  %v4207_v52 = vld [vmem:[%s4794_s21 + $0x20] sm:$0xff]  }
  0x71   : > { %v4208_v53 = vld [vmem:[%s4794_s21 + $0x28] sm:$0xff]   ;;  %v4209_v54 = vld [vmem:[%s4794_s21 + $0x30] sm:$0xff]   ;;  %v4210_v55 = vld [vmem:[%s4794_s21 + $0x38] sm:$0xff]  }
  0x72   : > { %v4211_v56 = vld [vmem:[%s4794_s21 + $0x40] sm:$0xff]   ;;  %v4212_v57 = vld [vmem:[%s4794_s21 + $0x48] sm:$0xff]   ;;  %v4213_v58 = vld [vmem:[%s4794_s21 + $0x50] sm:$0xff]  }
  0x73   : > { %v4214_v59 = vld [vmem:[%s4794_s21 + $0x58] sm:$0xff]   ;;  %v4215_v60 = vld [vmem:[%s4794_s21 + $0x60] sm:$0xff]   ;;  %v4216_v61 = vld [vmem:[%s4794_s21 + $0x68] sm:$0xff]  }
  0x74   : > { %3898 = vmatpush3.bf16.xpose.msra.mxu0 %v4190_v35  ;;  %v4217_v62 = vld [vmem:[%s4794_s21 + $0x70] sm:$0xff]   ;;  %v4218_v63 = vld [vmem:[%s4794_s21 + $0x78] sm:$0xff]  }
  0x75   : > { %3899 = vmatprep.subr.bf16.mxu0 %v4191_v36 }
  0x7c   : > { %3900 = vmatpush3.bf16.xpose.msra.mxu0 %v4192_v37 }
  0x7d   : > { %3901 = vmatprep.subr.bf16.mxu0 %v4193_v38 }
  0x84   : > { %3902 = vmatpush3.bf16.xpose.msra.mxu0 %v4194_v40 }
  0x85   : > { %3903 = vmatprep.subr.bf16.mxu0 %v4195_v41 }
  0x8c   : > { %3904 = vmatpush3.bf16.xpose.msra.mxu0 %v4196_v42 }
  0x8d   : > { %3905 = vmatprep.subr.bf16.mxu0 %v4197_v43 }
  0x94   : > { %3906 = vmatpush3.bf16.xpose.msra.mxu0 %v4198_v44 }
  0x95   : > { %3907 = vmatprep.subr.bf16.mxu0 %v4199_v45 }
  0x9c   : > { %3908 = vmatpush3.bf16.xpose.msra.mxu0 %v4200_v46 }
  0x9d   : > { %3909 = vmatprep.subr.bf16.mxu0 %v4201_v47 }
  0xa4   : > { %3910 = vmatpush3.bf16.xpose.msra.mxu0 %v4202_v48 }
  0xab   : > { %3912 = vmatmul.mubr.bf16.vlgmr.msra.gmra.mrb[0].mxu0 %v4203_v39 }
  0xac   : > { %3913 = vmatprep.mubr.bf16.mxu0 %v4204_v49 }
  0xb3   : > { %3914 = vmatmul.mubr.bf16.gmra.mrb[4].mxu0 %v4204_v49 }
  0xb4   : > { %3915 = vmatprep.mubr.bf16.mxu0 %v4205_v50 }
  0xbb   : > { %3916 = vmatmul.mubr.bf16.gmra.mrb[8].mxu0 %v4205_v50 }
  0xbc   : > { %3917 = vmatprep.mubr.bf16.mxu0 %v4206_v51 }
  0xc3   : > { %3918 = vmatmul.mubr.bf16.gmra.mrb[12].mxu0 %v4206_v51 }
  0xc4   : > { %3919 = vmatprep.mubr.bf16.mxu0 %v4207_v52 }
  0xcb   : > { %3920 = vmatmul.mubr.bf16.gmra.mrb[16].mxu0 %v4207_v52 }
  0xcc   : > { %3921 = vmatprep.mubr.bf16.mxu0 %v4208_v53 }
  0xd3   : > { %3922 = vmatmul.mubr.bf16.gmra.mrb[20].mxu0 %v4208_v53 }
  0xd4   : > { %3923 = vmatprep.mubr.bf16.mxu0 %v4209_v54 }
  0xdb   : > { %3924 = vmatmul.mubr.bf16.gmra.mrb[24].mxu0 %v4209_v54 }
  0xdc   : > { %3925 = vmatprep.mubr.bf16.mxu0 %v4210_v55 }
  0xe3   : > { %3926 = vmatmul.mubr.bf16.gmra.mrb[28].mxu0 %v4210_v55 }
  0xe4   : > { %3927 = vmatprep.mubr.bf16.mxu0 %v4211_v56 }
  0xeb   : > { %3928 = vmatmul.mubr.bf16.gmra.mrb[32].mxu0 %v4211_v56 }
  0xec   : > { %3929 = vmatprep.mubr.bf16.mxu0 %v4212_v57 }
  0xf3   : > { %3930 = vmatmul.mubr.bf16.gmra.mrb[36].mxu0 %v4212_v57 }
  0xf4   : > { %3931 = vmatprep.mubr.bf16.mxu0 %v4213_v58 }
  0xfb   : > { %3932 = vmatmul.mubr.bf16.gmra.mrb[40].mxu0 %v4213_v58 }
  0xfc   : > { %3933 = vmatprep.mubr.bf16.mxu0 %v4214_v59 }
 0x103   : > { %3934 = vmatmul.mubr.bf16.gmra.mrb[44].mxu0 %v4214_v59 }
 0x104   : > { %3935 = vmatprep.mubr.bf16.mxu0 %v4215_v60 }
 0x10b   : > { %3936 = vmatmul.mubr.bf16.gmra.mrb[48].mxu0 %v4215_v60 }
 0x10c   : > { %3937 = vmatprep.mubr.bf16.mxu0 %v4216_v61 }
 0x113   : > { %3938 = vmatmul.mubr.bf16.gmra.mrb[52].mxu0 %v4216_v61 }
 0x114   : > { %3939 = vmatprep.mubr.bf16.mxu0 %v4217_v62 }
 0x11b   : > { %3940 = vmatmul.mubr.bf16.gmra.mrb[56].mxu0 %v4217_v62 }
 0x11c   : > { %3941 = vmatprep.mubr.bf16.mxu0 %v4218_v63 }
 0x123   : > { %3942 = vmatmul.mubr.bf16.gmra.mrb[60].mxu0 %v4218_v63 }
 0x17e   : > { %v4821_v0 = vpop.f32.mrb[0].mxu0 }
 0x17f   : > { %v4823_v1 = vpop.f32.mrb[1].mxu0 }
 0x180   : > { %v4825_v2 = vpop.f32.mrb[2].mxu0  ;;  %v1467_v3 = vmax.f32 %v4821_v0, %v4823_v1 }
 0x181   : > { %v4829_v4 = vpop.f32.mrb[3].mxu0 }
 0x182   : > { %1468 = vmax.xlane.f32.xlu0 %v1467_v3  ;;  %v1470_v5 = vmax.f32 %v4825_v2, %v4829_v4 }
 0x184   : > { %1471 = vmax.xlane.f32.xlu1 %v1470_v5 }
 0x186   : > { %v4833_v6 = vpop.f32.mrb[4].mxu0 }
 0x187   : > { %5860 = vst [vmem:[#allocation8_spill] sm:$0xff] %v4833_v6  ;;  %v4835_v7 = vpop.f32.mrb[5].mxu0 }
 0x188   : > { %5861 = vst [vmem:[#allocation9_spill] sm:$0xff] %v4835_v7  ;;  %v4837_v8 = vpop.f32.mrb[6].mxu0  ;;  %v1473_v9 = vmax.f32 %v4833_v6, %v4835_v7 }
 0x189   : > { %5862 = vst [vmem:[#allocation10_spill] sm:$0xff] %v4837_v8  ;;  %v4841_v10 = vpop.f32.mrb[7].mxu0 }
 0x18a   : > { %5863 = vst [vmem:[#allocation11_spill] sm:$0xff] %v4841_v10  ;;  %1474 = vmax.xlane.f32.xlu0 %v1473_v9  ;;  %v1476_v11 = vmax.f32 %v4837_v8, %v4841_v10 }
 0x18c   : > { %1477 = vmax.xlane.f32.xlu1 %v1476_v11 }
 0x18e   : > { %v4845_v12 = vpop.f32.mrb[8].mxu0 }
 0x18f   : > { %v4847_v13 = vpop.f32.mrb[9].mxu0 }
 0x190   : > { %v4849_v14 = vpop.f32.mrb[10].mxu0  ;;  %v1479_v15 = vmax.f32 %v4845_v12, %v4847_v13 }
 0x191   : > { %v4853_v16 = vpop.f32.mrb[11].mxu0 }
 0x192   : > { %1480 = vmax.xlane.f32.xlu0 %v1479_v15  ;;  %v1482_v17 = vmax.f32 %v4849_v14, %v4853_v16 }
 0x196   : > { %1483 = vmax.xlane.f32.xlu0 %v1482_v17  ;;  %v4857_v18 = vpop.f32.mrb[12].mxu0 }
 0x197   : > { %v4859_v19 = vpop.f32.mrb[13].mxu0 }
 0x198   : > { %v4861_v20 = vpop.f32.mrb[14].mxu0  ;;  %v1485_v21 = vmax.f32 %v4857_v18, %v4859_v19 }
 0x199   : > { %v4865_v22 = vpop.f32.mrb[15].mxu0 }
 0x19a   : > { %1486 = vmax.xlane.f32.xlu1 %v1485_v21  ;;  %v1488_v23 = vmax.f32 %v4861_v20, %v4865_v22 }
 0x19e   : > { %1489 = vmax.xlane.f32.xlu1 %v1488_v23  ;;  %v4869_v24 = vpop.f32.mrb[16].mxu0 }
 0x19f   : > { %v4871_v25 = vpop.f32.mrb[17].mxu0 }
 0x1a0   : > { %v4873_v27 = vpop.f32.mrb[18].mxu0  ;;  %v1491_v28 = vmax.f32 %v4869_v24, %v4871_v25 }
 0x1a1   : > { %v4877_v29 = vpop.f32.mrb[19].mxu0 }
 0x1a2   : > { %1492 = vmax.xlane.f32.xlu0 %v1491_v28  ;;  %v1494_v30 = vmax.f32 %v4873_v27, %v4877_v29 }
 0x1a4   : > { %1495 = vmax.xlane.f32.xlu1 %v1494_v30 }
 0x1a6   : > { %v4881_v31 = vpop.f32.mrb[20].mxu0 }
 0x1a7   : > { %v4883_v32 = vpop.f32.mrb[21].mxu0 }
 0x1a8   : > { %v4885_v33 = vpop.f32.mrb[22].mxu0  ;;  %v1497_v34 = vmax.f32 %v4881_v31, %v4883_v32 }
 0x1a9   : > { %v4889_v35 = vpop.f32.mrb[23].mxu0 }
 0x1aa   : > { %1498 = vmax.xlane.f32.xlu0 %v1497_v34  ;;  %v1500_v36 = vmax.f32 %v4885_v33, %v4889_v35 }
 0x1ac   : > { %1501 = vmax.xlane.f32.xlu1 %v1500_v36 }
 0x1ae   : > { %v4893_v37 = vpop.f32.mrb[24].mxu0 }
 0x1af   : > { %v4895_v38 = vpop.f32.mrb[25].mxu0 }
 0x1b0   : > { %v4897_v39 = vpop.f32.mrb[26].mxu0  ;;  %v1503_v40 = vmax.f32 %v4893_v37, %v4895_v38 }
 0x1b1   : > { %v4901_v41 = vpop.f32.mrb[27].mxu0 }
 0x1b2   : > { %1504 = vmax.xlane.f32.xlu0 %v1503_v40  ;;  %v1506_v42 = vmax.f32 %v4897_v39, %v4901_v41 }
 0x1b4   : > { %1507 = vmax.xlane.f32.xlu1 %v1506_v42 }
 0x1b6   : > { %v4905_v43 = vpop.f32.mrb[28].mxu0 }
 0x1b7   : > { %5864 = vst [vmem:[#allocation12_spill] sm:$0xff] %v4905_v43  ;;  %v4907_v44 = vpop.f32.mrb[29].mxu0 }
 0x1b8   : > { %5865 = vst [vmem:[#allocation13_spill] sm:$0xff] %v4907_v44  ;;  %v4909_v45 = vpop.f32.mrb[30].mxu0  ;;  %v1509_v46 = vmax.f32 %v4905_v43, %v4907_v44 }
 0x1b9   : > { %5866 = vst [vmem:[#allocation14_spill] sm:$0xff] %v4909_v45  ;;  %v4913_v47 = vpop.f32.mrb[31].mxu0 }
 0x1ba   : > { %5867 = vst [vmem:[#allocation15_spill] sm:$0xff] %v4913_v47  ;;  %1510 = vmax.xlane.f32.xlu0 %v1509_v46  ;;  %v1512_v48 = vmax.f32 %v4909_v45, %v4913_v47 }
 0x1bc   : > { %1513 = vmax.xlane.f32.xlu1 %v1512_v48 }
 0x1be   : > { %v4917_v49 = vpop.f32.mrb[32].mxu0 }
 0x1bf   : > { %5868 = vst [vmem:[#allocation16_spill] sm:$0xff] %v4917_v49  ;;  %v4919_v50 = vpop.f32.mrb[33].mxu0 }
 0x1c0   : > { %5869 = vst [vmem:[#allocation17_spill] sm:$0xff] %v4919_v50  ;;  %v4921_v51 = vpop.f32.mrb[34].mxu0  ;;  %v1515_v52 = vmax.f32 %v4917_v49, %v4919_v50 }
 0x1c1   : > { %5870 = vst [vmem:[#allocation18_spill] sm:$0xff] %v4921_v51  ;;  %v4925_v53 = vpop.f32.mrb[35].mxu0 }
 0x1c2   : > { %5871 = vst [vmem:[#allocation19_spill] sm:$0xff] %v4925_v53  ;;  %1516 = vmax.xlane.f32.xlu0 %v1515_v52  ;;  %v1518_v54 = vmax.f32 %v4921_v51, %v4925_v53 }
 0x1c4   : > { %1519 = vmax.xlane.f32.xlu1 %v1518_v54 }
 0x1c6   : > { %v4929_v55 = vpop.f32.mrb[36].mxu0 }
 0x1c7   : > { %5872 = vst [vmem:[#allocation20_spill] sm:$0xff] %v4929_v55  ;;  %v4931_v56 = vpop.f32.mrb[37].mxu0 }
 0x1c8   : > { %5873 = vst [vmem:[#allocation21_spill] sm:$0xff] %v4931_v56  ;;  %v4933_v57 = vpop.f32.mrb[38].mxu0  ;;  %v1521_v58 = vmax.f32 %v4929_v55, %v4931_v56 }
 0x1c9   : > { %5874 = vst [vmem:[#allocation22_spill] sm:$0xff] %v4933_v57  ;;  %v4937_v59 = vpop.f32.mrb[39].mxu0 }
 0x1ca   : > { %5875 = vst [vmem:[#allocation23_spill] sm:$0xff] %v4937_v59  ;;  %1522 = vmax.xlane.f32.xlu0 %v1521_v58  ;;  %v1524_v60 = vmax.f32 %v4933_v57, %v4937_v59 }
 0x1cc   : > { %1525 = vmax.xlane.f32.xlu1 %v1524_v60 }
 0x1ce   : > { %v4941_v61 = vpop.f32.mrb[40].mxu0 }
 0x1cf   : > { %5876 = vst [vmem:[#allocation24_spill] sm:$0xff] %v4941_v61  ;;  %v4943_v62 = vpop.f32.mrb[41].mxu0 }
 0x1d0   : > { %5877 = vst [vmem:[#allocation25_spill] sm:$0xff] %v4943_v62  ;;  %v4945_v63 = vpop.f32.mrb[42].mxu0  ;;  %v1527_v3 = vmax.f32 %v4941_v61, %v4943_v62 }
 0x1d1   : > { %5878 = vst [vmem:[#allocation26_spill] sm:$0xff] %v4945_v63  ;;  %v4949_v5 = vpop.f32.mrb[43].mxu0 }
 0x1d2   : > { %5879 = vst [vmem:[#allocation27_spill] sm:$0xff] %v4949_v5  ;;  %1528 = vmax.xlane.f32.xlu0 %v1527_v3  ;;  %v1530_v9 = vmax.f32 %v4945_v63, %v4949_v5 }
 0x1d4   : > { %1531 = vmax.xlane.f32.xlu1 %v1530_v9 }
 0x1d6   : > { %v4953_v11 = vpop.f32.mrb[44].mxu0 }
 0x1d7   : > { %5880 = vst [vmem:[#allocation28_spill] sm:$0xff] %v4953_v11  ;;  %v4955_v15 = vpop.f32.mrb[45].mxu0 }
 0x1d8   : > { %5881 = vst [vmem:[#allocation29_spill] sm:$0xff] %v4955_v15  ;;  %v4957_v17 = vpop.f32.mrb[46].mxu0  ;;  %v1533_v21 = vmax.f32 %v4953_v11, %v4955_v15  ;;  %v4230_v15 = vld [vmem:[%s5014_s14 + $0x28] sm:$0xff]   ;;  %v4232_v11 = vld [vmem:[%s5014_s14 + $0x30] sm:$0xff]  }
 0x1d9   : > { %5882 = vst [vmem:[#allocation30_spill] sm:$0xff] %v4957_v17  ;;  %v4961_v23 = vpop.f32.mrb[47].mxu0 }
 0x1da   : > { %5883 = vst [vmem:[#allocation31_spill] sm:$0xff] %v4961_v23  ;;  %1534 = vmax.xlane.f32.xlu0 %v1533_v21  ;;  %v1536_v26 = vmax.f32 %v4957_v17, %v4961_v23  ;;  %v4233_v23 = vld [vmem:[%s5014_s14 + $0x78] sm:$0xff]  }
 0x1dc   : > { %1537 = vmax.xlane.f32.xlu1 %v1536_v26 }
 0x1de   : > { %v4965_v28 = vpop.f32.mrb[48].mxu0 }
 0x1df   : > { %5884 = vst [vmem:[#allocation32_spill] sm:$0xff] %v4965_v28  ;;  %v4967_v30 = vpop.f32.mrb[49].mxu0 }
 0x1e0   : > { %5885 = vst [vmem:[#allocation33_spill] sm:$0xff] %v4967_v30  ;;  %v4969_v34 = vpop.f32.mrb[50].mxu0  ;;  %v1539_v36 = vmax.f32 %v4965_v28, %v4967_v30  ;;  %v4227_v28 = vld [vmem:[%s5014_s14 + $0x60] sm:$0xff]  }
 0x1e1   : > { %5886 = vst [vmem:[#allocation34_spill] sm:$0xff] %v4969_v34  ;;  %v4973_v40 = vpop.f32.mrb[51].mxu0 }
 0x1e2   : > { %5887 = vst [vmem:[#allocation35_spill] sm:$0xff] %v4973_v40  ;;  %1540 = vmax.xlane.f32.xlu1 %v1539_v36  ;;  %v1542_v42 = vmax.f32 %v4969_v34, %v4973_v40  ;;  %v4228_v34 = vld [vmem:[%s5014_s14 + $0x20] sm:$0xff]  }
 0x1e4   : > { %1543 = vmax.xlane.f32.xlu0 %v1542_v42 }
 0x1e6   : > { %v4977_v46 = vpop.f32.mrb[52].mxu0 }
 0x1e7   : > { %5888 = vst [vmem:[#allocation36_spill] sm:$0xff] %v4977_v46  ;;  %v4979_v48 = vpop.f32.mrb[53].mxu0 }
 0x1e8   : > { %5889 = vst [vmem:[#allocation37_spill] sm:$0xff] %v4979_v48  ;;  %v4981_v52 = vpop.f32.mrb[54].mxu0  ;;  %v1545_v54 = vmax.f32 %v4977_v46, %v4979_v48  ;;  %v4222_v46 = vld [vmem:[%s5014_s14 + $0x8] sm:$0xff]  }
 0x1e9   : > { %5890 = vst [vmem:[#allocation38_spill] sm:$0xff] %v4981_v52  ;;  %v4985_v58 = vpop.f32.mrb[55].mxu0 }
 0x1ea   : > { %5891 = vst [vmem:[#allocation39_spill] sm:$0xff] %v4985_v58  ;;  %1546 = vmax.xlane.f32.xlu1 %v1545_v54  ;;  %v1548_v60 = vmax.f32 %v4981_v52, %v4985_v58  ;;  %v4224_v52 = vld [vmem:[%s5014_s14 + $0x10] sm:$0xff]  }
 0x1ec   : > { %1549 = vmax.xlane.f32.xlu0 %v1548_v60 }
 0x1ee   : > { %v4989_v3 = vpop.f32.mrb[56].mxu0 }
 0x1ef   : > { %5892 = vst [vmem:[#allocation40_spill] sm:$0xff] %v4989_v3  ;;  %v4991_v9 = vpop.f32.mrb[57].mxu0 }
 0x1f0   : > { %5893 = vst [vmem:[#allocation41_spill] sm:$0xff] %v4991_v9  ;;  %v4993_v21 = vpop.f32.mrb[58].mxu0  ;;  %v1551_v26 = vmax.f32 %v4989_v3, %v4991_v9  ;;  %v4221_v3 = vld [vmem:[%s5014_s14 + $0x48] sm:$0xff]   ;;  %v4223_v9 = vld [vmem:[%s5014_s14 + $0x50] sm:$0xff]  }
 0x1f1   : > { %5894 = vst [vmem:[#allocation42_spill] sm:$0xff] %v4993_v21  ;;  %v4997_v36 = vpop.f32.mrb[59].mxu0 }
 0x1f2   : > { %5895 = vst [vmem:[#allocation43_spill] sm:$0xff] %v4997_v36  ;;  %v1554_v42 = vmax.f32 %v4993_v21, %v4997_v36  ;;  %1552 = vmax.xlane.f32.xlu0 %v1551_v26  ;;  %v4219_v26 = vld [vmem:[%s5014_s14 + $0x40] sm:$0xff]  }
 0x1f3   : > { %4127 = vmatprep.subr.bf16.mxu1 %v4219_v26  ;;  %3943 = vmatprep.subr.bf16.mxu0 %v4219_v26 }
 0x1f4   : > { %1555 = vmax.xlane.f32.xlu1 %v1554_v42  ;;  %v4220_v42 = vld [vmem:[%s5014_s14] sm:$0xff]  }
 0x1f5   : > { %4135 = vmatpush3.bf16.msra.mxu1 %v4220_v42  ;;  %3944 = vmatpush3.bf16.msra.mxu0 %v4220_v42  ;;  %v4225_v42 = vld [vmem:[%s5014_s14 + $0x58] sm:$0xff]  }
 0x1f6   : > { %v5001_v54 = vpop.f32.mrb[60].mxu0  ;;  %4128 = vmatprep.subr.bf16.mxu1 %v4221_v3  ;;  %3945 = vmatprep.subr.bf16.mxu0 %v4221_v3 }
 0x1f7   : > { %5896 = vst [vmem:[#allocation44_spill] sm:$0xff] %v5001_v54  ;;  %v5003_v48 = vpop.f32.mrb[61].mxu0 }
 0x1f8   : > { %5897 = vst [vmem:[#allocation45_spill] sm:$0xff] %v5003_v48  ;;  %v5005_v60 = vpop.f32.mrb[62].mxu0 }
 0x1f9   : > { %5898 = vst [vmem:[#allocation46_spill] sm:$0xff] %v5005_v60  ;;  %v5009_v58 = vpop.f32.mrb[63].mxu0  ;;  %4136 = vmatpush3.bf16.msra.mxu1 %v4222_v46  ;;  %3946 = vmatpush3.bf16.msra.mxu0 %v4222_v46 }
 0x1fa   : > { %5899 = vst [vmem:[#allocation47_spill] sm:$0xff] %v5009_v58  ;;  %4129 = vmatprep.subr.bf16.mxu1 %v4223_v9  ;;  %3947 = vmatprep.subr.bf16.mxu0 %v4223_v9  ;;  %v4226_v9 = vld [vmem:[%s5014_s14 + $0x18] sm:$0xff]  }
 0x1fd   : > { %4137 = vmatpush3.bf16.msra.mxu1 %v4224_v52  ;;  %3948 = vmatpush3.bf16.msra.mxu0 %v4224_v52  ;;  %v4229_v52 = vld [vmem:[%s5014_s14 + $0x68] sm:$0xff]  }
 0x1fe   : > { %4130 = vmatprep.subr.bf16.mxu1 %v4225_v42  ;;  %3949 = vmatprep.subr.bf16.mxu0 %v4225_v42 }
 0x201   : > { %4138 = vmatpush3.bf16.msra.mxu1 %v4226_v9  ;;  %3950 = vmatpush3.bf16.msra.mxu0 %v4226_v9  ;;  %v4231_v9 = vld [vmem:[%s5014_s14 + $0x70] sm:$0xff]  }
 0x202   : > { %4131 = vmatprep.subr.bf16.mxu1 %v4227_v28  ;;  %3951 = vmatprep.subr.bf16.mxu0 %v4227_v28 }
 0x205   : > { %4139 = vmatpush3.bf16.msra.mxu1 %v4228_v34  ;;  %3952 = vmatpush3.bf16.msra.mxu0 %v4228_v34  ;;  %v4234_v34 = vld [vmem:[%s5014_s14 + $0x38] sm:$0xff]  }
 0x206   : > { %4132 = vmatprep.subr.bf16.mxu1 %v4229_v52  ;;  %3953 = vmatprep.subr.bf16.mxu0 %v4229_v52  ;;  %v5901_v52 = vmax.f32 %v5001_v54, %v5003_v48 }
 0x209   : > { %4140 = vmatpush3.bf16.msra.mxu1 %v4230_v15  ;;  %3954 = vmatpush3.bf16.msra.mxu0 %v4230_v15 }
 0x20a   : > { %4133 = vmatprep.subr.bf16.mxu1 %v4231_v9  ;;  %3955 = vmatprep.subr.bf16.mxu0 %v4231_v9 }
 0x20d   : > { %4141 = vmatpush3.bf16.msra.mxu1 %v4232_v11  ;;  %3956 = vmatpush3.bf16.msra.mxu0 %v4232_v11  ;;  %v5900_v11 = vmax.f32 %v5005_v60, %v5009_v58 }
 0x20e   : > { %4134 = vmatprep.subr.bf16.mxu1 %v4233_v23  ;;  %3957 = vmatprep.subr.bf16.mxu0 %v4233_v23 }
 0x20f   : > { %v5020_v36 = vpop.xlane.xlu0 %1468 }
 0x211   : > { %v5026_v30 = vpop.xlane.xlu1 %1471  ;;  %4142 = vmatpush3.bf16.msra.mxu1 %v4234_v34  ;;  %3958 = vmatpush3.bf16.msra.mxu0 %v4234_v34 }
 0x217   : > { %v5023_v21 = vpop.xlane.xlu0 %1474 }
 0x219   : > { %v5032_v46 = vpop.xlane.xlu1 %1477 }
 0x21f   : > { %v5028_v26 = vpop.xlane.xlu0 %1480 }
 0x220   : > { %1713 = vperm.xlu0 %4185, %v5028_v26  }
 0x223   : > { %v5034_v3 = vpop.xlane.xlu0 %1483 }
 0x224   : > { %1718 = vperm.xlu1 %4186, %v5034_v3  }
 0x227   : > { %v5039_v40 = vpop.xlane.xlu1 %1486 }
 0x228   : > { %1723 = vperm.xlu1 %4186, %v5039_v40  }
 0x22b   : > { %v5044_v42 = vpop.xlane.xlu1 %1489 }
 0x22c   : > { %1728 = vperm.xlu1 %4186, %v5044_v42  }
 0x22f   : > { %v5051_v28 = vpop.xlane.xlu0 %1492 }
 0x231   : > { %v5054_v17 = vpop.xlane.xlu1 %1495 }
 0x237   : > { %v5056_v62 = vpop.xlane.xlu0 %1498 }
 0x238   : > { %1743 = vperm.xlu1 %4186, %v5056_v62  }
 0x239   : > { %v5059_v15 = vpop.xlane.xlu1 %1501 }
 0x23c   : > { %1748 = vperm.xlu1 %4186, %v5059_v15  }
 0x23f   : > { %1561 = vmax.xlane.f32.xlu0 %v5900_v11  ;;  %v5073_v9 = vpop.xlane.xlu0 %1504 }
 0x241   : > { %v5068_v23 = vpop.xlane.xlu1 %1507 }
 0x247   : > { %v5078_v58 = vpop.xlane.xlu0 %1510 }
 0x249   : > { %v5076_v34 = vpop.xlane.xlu1 %1513 }
 0x24f   : > { %v5083_v60 = vpop.xlane.xlu0 %1516 }
 0x251   : > { %v5081_v11 = vpop.xlane.xlu1 %1519 }
 0x255   : > { %1733 = vperm.xlu0 %4185, %v5051_v28  }
 0x259   : > { %1738 = vperm.xlu0 %4185, %v5054_v17   ;;  %v5086_v61 = vpop.xlane.xlu1 %1525 }
 0x25d   : > { %1693 = vperm.xlu0 %4185, %v5020_v36  }
 0x260   : > { %1558 = vmax.xlane.f32.xlu1 %v5901_v52  ;;  %v5089_v52 = vpop.xlane.xlu0 %1522 }
 0x261   : > { %1698 = vperm.xlu0 %4185, %v5026_v30   ;;  %v5093_v48 = vpop.xlane.xlu1 %1531 }
 0x264   : > { %v5095_v54 = vpop.xlane.xlu0 %1528 }
 0x265   : > { %1753 = vperm.xlu0 %4185, %v5073_v9  }
 0x268   : > { %v5103_v63 = vpop.xlane.xlu0 %1534 }
 0x269   : > { %1758 = vperm.xlu0 %4185, %v5068_v23   ;;  %v5099_v5 = vpop.xlane.xlu1 %1537 }
 0x26d   : > { %1703 = vperm.xlu0 %4185, %v5023_v21  }
 0x26f   : > { %v5107_v56 = vpop.xlane.xlu1 %1540 }
 0x271   : > { %1763 = vperm.xlu1 %4186, %v5078_v58   ;;  %1768 = vperm.xlu0 %4185, %v5076_v34   ;;  %v5109_v55 = vpop.xlane.xlu0 %1543 }
 0x272   : > { %5902 = vst [vmem:[#allocation48_spill] sm:$0xff] %v5109_v55 }
 0x275   : > { %1778 = vperm.xlu1 %4186, %v5081_v11   ;;  %1708 = vperm.xlu0 %4185, %v5032_v46  }
 0x277   : > { %v5113_v59 = vpop.xlane.xlu1 %1546 }
 0x278   : > { %5903 = vst [vmem:[#allocation49_spill] sm:$0xff] %v5113_v59 }
 0x279   : > { %1788 = vperm.xlu1 %4186, %v5086_v61   ;;  %1773 = vperm.xlu0 %4185, %v5083_v60   ;;  %v5117_v57 = vpop.xlane.xlu0 %1549 }
 0x27a   : > { %5904 = vst [vmem:[#allocation50_spill] sm:$0xff] %v5117_v57 }
 0x27d   : > { %1798 = vperm.xlu1 %4186, %v5093_v48   ;;  %1783 = vperm.xlu0 %4185, %v5089_v52  }
 0x27f   : > { %v5125_v53 = vpop.xlane.xlu0 %1552 }
 0x280   : > { %5906 = vst [vmem:[#allocation52_spill] sm:$0xff] %v5125_v53 }
 0x281   : > { %1808 = vperm.xlu1 %4186, %v5099_v5   ;;  %1793 = vperm.xlu0 %4185, %v5095_v54   ;;  %v5121_v50 = vpop.xlane.xlu1 %1555 }
 0x282   : > { %5905 = vst [vmem:[#allocation51_spill] sm:$0xff] %v5121_v50 }
 0x285   : > { %1818 = vperm.xlu1 %4186, %v5109_v55   ;;  %1803 = vperm.xlu0 %4185, %v5103_v63  }
 0x289   : > { %1828 = vperm.xlu1 %4186, %v5117_v57   ;;  %1813 = vperm.xlu0 %4185, %v5107_v56  }
 0x28d   : > { %1838 = vperm.xlu1 %4186, %v5121_v50   ;;  %1823 = vperm.xlu0 %4185, %v5113_v59  }
 0x291   : > { %1833 = vperm.xlu0 %4185, %v5125_v53  }
 0x29f   : > { %v1714_v49 = vpop.permute.xlu0 %1713 }
 0x2a0   : > { %v1859_v10 = vsub.f32 %v4845_v12, %v1714_v49  ;;  %v1860_v8 = vsub.f32 %v4847_v13, %v1714_v49 }
 0x2a3   : > { %v1719_v51 = vpop.permute.xlu1 %1718 }
 0x2a4   : > { %v1861_v7 = vsub.f32 %v4849_v14, %v1719_v51  ;;  %v1862_v6 = vsub.f32 %v4853_v16, %v1719_v51 }
 0x2a6   : > { %v1919_v44 = vpack.c.bf16 %v1861_v7, %v1859_v10  ;;  %v1920_v43 = vpack.c.bf16 %v1862_v6, %v1860_v8 }
 0x2a7   : > { %v1724_v47 = vpop.permute.xlu1 %1723 }
 0x2a8   : > { %v1960_v50 = vmul.bf16 1069105081, %v1919_v44  ;;  %v1963_v45 = vmul.bf16 1069105081, %v1920_v43  ;;  %v1863_v53 = vsub.f32 %v4857_v18, %v1724_v47  ;;  %v1864_v57 = vsub.f32 %v4859_v19, %v1724_v47 }
 0x2aa   : > { %4243 = vpow.bf16 %v1960_v50 }
 0x2ab   : > { %4245 = vpow.bf16 %v1963_v45  ;;  %v1729_v59 = vpop.permute.xlu1 %1728 }
 0x2ac   : > { %v1865_v12 = vsub.f32 %v4861_v20, %v1729_v59  ;;  %v1866_v13 = vsub.f32 %v4865_v22, %v1729_v59 }
 0x2ae   : > { %v1921_v49 = vpack.c.bf16 %v1865_v12, %v1863_v53  ;;  %v1922_v14 = vpack.c.bf16 %v1866_v13, %v1864_v57 }
 0x2b0   : > { %v1966_v55 = vmul.bf16 1069105081, %v1921_v49  ;;  %v1969_v16 = vmul.bf16 1069105081, %v1922_v14 }
 0x2b2   : > { %4247 = vpow.bf16 %v1966_v55  ;;  %v1595_v55 = vsub.f32 -inf, %v5020_v36  ;;  %v1598_v36 = vsub.f32 -inf, %v5032_v46 }
 0x2b3   : > { %4249 = vpow.bf16 %v1969_v16 }
 0x2b5   : > { %v4244_v6 = vpop.eup %4243 }
 0x2b6   : > { %v4246_v7 = vpop.eup %4245  ;;  %v2051_v8 = vunpack.c.l.bf16 %v4244_v6  ;;  %v2053_v10 = vunpack.c.h.bf16 %v4244_v6 }
 0x2b7   : > { %2699 = vmatprep.mubr.bf16.mxu1 %v4246_v7  ;;  %v1744_v43 = vpop.permute.xlu1 %1743  ;;  %v2052_v44 = vunpack.c.l.bf16 %v4246_v7  ;;  %v2054_v18 = vunpack.c.h.bf16 %v4246_v7 }
 0x2b8   : > { %2700 = vmatmul.mubr.bf16.vlgmr.msra.gmra.mrb[0].mxu1 %v4244_v6  ;;  %v1871_v45 = vsub.f32 %v4881_v31, %v1744_v43  ;;  %v1872_v47 = vsub.f32 %v4883_v32, %v1744_v43  ;;  %v1600_v43 = vsub.f32 -inf, %v5034_v3 }
 0x2b9   : > { %v5136_v19 = vadd.f32 %v2052_v44, %v2051_v8  ;;  %v5138_v20 = vadd.f32 %v2054_v18, %v2053_v10  ;;  %v1633_v10 = vmul.f32 1.442695, %v1598_v36  ;;  %v1596_v44 = vsub.f32 -inf, %v5026_v30 }
 0x2ba   : > { %v1599_v18 = vsub.f32 -inf, %v5028_v26  ;;  %v1603_v26 = vsub.f32 -inf, %v5051_v28  ;;  %v1605_v28 = vsub.f32 -inf, %v5056_v62  ;;  %v1609_v62 = vsub.f32 -inf, %v5078_v58 }
 0x2bb   : > { %v1749_v22 = vpop.permute.xlu1 %1748 }
 0x2bc   : > { %v1873_v50 = vsub.f32 %v4885_v33, %v1749_v22  ;;  %v1874_v51 = vsub.f32 %v4889_v35, %v1749_v22  ;;  %v1627_v33 = vmul.f32 1.442695, %v1595_v55  ;;  %v1597_v35 = vsub.f32 -inf, %v5023_v21 }
 0x2bd   : > { %v4248_v53 = vpop.eup %4247  ;;  %v1601_v21 = vsub.f32 -inf, %v5039_v40  ;;  %v1635_v40 = vmul.f32 1.442695, %v1599_v18  ;;  %v1647_v36 = vmul.f32 1.442695, %v1605_v28 }
 0x2be   : > { %v4250_v57 = vpop.eup %4249  ;;  %v1925_v59 = vpack.c.bf16 %v1873_v50, %v1871_v45  ;;  %v1926_v12 = vpack.c.bf16 %v1874_v51, %v1872_v47  ;;  %v2055_v13 = vunpack.c.l.bf16 %v4248_v53  ;;  %v2057_v49 = vunpack.c.h.bf16 %v4248_v53 }
 0x2bf   : > { %2707 = vmatprep.mubr.bf16.mxu1 %v4250_v57  ;;  %v2056_v14 = vunpack.c.l.bf16 %v4250_v57  ;;  %v2058_v16 = vunpack.c.h.bf16 %v4250_v57  ;;  %v1631_v8 = vmul.f32 1.442695, %v1597_v35  ;;  %v1637_v47 = vmul.f32 1.442695, %v1600_v43 }
 0x2c0   : > { %v1978_v6 = vmul.bf16 1069105081, %v1925_v59  ;;  %v1981_v7 = vmul.bf16 1069105081, %v1926_v12  ;;  %2708 = vmatmul.mubr.bf16.gmra.mrb[4].mxu1 %v4248_v53  ;;  %v1602_v50 = vsub.f32 -inf, %v5044_v42  ;;  %v1604_v59 = vsub.f32 -inf, %v5054_v17 }
 0x2c1   : > { %v5145_v31 = vadd.f32 %v2056_v14, %v2055_v13  ;;  %v5147_v32 = vadd.f32 %v2058_v16, %v2057_v49  ;;  %v1629_v51 = vmul.f32 1.442695, %v1596_v44  ;;  %v1639_v12 = vmul.f32 1.442695, %v1601_v21 }
 0x2c2   : > { %4251 = vpow.bf16 %v1978_v6  ;;  %v1641_v49 = vmul.f32 1.442695, %v1602_v50  ;;  %v1643_v14 = vmul.f32 1.442695, %v1603_v26  ;;  %v1606_v16 = vsub.f32 -inf, %v5059_v15 }
 0x2c3   : > { %4253 = vpow.bf16 %v1981_v7  ;;  %v1645_v7 = vmul.f32 1.442695, %v1604_v59  ;;  %v1607_v17 = vsub.f32 -inf, %v5073_v9  ;;  %v1655_v58 = vmul.f32 1.442695, %v1609_v62 }
 0x2c4   : > { %4255 = vpow2.f32 %v1627_v33  ;;  %v1608_v33 = vsub.f32 -inf, %v5068_v23  ;;  %v1649_v15 = vmul.f32 1.442695, %v1606_v16  ;;  %v1611_v50 = vsub.f32 -inf, %v5083_v60 }
 0x2c5   : > { %4257 = vpow2.f32 %v1631_v8 }
 0x2c6   : > { %4259 = vpow2.f32 %v1633_v10  ;;  %v1651_v10 = vmul.f32 1.442695, %v1607_v17  ;;  %v1653_v43 = vmul.f32 1.442695, %v1608_v33  ;;  %v1659_v59 = vmul.f32 1.442695, %v1611_v50 }
 0x2c7   : > { %4261 = vpow2.f32 %v1637_v47  ;;  %v1610_v47 = vsub.f32 -inf, %v5076_v34 }
 0x2c8   : > { %4263 = vpow2.f32 %v1629_v51 }
 0x2c9   : > { %4265 = vpow2.f32 %v1635_v40  ;;  %v1657_v60 = vmul.f32 1.442695, %v1610_v47 }
 0x2ca   : > { %4267 = vpow2.f32 %v1639_v12 }
 0x2cb   : > { %4269 = vpow2.f32 %v1641_v49 }
 0x2cc   : > { %v5154_v22 = vpop.xlane.xlu0 %1561  ;;  %4271 = vpow2.f32 %v1643_v14 }
 0x2cd   : > { %v5156_v45 = vpop.eup %4251  ;;  %1848 = vperm.xlu1 %4186, %v5154_v22   ;;  %4273 = vpow2.f32 %v1645_v7 }
 0x2ce   : > { %v5160_v46 = vpop.eup %4253  ;;  %v2063_v3 = vunpack.c.l.bf16 %v5156_v45  ;;  %v2065_v30 = vunpack.c.h.bf16 %v5156_v45  ;;  %4275 = vpow2.f32 %v1647_v36 }
 0x2cf   : > { %v2064_v53 = vunpack.c.l.bf16 %v5160_v46  ;;  %v2066_v55 = vunpack.c.h.bf16 %v5160_v46  ;;  %v5168_v57 = vpop.eup %4255  ;;  %4277 = vpow2.f32 %v1649_v15 }
 0x2d0   : > { %v5178_v6 = vpop.eup %4257  ;;  %4279 = vpow2.f32 %v1651_v10 }
 0x2d1   : > { %2365 = vperm.xlu1 %4186, %v5168_v57   ;;  %v5172_v42 = vadd.f32 %v2064_v53, %v2063_v3  ;;  %v5174_v13 = vadd.f32 %v2066_v55, %v2065_v30  ;;  %v5184_v8 = vpop.eup %4259  ;;  %4281 = vpow2.f32 %v1653_v43  ;;  %v1614_v55 = vsub.f32 -inf, %v5086_v61 }
 0x2d2   : > { %v5193_v51 = vpop.eup %4261  ;;  %4283 = vpow2.f32 %v1655_v58 }
 0x2d3   : > { %v1665_v33 = vmul.f32 1.442695, %v1614_v55 }
 0x2d4   : > { %v1734_v35 = vpop.permute.xlu0 %1733 }
 0x2d5   : > { %2375 = vperm.xlu1 %4186, %v5178_v6   ;;  %v1867_v9 = vsub.f32 %v4869_v24, %v1734_v35  ;;  %v1868_v23 = vsub.f32 %v4871_v25, %v1734_v35  ;;  %v1612_v24 = vsub.f32 -inf, %v5081_v11  ;;  %v1613_v25 = vsub.f32 -inf, %v5089_v52 }
 0x2d6   : > { %v1615_v35 = vsub.f32 -inf, %v5095_v54 }
 0x2d7   : > { %v1661_v52 = vmul.f32 1.442695, %v1612_v24  ;;  %v1663_v12 = vmul.f32 1.442695, %v1613_v25  ;;  %v1619_v24 = vsub.f32 -inf, %v5107_v56 }
 0x2d8   : > { %v1739_v44 = vpop.permute.xlu0 %1738  ;;  %v1667_v54 = vmul.f32 1.442695, %v1615_v35 }
 0x2d9   : > { %v1869_v18 = vsub.f32 %v4873_v27, %v1739_v44  ;;  %v1870_v21 = vsub.f32 %v4877_v29, %v1739_v44  ;;  %2380 = vperm.xlu1 %4186, %v5184_v8   ;;  %v5197_v29 = vpop.eup %4263 }
 0x2da   : > { %v5200_v34 = vpop.eup %4265 }
 0x2db   : > { %v1923_v3 = vpack.c.bf16 %v1869_v18, %v1867_v9  ;;  %v1924_v30 = vpack.c.bf16 %v1870_v21, %v1868_v23  ;;  %v5203_v40 = vpop.eup %4267 }
 0x2dc   : > { %v1694_v27 = vpop.permute.xlu0 %1693  ;;  %v5205_v11 = vpop.eup %4269 }
 0x2dd   : > { %v1972_v26 = vmul.bf16 1069105081, %v1923_v3  ;;  %v1975_v53 = vmul.bf16 1069105081, %v1924_v30  ;;  %2390 = vperm.xlu1 %4186, %v5193_v51   ;;  %v5207_v28 = vpop.eup %4271  ;;  %v1851_v14 = vsub.f32 %v4821_v0, %v1694_v27  ;;  %v1852_v16 = vsub.f32 %v4823_v1, %v1694_v27 }
 0x2de   : > { %v5214_v17 = vpop.eup %4273  ;;  %v1616_v0 = vsub.f32 -inf, %v5093_v48  ;;  %v1617_v1 = vsub.f32 -inf, %v5103_v63  ;;  %v1618_v63 = vsub.f32 -inf, %v5099_v5 }
 0x2df   : > { %4285 = vpow.bf16 %v1972_v26  ;;  %v5217_v15 = vpop.eup %4275 }
 0x2e0   : > { %4287 = vpow.bf16 %v1975_v53  ;;  %v1699_v49 = vpop.permute.xlu0 %1698  ;;  %v1669_v48 = vmul.f32 1.442695, %v1616_v0  ;;  %v1671_v18 = vmul.f32 1.442695, %v1617_v1 }
 0x2e1   : > { %v1853_v7 = vsub.f32 %v4825_v2, %v1699_v49  ;;  %v1854_v61 = vsub.f32 %v4829_v4, %v1699_v49  ;;  %2400 = vperm.xlu1 %4186, %v5205_v11   ;;  %4289 = vpow2.f32 %v1657_v60  ;;  %v5221_v4 = vpop.eup %4277 }
 0x2e2   : > { %4291 = vpow2.f32 %v1659_v59  ;;  %5907 = vst [vmem:[#allocation53_spill] sm:$0xff] %v5221_v4  ;;  %v5224_v44 = vpop.eup %4279  ;;  %v5911_v59 = vld [vmem:[#allocation48_spill] sm:$0xff] }
 0x2e3   : > { %v1915_v36 = vpack.c.bf16 %v1853_v7, %v1851_v14  ;;  %v1916_v62 = vpack.c.bf16 %v1854_v61, %v1852_v16  ;;  %4293 = vpow2.f32 %v1661_v52  ;;  %v5226_v9 = vpop.eup %4281  ;;  %v1620_v52 = vsub.f32 -inf, %v5911_v59  ;;  %v5913_v7 = vld [vmem:[#allocation50_spill] sm:$0xff] }
 0x2e4   : > { %v1754_v2 = vpop.permute.xlu0 %1753  ;;  %4295 = vpow2.f32 %v1663_v12  ;;  %5908 = vst [vmem:[#allocation54_spill] sm:$0xff] %v5226_v9  ;;  %v5228_v23 = vpop.eup %4283  ;;  %v1675_v16 = vmul.f32 1.442695, %v1619_v24  ;;  %v1622_v61 = vsub.f32 -inf, %v5913_v7  ;;  %v5920_v24 = vld [vmem:[#allocation8_spill] sm:$0xff]  ;;  %v5923_v7 = vld [vmem:[#allocation11_spill] sm:$0xff] }
 0x2e5   : > { %v1948_v10 = vmul.bf16 1069105081, %v1915_v36  ;;  %v1951_v43 = vmul.bf16 1069105081, %v1916_v62  ;;  %2410 = vperm.xlu1 %4186, %v5214_v17   ;;  %4297 = vpow2.f32 %v1665_v33  ;;  %5909 = vst [vmem:[#allocation55_spill] sm:$0xff] %v5228_v23  ;;  %v1875_v58 = vsub.f32 %v4893_v37, %v1754_v2 }
 0x2e6   : > { %v1876_v47 = vsub.f32 %v4895_v38, %v1754_v2  ;;  %v1673_v37 = vmul.f32 1.442695, %v1618_v63  ;;  %v1677_v1 = vmul.f32 1.442695, %v1620_v52  ;;  %v5915_v2 = vld [vmem:[#allocation14_spill] sm:$0xff]  ;;  %v5917_v63 = vld [vmem:[#allocation12_spill] sm:$0xff] }
 0x2e7   : > { %4299 = vpow.bf16 %v1948_v10  ;;  %v5921_v52 = vld [vmem:[#allocation9_spill] sm:$0xff] }
 0x2e8   : > { %4301 = vpow.bf16 %v1951_v43  ;;  %v1759_v21 = vpop.permute.xlu0 %1758  ;;  %v5916_v43 = vld [vmem:[#allocation15_spill] sm:$0xff] }
 0x2e9   : > { %v1877_v50 = vsub.f32 %v4897_v39, %v1759_v21  ;;  %v1878_v3 = vsub.f32 %v4901_v41, %v1759_v21  ;;  %2420 = vperm.xlu1 %4186, %v5221_v4   ;;  %4303 = vpow2.f32 %v1667_v54  ;;  %v5960_v4 = vld [vmem:[#allocation52_spill] sm:$0xff] }
 0x2ea   : > { %v4286_v30 = vpop.eup %4285  ;;  %4305 = vpow2.f32 %v1669_v48 }
 0x2eb   : > { %v4288_v25 = vpop.eup %4287  ;;  %v1927_v27 = vpack.c.bf16 %v1877_v50, %v1875_v58  ;;  %v1928_v26 = vpack.c.bf16 %v1878_v3, %v1876_v47  ;;  %v2059_v5 = vunpack.c.l.bf16 %v4286_v30  ;;  %v2061_v53 = vunpack.c.h.bf16 %v4286_v30  ;;  %v5918_v58 = vld [vmem:[#allocation13_spill] sm:$0xff]  ;;  %v5919_v3 = vld [vmem:[#allocation51_spill] sm:$0xff] }
 0x2ec   : > { %v5237_v60 = vpop.eup %4289  ;;  %2715 = vmatprep.mubr.bf16.mxu1 %v4288_v25  ;;  %v5239_v38 = vpop.permute.xlu0 %1703  ;;  %v2060_v39 = vunpack.c.l.bf16 %v4288_v25  ;;  %v2062_v41 = vunpack.c.h.bf16 %v4288_v25  ;;  %4307 = vpow2.f32 %v1671_v18  ;;  %v1681_v18 = vmul.f32 1.442695, %v1622_v61 }
 0x2ed   : > { %5910 = vst [vmem:[#allocation56_spill] sm:$0xff] %v5237_v60  ;;  %v5241_v55 = vpop.eup %4291  ;;  %v1984_v56 = vmul.bf16 1069105081, %v1927_v27  ;;  %v1987_v12 = vmul.bf16 1069105081, %v1928_v26  ;;  %2716 = vmatmul.mubr.bf16.gmra.mrb[8].mxu1 %v4286_v30  ;;  %v5244_v49 = vpop.xlane.xlu1 %1558  ;;  %2430 = vperm.xlu1 %4186, %v5226_v9   ;;  %v1624_v30 = vsub.f32 -inf, %v5919_v3  ;;  %v1855_v25 = vsub.f32 %v5920_v24, %v5239_v38 }
 0x2ee   : > { %v5247_v14 = vpop.eup %4293  ;;  %2723 = vmatprep.mubr.bf16.mxu1 %v5160_v46  ;;  %1843 = vperm.xlu0 %4185, %v5244_v49   ;;  %v5252_v33 = vadd.f32 %v2060_v39, %v2059_v5  ;;  %v5254_v35 = vadd.f32 %v2062_v41, %v2061_v53  ;;  %v5927_v24 = vld [vmem:[#allocation16_spill] sm:$0xff]  ;;  %v5957_v9 = vld [vmem:[#allocation43_spill] sm:$0xff] }
 0x2ef   : > { %5912 = vst [vmem:[#allocation48_spill] sm:$0xff] %v5247_v14  ;;  %v5256_v36 = vpop.eup %4295  ;;  %4309 = vpow.bf16 %v1984_v56  ;;  %v1856_v56 = vsub.f32 %v5921_v52, %v5239_v38  ;;  %v5930_v52 = vld [vmem:[#allocation22_spill] sm:$0xff] }
 0x2f0   : > { %v5258_v62 = vpop.eup %4297  ;;  %4311 = vpow.bf16 %v1987_v12  ;;  %v1769_v0 = vpop.permute.xlu0 %1768  ;;  %v5922_v12 = vld [vmem:[#allocation10_spill] sm:$0xff] }
 0x2f1   : > { %5914 = vst [vmem:[#allocation50_spill] sm:$0xff] %v5258_v62  ;;  %4313 = vpow2.f32 %v1673_v37  ;;  %v1881_v10 = vsub.f32 %v5915_v2, %v1769_v0  ;;  %v1882_v54 = vsub.f32 %v5916_v43, %v1769_v0  ;;  %v1764_v46 = vpop.permute.xlu1 %1763  ;;  %2440 = vperm.xlu1 %4186, %v5237_v60  }
 0x2f2   : > { %v4300_v48 = vpop.eup %4299  ;;  %4315 = vpow2.f32 %v1675_v16  ;;  %v1879_v21 = vsub.f32 %v5917_v63, %v1764_v46  ;;  %v1880_v47 = vsub.f32 %v5918_v58, %v1764_v46  ;;  %2370 = vperm.xlu0 %4185, %v5197_v29   ;;  %v5926_v58 = vld [vmem:[#allocation18_spill] sm:$0xff] }
 0x2f3   : > { %v4302_v50 = vpop.eup %4301  ;;  %v2045_v27 = vunpack.c.h.bf16 %v4300_v48  ;;  %v2043_v26 = vunpack.c.l.bf16 %v4300_v48  ;;  %4317 = vpow2.f32 %v1677_v1 }
 0x2f4   : > { %v5269_v5 = vpop.eup %4303  ;;  %v1929_v53 = vpack.c.bf16 %v1881_v10, %v1879_v21  ;;  %v1930_v37 = vpack.c.bf16 %v1882_v54, %v1880_v47  ;;  %2683 = vmatprep.mubr.bf16.mxu0 %v4302_v50  ;;  %v1709_v39 = vpop.permute.xlu0 %1708  ;;  %v2046_v41 = vunpack.c.h.bf16 %v4302_v50  ;;  %v2044_v59 = vunpack.c.l.bf16 %v4302_v50 }
 0x2f5   : > { %2684 = vmatmul.mubr.bf16.vlgmr.msra.gmra.mrb[64].mxu0 %v4300_v48  ;;  %2724 = vmatmul.mubr.bf16.gmra.mrb[12].mxu1 %v5156_v45  ;;  %v1857_v16 = vsub.f32 %v5922_v12, %v1709_v39  ;;  %v1858_v61 = vsub.f32 %v5923_v7, %v1709_v39  ;;  %v1779_v0 = vpop.permute.xlu1 %1778  ;;  %v5276_v2 = vpop.eup %4305  ;;  %4319 = vpow2.f32 %v1681_v18  ;;  %v5925_v48 = vld [vmem:[#allocation49_spill] sm:$0xff]  ;;  %v1685_v21 = vmul.f32 1.442695, %v1624_v30 }
 0x2f6   : > { %5924 = vst [vmem:[#allocation14_spill] sm:$0xff] %v5276_v2  ;;  %v1990_v10 = vmul.bf16 1069105081, %v1929_v53  ;;  %v1993_v43 = vmul.bf16 1069105081, %v1930_v37  ;;  %2450 = vperm.xlu1 %4186, %v5247_v14   ;;  %2385 = vperm.xlu0 %4185, %v5200_v34   ;;  %v5280_v1 = vpop.eup %4307  ;;  %v5282_v46 = vadd.f32 %v2046_v41, %v2045_v27  ;;  %v5284_v45 = vadd.f32 %v2044_v59, %v2043_v26  ;;  %v5928_v27 = vld [vmem:[#allocation19_spill] sm:$0xff] }
 0x2f7   : > { %v1917_v38 = vpack.c.bf16 %v1857_v16, %v1855_v25  ;;  %v1918_v54 = vpack.c.bf16 %v1858_v61, %v1856_v56  ;;  %v1621_v63 = vsub.f32 -inf, %v5925_v48  ;;  %v1885_v18 = vsub.f32 %v5926_v58, %v1779_v0  ;;  %v5929_v26 = vld [vmem:[#allocation17_spill] sm:$0xff]  ;;  %v5933_v48 = vld [vmem:[#allocation23_spill] sm:$0xff] }
 0x2f8   : > { %4321 = vpow.bf16 %v1990_v10  ;;  %v1774_v47 = vpop.permute.xlu0 %1773  ;;  %v1626_v25 = vsub.f32 -inf, %v5154_v22  ;;  %v1886_v41 = vsub.f32 %v5928_v27, %v1779_v0  ;;  %v5935_v27 = vld [vmem:[#allocation21_spill] sm:$0xff]  ;;  %v5952_v14 = vld [vmem:[#allocation39_spill] sm:$0xff] }
 0x2f9   : > { %4323 = vpow.bf16 %v1993_v43  ;;  %v1954_v50 = vmul.bf16 1069105081, %v1917_v38  ;;  %v1957_v3 = vmul.bf16 1069105081, %v1918_v54  ;;  %v1883_v53 = vsub.f32 %v5927_v24, %v1774_v47  ;;  %v1789_v37 = vpop.permute.xlu1 %1788 }
 0x2fa   : > { %v4310_v39 = vpop.eup %4309  ;;  %v1884_v59 = vsub.f32 %v5929_v26, %v1774_v47  ;;  %v1889_v56 = vsub.f32 %v5930_v52, %v1789_v37  ;;  %2460 = vperm.xlu1 %4186, %v5258_v62   ;;  %2395 = vperm.xlu0 %4185, %v5203_v40   ;;  %v1890_v58 = vsub.f32 %v5933_v48, %v1789_v37  ;;  %v5934_v47 = vld [vmem:[#allocation20_spill] sm:$0xff] }
 0x2fb   : > { %v4312_v30 = vpop.eup %4311  ;;  %4325 = vpow.bf16 %v1954_v50  ;;  %v1931_v16 = vpack.c.bf16 %v1885_v18, %v1883_v53  ;;  %v2067_v7 = vunpack.c.l.bf16 %v4310_v39  ;;  %v2069_v61 = vunpack.c.h.bf16 %v4310_v39 }
 0x2fc   : > { %v5295_v12 = vpop.eup %4313  ;;  %4327 = vpow.bf16 %v1957_v3  ;;  %v1932_v22 = vpack.c.bf16 %v1886_v41, %v1884_v59  ;;  %2731 = vmatprep.mubr.bf16.mxu1 %v4312_v30  ;;  %v1784_v0 = vpop.permute.xlu0 %1783  ;;  %v2068_v43 = vunpack.c.l.bf16 %v4312_v30  ;;  %v2070_v38 = vunpack.c.h.bf16 %v4312_v30  ;;  %v5938_v30 = vld [vmem:[#allocation26_spill] sm:$0xff] }
 0x2fd   : > { %5931 = vst [vmem:[#allocation15_spill] sm:$0xff] %v5295_v12  ;;  %v5297_v10 = vpop.eup %4315  ;;  %v1996_v54 = vmul.bf16 1069105081, %v1931_v16  ;;  %2732 = vmatmul.mubr.bf16.gmra.mrb[16].mxu1 %v4310_v39  ;;  %v1887_v24 = vsub.f32 %v5934_v47, %v1784_v0  ;;  %v1888_v26 = vsub.f32 %v5935_v27, %v1784_v0  ;;  %v1799_v50 = vpop.permute.xlu1 %1798  ;;  %4329 = vpow2.f32 %v1685_v21  ;;  %v5940_v47 = vld [vmem:[#allocation24_spill] sm:$0xff] }
 0x2fe   : > { %5932 = vst [vmem:[#allocation12_spill] sm:$0xff] %v5297_v10  ;;  %v1689_v18 = vmul.f32 1.442695, %v1626_v25  ;;  %v1999_v53 = vmul.bf16 1069105081, %v1932_v22  ;;  %2470 = vperm.xlu1 %4186, %v5276_v2   ;;  %2405 = vperm.xlu0 %4185, %v5207_v28   ;;  %v5304_v3 = vadd.f32 %v2068_v43, %v2067_v7  ;;  %v5306_v41 = vpop.eup %4317  ;;  %v5308_v39 = vadd.f32 %v2070_v38, %v2069_v61  ;;  %v5939_v25 = vld [vmem:[#allocation27_spill] sm:$0xff] }
 0x2ff   : > { %5936 = vst [vmem:[#allocation13_spill] sm:$0xff] %v5306_v41  ;;  %4331 = vpow.bf16 %v1996_v54  ;;  %v1933_v59 = vpack.c.bf16 %v1889_v56, %v1887_v24  ;;  %v1934_v37 = vpack.c.bf16 %v1890_v58, %v1888_v26  ;;  %v5310_v52 = vpop.eup %4319  ;;  %v1893_v21 = vsub.f32 %v5938_v30, %v1799_v50  ;;  %v5941_v43 = vld [vmem:[#allocation25_spill] sm:$0xff]  ;;  %v5942_v58 = vld [vmem:[#allocation30_spill] sm:$0xff] }
 0x300   : > { %5937 = vst [vmem:[#allocation51_spill] sm:$0xff] %v5310_v52  ;;  %4333 = vpow.bf16 %v1999_v53  ;;  %v1894_v16 = vsub.f32 %v5939_v25, %v1799_v50  ;;  %v1794_v22 = vpop.permute.xlu0 %1793  ;;  %v5316_v54 = vmul.f32 1.442695, %v1621_v63  ;;  %v5943_v50 = vld [vmem:[#allocation31_spill] sm:$0xff] }
 0x301   : > { %v2002_v0 = vmul.bf16 1069105081, %v1933_v59  ;;  %v2005_v48 = vmul.bf16 1069105081, %v1934_v37  ;;  %v1891_v7 = vsub.f32 %v5940_v47, %v1794_v22  ;;  %v1892_v27 = vsub.f32 %v5941_v43, %v1794_v22  ;;  %v1809_v2 = vpop.permute.xlu1 %1808  ;;  %v5945_v47 = vld [vmem:[#allocation29_spill] sm:$0xff] }
 0x302   : > { %4335 = vpow2.f32 %v1689_v18  ;;  %2480 = vperm.xlu1 %4186, %v5295_v12   ;;  %2415 = vperm.xlu0 %4185, %v5217_v15   ;;  %v1897_v24 = vsub.f32 %v5942_v58, %v1809_v2  ;;  %v1898_v53 = vsub.f32 %v5943_v50, %v1809_v2  ;;  %v5944_v18 = vld [vmem:[#allocation28_spill] sm:$0xff] }
 0x303   : > { %v4322_v56 = vpop.eup %4321  ;;  %4337 = vpow.bf16 %v2002_v0  ;;  %v1935_v61 = vpack.c.bf16 %v1893_v21, %v1891_v7  ;;  %v1936_v38 = vpack.c.bf16 %v1894_v16, %v1892_v27  ;;  %v5946_v21 = vld [vmem:[#allocation34_spill] sm:$0xff]  ;;  %v5947_v7 = vld [vmem:[#allocation35_spill] sm:$0xff] }
 0x304   : > { %v4324_v26 = vpop.eup %4323  ;;  %4339 = vpow.bf16 %v2005_v48  ;;  %v1804_v59 = vpop.permute.xlu0 %1803  ;;  %v2071_v37 = vunpack.c.l.bf16 %v4322_v56  ;;  %v2073_v30 = vunpack.c.h.bf16 %v4322_v56 }
 0x305   : > { %v2008_v63 = vmul.bf16 1069105081, %v1935_v61  ;;  %v2011_v25 = vmul.bf16 1069105081, %v1936_v38  ;;  %2739 = vmatprep.mubr.bf16.mxu1 %v4324_v26  ;;  %v1895_v22 = vsub.f32 %v5944_v18, %v1804_v59  ;;  %v1896_v43 = vsub.f32 %v5945_v47, %v1804_v59  ;;  %v1819_v12 = vpop.permute.xlu1 %1818 }
 0x306   : > { %v4326_v0 = vpop.eup %4325  ;;  %v1901_v16 = vsub.f32 %v5946_v21, %v1819_v12  ;;  %v1902_v27 = vsub.f32 %v5947_v7, %v1819_v12  ;;  %2490 = vperm.xlu1 %4186, %v5306_v41   ;;  %2740 = vmatmul.mubr.bf16.gmra.mrb[20].mxu1 %v4322_v56  ;;  %v2072_v2 = vunpack.c.l.bf16 %v4324_v26  ;;  %v2074_v48 = vunpack.c.h.bf16 %v4324_v26  ;;  %v5949_v26 = vld [vmem:[#allocation32_spill] sm:$0xff] }
 0x307   : > { %v4328_v58 = vpop.eup %4327  ;;  %4341 = vpow.bf16 %v2008_v63  ;;  %v1937_v61 = vpack.c.bf16 %v1897_v24, %v1895_v22  ;;  %v1938_v38 = vpack.c.bf16 %v1898_v53, %v1896_v43  ;;  %2425 = vperm.xlu0 %4185, %v5224_v44   ;;  %v2047_v50 = vunpack.c.l.bf16 %v4326_v0  ;;  %v5950_v63 = vld [vmem:[#allocation33_spill] sm:$0xff]  ;;  %v5951_v43 = vld [vmem:[#allocation38_spill] sm:$0xff] }
 0x308   : > { %v5328_v18 = vpop.eup %4329  ;;  %4343 = vpow.bf16 %v2011_v25  ;;  %2691 = vmatprep.mubr.bf16.mxu0 %v4328_v58  ;;  %v1814_v59 = vpop.permute.xlu0 %1813  ;;  %v5330_v47 = vadd.f32 %v2072_v2, %v2071_v37  ;;  %v2048_v12 = vunpack.c.l.bf16 %v4328_v58  ;;  %v2049_v21 = vunpack.c.h.bf16 %v4326_v0 }
 0x309   : > { %5948 = vst [vmem:[#allocation8_spill] sm:$0xff] %v5328_v18  ;;  %v2014_v7 = vmul.bf16 1069105081, %v1937_v61  ;;  %v2017_v56 = vmul.bf16 1069105081, %v1938_v38  ;;  %2692 = vmatmul.mubr.bf16.gmra.mrb[68].mxu0 %v4326_v0  ;;  %v1899_v41 = vsub.f32 %v5949_v26, %v1814_v59  ;;  %v1900_v24 = vsub.f32 %v5950_v63, %v1814_v59  ;;  %v1829_v53 = vpop.permute.xlu1 %1828 }
 0x30a   : > { %v4332_v22 = vpop.eup %4331  ;;  %v1905_v62 = vsub.f32 %v5951_v43, %v1829_v53  ;;  %v1906_v60 = vsub.f32 %v5952_v14, %v1829_v53  ;;  %2500 = vperm.xlu1 %4186, %v5310_v52   ;;  %v5337_v25 = vadd.f32 %v2048_v12, %v2047_v50  ;;  %v2050_v37 = vunpack.c.h.bf16 %v4328_v58  ;;  %v5954_v58 = vld [vmem:[#allocation36_spill] sm:$0xff] }
 0x30b   : > { %v4334_v2 = vpop.eup %4333  ;;  %4345 = vpow.bf16 %v2014_v7  ;;  %v1939_v61 = vpack.c.bf16 %v1901_v16, %v1899_v41  ;;  %v1940_v38 = vpack.c.bf16 %v1902_v27, %v1900_v24  ;;  %2435 = vperm.xlu0 %4185, %v5228_v23   ;;  %v2075_v0 = vunpack.c.l.bf16 %v4332_v22  ;;  %v5955_v7 = vld [vmem:[#allocation37_spill] sm:$0xff]  ;;  %v5956_v24 = vld [vmem:[#allocation42_spill] sm:$0xff] }
 0x30c   : > { %v5340_v26 = vpop.eup %4335  ;;  %4347 = vpow.bf16 %v2017_v56  ;;  %2747 = vmatprep.mubr.bf16.mxu1 %v4334_v2  ;;  %v1824_v59 = vpop.permute.xlu0 %1823  ;;  %v5342_v63 = vadd.f32 %v2050_v37, %v2049_v21  ;;  %v2076_v14 = vunpack.c.l.bf16 %v4334_v2  ;;  %v5344_v53 = vadd.f32 %v2074_v48, %v2073_v30 }
 0x30d   : > { %5953 = vst [vmem:[#allocation9_spill] sm:$0xff] %v5340_v26  ;;  %v2020_v50 = vmul.bf16 1069105081, %v1939_v61  ;;  %v2023_v12 = vmul.bf16 1069105081, %v1940_v38  ;;  %v1903_v43 = vsub.f32 %v5954_v58, %v1824_v59  ;;  %v1904_v41 = vsub.f32 %v5955_v7, %v1824_v59  ;;  %v1839_v16 = vpop.permute.xlu1 %1838 }
 0x30e   : > { %v4338_v27 = vpop.eup %4337  ;;  %v1909_v52 = vsub.f32 %v5956_v24, %v1839_v16  ;;  %v1910_v23 = vsub.f32 %v5957_v9, %v1839_v16  ;;  %2510 = vperm.xlu1 %4186, %v5328_v18   ;;  %2748 = vmatmul.mubr.bf16.gmra.mrb[24].mxu1 %v4332_v22  ;;  %v5351_v21 = vadd.f32 %v2076_v14, %v2075_v0  ;;  %v2077_v56 = vunpack.c.h.bf16 %v4332_v22  ;;  %v5958_v24 = vld [vmem:[#allocation40_spill] sm:$0xff]  ;;  %v5959_v0 = vld [vmem:[#allocation41_spill] sm:$0xff] }
 0x30f   : > { %v4340_v30 = vpop.eup %4339  ;;  %4349 = vpow.bf16 %v2020_v50  ;;  %v1941_v48 = vpack.c.bf16 %v1905_v62, %v1903_v43  ;;  %v1942_v37 = vpack.c.bf16 %v1906_v60, %v1904_v41  ;;  %2445 = vperm.xlu0 %4185, %v5241_v55   ;;  %v2079_v61 = vunpack.c.l.bf16 %v4338_v27 }
 0x310   : > { %4351 = vpow.bf16 %v2023_v12  ;;  %2755 = vmatprep.mubr.bf16.mxu1 %v4340_v30  ;;  %v1834_v38 = vpop.permute.xlu0 %1833  ;;  %v2080_v59 = vunpack.c.l.bf16 %v4340_v30  ;;  %v2078_v58 = vunpack.c.h.bf16 %v4334_v2  ;;  %v2081_v7 = vunpack.c.h.bf16 %v4338_v27 }
 0x311   : > { %v2026_v9 = vmul.bf16 1069105081, %v1941_v48  ;;  %v2029_v16 = vmul.bf16 1069105081, %v1942_v37  ;;  %v1907_v18 = vsub.f32 %v5958_v24, %v1834_v38  ;;  %v1908_v14 = vsub.f32 %v5959_v0, %v1834_v38 }
 0x312   : > { %v4342_v22 = vpop.eup %4341  ;;  %v1623_v50 = vsub.f32 -inf, %v5960_v4  ;;  %2520 = vperm.xlu1 %4186, %v5340_v26   ;;  %v5358_v60 = vadd.f32 %v2080_v59, %v2079_v61  ;;  %v5360_v62 = vadd.f32 %v2078_v58, %v2077_v56  ;;  %v2082_v12 = vunpack.c.h.bf16 %v4340_v30 }
 0x313   : > { %v4344_v43 = vpop.eup %4343  ;;  %4353 = vpow.bf16 %v2026_v9  ;;  %v1943_v2 = vpack.c.bf16 %v1909_v52, %v1907_v18  ;;  %v1944_v41 = vpack.c.bf16 %v1910_v23, %v1908_v14  ;;  %2455 = vperm.xlu0 %4185, %v5256_v36   ;;  %v2083_v48 = vunpack.c.l.bf16 %v4342_v22 }
 0x314   : > { %4355 = vpow.bf16 %v2029_v16  ;;  %v2084_v37 = vunpack.c.l.bf16 %v4344_v43  ;;  %v5363_v38 = vadd.f32 %v2082_v12, %v2081_v7  ;;  %v2085_v24 = vunpack.c.h.bf16 %v4342_v22 }
 0x315   : > { %v2032_v4 = vmul.bf16 1069105081, %v1943_v2  ;;  %v2035_v0 = vmul.bf16 1069105081, %v1944_v41  ;;  %v2086_v26 = vunpack.c.h.bf16 %v4344_v43  ;;  %4357 = vpow2.f32 %v5316_v54 }
 0x316   : > { %v4346_v61 = vpop.eup %4345  ;;  %v1683_v56 = vmul.f32 1.442695, %v1623_v50  ;;  %2756 = vmatmul.mubr.bf16.gmra.mrb[28].mxu1 %v4338_v27  ;;  %v5366_v30 = vadd.f32 %v2084_v37, %v2083_v48  ;;  %v1625_v58 = vsub.f32 -inf, %v5244_v49 }
 0x317   : > { %v4348_v52 = vpop.eup %4347  ;;  %4359 = vpow.bf16 %v2032_v4  ;;  %2465 = vperm.xlu0 %4185, %v5269_v5   ;;  %2763 = vmatprep.mubr.bf16.mxu1 %v4344_v43  ;;  %v2087_v23 = vunpack.c.l.bf16 %v4346_v61  ;;  %v5369_v18 = vadd.f32 %v2086_v26, %v2085_v24  ;;  %v2089_v59 = vunpack.c.h.bf16 %v4346_v61 }
 0x318   : > { %4361 = vpow.bf16 %v2035_v0  ;;  %v2088_v7 = vunpack.c.l.bf16 %v4348_v52  ;;  %v2090_v9 = vunpack.c.h.bf16 %v4348_v52  ;;  %v1687_v43 = vmul.f32 1.442695, %v1625_v58 }
 0x319   : > { %4363 = vpow2.f32 %v1683_v56 }
 0x31a   : > { %v4350_v16 = vpop.eup %4349  ;;  %v2173_v54 = vadd.f32 %v2088_v7, %v2087_v23  ;;  %v5372_v14 = vadd.f32 %v2090_v9, %v2089_v59  ;;  %4365 = vpow2.f32 %v1687_v43 }
 0x31b   : > { %v4352_v27 = vpop.eup %4351  ;;  %2475 = vperm.xlu0 %4185, %v5280_v1   ;;  %v2091_v50 = vunpack.c.l.bf16 %v4350_v16  ;;  %v2093_v12 = vunpack.c.h.bf16 %v4350_v16 }
 0x31c   : > { %v2092_v2 = vunpack.c.l.bf16 %v4352_v27  ;;  %v2094_v26 = vunpack.c.h.bf16 %v4352_v27 }
 0x31e   : > { %v4354_v41 = vpop.eup %4353  ;;  %2764 = vmatmul.mubr.bf16.gmra.mrb[32].mxu1 %v4342_v22  ;;  %v2179_v48 = vadd.f32 %v2092_v2, %v2091_v50  ;;  %v5375_v49 = vadd.f32 %v2094_v26, %v2093_v12 }
 0x31f   : > { %v4356_v37 = vpop.eup %4355  ;;  %2485 = vperm.xlu0 %4185, %v5297_v10   ;;  %2771 = vmatprep.mubr.bf16.mxu1 %v4348_v52  ;;  %v2095_v24 = vunpack.c.l.bf16 %v4354_v41  ;;  %v2097_v4 = vunpack.c.h.bf16 %v4354_v41 }
 0x320   : > { %v5378_v0 = vpop.eup %4357  ;;  %v2096_v23 = vunpack.c.l.bf16 %v4356_v37  ;;  %v2098_v59 = vunpack.c.h.bf16 %v4356_v37 }
 0x322   : > { %v4360_v56 = vpop.eup %4359  ;;  %v2185_v58 = vadd.f32 %v2096_v23, %v2095_v24  ;;  %v5380_v7 = vadd.f32 %v2098_v59, %v2097_v4 }
 0x323   : > { %v4362_v9 = vpop.eup %4361  ;;  %2495 = vperm.xlu0 %4185, %v5378_v0   ;;  %v2099_v22 = vunpack.c.l.bf16 %v4360_v56  ;;  %v2101_v50 = vunpack.c.h.bf16 %v4360_v56 }
 0x324   : > { %v2100_v12 = vunpack.c.l.bf16 %v4362_v9  ;;  %v2102_v2 = vunpack.c.h.bf16 %v4362_v9  ;;  %v5383_v26 = vpop.eup %4363 }
 0x325   : > { %v5388_v43 = vpop.eup %4365 }
 0x326   : > { %2772 = vmatmul.mubr.bf16.gmra.mrb[36].mxu1 %v4346_v61  ;;  %v2191_v52 = vadd.f32 %v2100_v12, %v2099_v22  ;;  %v5385_v10 = vadd.f32 %v2102_v2, %v2101_v50  ;;  %v4236_v50 = vld [vmem:[%s5797_s3 + $0x8] sm:$0xff]  }
 0x327   : > { %2505 = vperm.xlu0 %4185, %v5383_v26   ;;  %2779 = vmatprep.mubr.bf16.mxu1 %v4352_v27 }
 0x32b   : > { %2515 = vperm.xlu0 %4185, %v5388_v43  }
 0x32e   : > { %2780 = vmatmul.mubr.bf16.gmra.mrb[40].mxu1 %v4350_v16 }
 0x32f   : > { %2787 = vmatprep.mubr.bf16.mxu1 %v4356_v37 }
 0x336   : > { %2111 = vadd.xlane.f32.xlu1 %v5282_v46  ;;  %2788 = vmatmul.mubr.bf16.gmra.mrb[44].mxu1 %v4354_v41 }
 0x337   : > { %2795 = vmatprep.mubr.bf16.mxu1 %v4362_v9 }
 0x33a   : > { %2120 = vadd.xlane.f32.xlu1 %v5136_v19 }
 0x33e   : > { %2126 = vadd.xlane.f32.xlu1 %v5145_v31  ;;  %2796 = vmatmul.mubr.bf16.gmra.mrb[48].mxu1 %v4360_v56 }
 0x342   : > { %2132 = vadd.xlane.f32.xlu1 %v5252_v33  ;;  %v5961_v33 = vld [vmem:[#allocation46_spill] sm:$0xff] }
 0x346   : > { %2138 = vadd.xlane.f32.xlu1 %v5172_v42 }
 0x34a   : > { %2108 = vadd.xlane.f32.xlu0 %v5284_v45  ;;  %2144 = vadd.xlane.f32.xlu1 %v5304_v3  ;;  %v5963_v3 = vld [vmem:[#allocation44_spill] sm:$0xff] }
 0x34c   : > { %v1849_v19 = vpop.permute.xlu1 %1848 }
 0x34d   : > { %v1913_v46 = vsub.f32 %v5961_v33, %v1849_v19 }
 0x34e   : > { %2150 = vadd.xlane.f32.xlu1 %v5330_v47  ;;  %2114 = vadd.xlane.f32.xlu0 %v5337_v25  ;;  %v5964_v47 = vld [vmem:[#allocation45_spill] sm:$0xff] }
 0x350   : > { %v5407_v31 = vpop.permute.xlu1 %2365 }
 0x352   : > { %2117 = vadd.xlane.f32.xlu0 %v5342_v63  ;;  %2156 = vadd.xlane.f32.xlu1 %v5351_v21 }
 0x354   : > { %v5410_v42 = vpop.permute.xlu1 %2375 }
 0x356   : > { %2123 = vadd.xlane.f32.xlu0 %v5138_v20  ;;  %2162 = vadd.xlane.f32.xlu1 %v5358_v60 }
 0x358   : > { %v5414_v20 = vpop.permute.xlu1 %2380 }
 0x35a   : > { %2129 = vadd.xlane.f32.xlu0 %v5147_v32  ;;  %2168 = vadd.xlane.f32.xlu1 %v5366_v30 }
 0x35e   : > { %2135 = vadd.xlane.f32.xlu0 %v5254_v35  ;;  %2174 = vadd.xlane.f32.xlu1 %v2173_v54  ;;  %v5962_v35 = vld [vmem:[#allocation47_spill] sm:$0xff] }
 0x35f   : > { %v1914_v45 = vsub.f32 %v5962_v35, %v1849_v19 }
 0x362   : > { %2141 = vadd.xlane.f32.xlu0 %v5174_v13  ;;  %2180 = vadd.xlane.f32.xlu1 %v2179_v48 }
 0x366   : > { %2147 = vadd.xlane.f32.xlu0 %v5308_v39  ;;  %2186 = vadd.xlane.f32.xlu1 %v2185_v58  ;;  %v2391_v39 = vpop.permute.xlu1 %2390 }
 0x367   : > { %v2528_v12 = vmul.f32 0.0, %v2391_v39 }
 0x36a   : > { %2153 = vadd.xlane.f32.xlu0 %v5344_v53  ;;  %2192 = vadd.xlane.f32.xlu1 %v2191_v52  ;;  %v2401_v53 = vpop.permute.xlu1 %2400 }
 0x36d   : > { %v1844_v32 = vpop.permute.xlu0 %1843 }
 0x36e   : > { %2159 = vadd.xlane.f32.xlu0 %v5360_v62  ;;  %v1911_v13 = vsub.f32 %v5963_v3, %v1844_v32  ;;  %v1912_v25 = vsub.f32 %v5964_v47, %v1844_v32  ;;  %v5424_v30 = vpop.permute.xlu1 %2410 }
 0x370   : > { %v1945_v63 = vpack.c.bf16 %v1913_v46, %v1911_v13  ;;  %v1946_v21 = vpack.c.bf16 %v1914_v45, %v1912_v25  ;;  %v2530_v25 = vmul.f32 0.0, %v2401_v53  ;;  %v4238_v53 = vld [vmem:[%s5797_s3 + $0x18] sm:$0xff]  }
 0x371   : > { %v5427_v16 = vpop.permute.xlu0 %2370 }
 0x372   : > { %v2038_v60 = vmul.bf16 1069105081, %v1945_v63  ;;  %v2041_v61 = vmul.bf16 1069105081, %v1946_v21  ;;  %2165 = vadd.xlane.f32.xlu0 %v5363_v38 }
 0x374   : > { %4367 = vpow.bf16 %v2038_v60 }
 0x375   : > { %4369 = vpow.bf16 %v2041_v61  ;;  %v2386_v24 = vpop.permute.xlu0 %2385  ;;  %v4237_v61 = vld [vmem:[%s5797_s3 + $0x10] sm:$0xff]  }
 0x376   : > { %2171 = vadd.xlane.f32.xlu0 %v5369_v18  ;;  %v4235_v18 = vld [vmem:[%s5797_s3] sm:$0xff]   ;;  %v2527_v58 = vmul.f32 0.0, %v2386_v24 }
 0x377   : > { %4079 = vmatprep.subr.bf16.mxu1 %v4235_v18 }
 0x378   : > { %4080 = vmatpush3.bf16.msra.mxu1 %v4235_v18 }
 0x379   : > { %v2396_v23 = vpop.permute.xlu0 %2395  ;;  %4081 = vmatprep.subr.bf16.mxu1 %v4236_v50 }
 0x37a   : > { %2177 = vadd.xlane.f32.xlu0 %v5372_v14  ;;  %v5433_v14 = vpop.permute.xlu1 %2420  ;;  %v2529_v45 = vmul.f32 0.0, %v2396_v23 }
 0x37c   : > { %4082 = vmatpush3.bf16.msra.mxu1 %v4236_v50 }
 0x37d   : > { %4083 = vmatprep.subr.bf16.mxu1 %v4237_v61 }
 0x37e   : > { %2183 = vadd.xlane.f32.xlu0 %v5375_v49  ;;  %v5436_v4 = vpop.permute.xlu1 %2430 }
 0x37f   : > { %v4368_v62 = vpop.eup %4367 }
 0x380   : > { %v4370_v54 = vpop.eup %4369  ;;  %v2103_v27 = vunpack.c.l.bf16 %v4368_v62  ;;  %v2105_v41 = vunpack.c.h.bf16 %v4368_v62  ;;  %4084 = vmatpush3.bf16.msra.mxu1 %v4237_v61 }
 0x381   : > { %2803 = vmatprep.mubr.bf16.mxu1 %v4370_v54  ;;  %v2104_v48 = vunpack.c.l.bf16 %v4370_v54  ;;  %v2106_v38 = vunpack.c.h.bf16 %v4370_v54  ;;  %4085 = vmatprep.subr.bf16.mxu1 %v4238_v53 }
 0x382   : > { %2189 = vadd.xlane.f32.xlu0 %v5380_v7  ;;  %2804 = vmatmul.mubr.bf16.gmra.mrb[52].mxu1 %v4368_v62  ;;  %v5441_v2 = vpop.permute.xlu1 %2440 }
 0x383   : > { %v2197_v37 = vadd.f32 %v2104_v48, %v2103_v27  ;;  %v2200_v49 = vadd.f32 %v2106_v38, %v2105_v41  ;;  %v4239_v48 = vld [vmem:[%s5797_s3 + $0x20] sm:$0xff]  }
 0x384   : > { %4086 = vmatpush3.bf16.msra.mxu1 %v4238_v53 }
 0x385   : > { %2198 = vadd.xlane.f32.xlu1 %v2197_v37  ;;  %4087 = vmatprep.subr.bf16.mxu1 %v4239_v48  ;;  %v4240_v37 = vld [vmem:[%s5797_s3 + $0x28] sm:$0xff]  }
 0x386   : > { %2195 = vadd.xlane.f32.xlu0 %v5385_v10  ;;  %v2406_v10 = vpop.permute.xlu0 %2405  ;;  %v5447_v35 = vpop.permute.xlu1 %2450 }
 0x388   : > { %4088 = vmatpush3.bf16.msra.mxu1 %v4239_v48 }
 0x389   : > { %4089 = vmatprep.subr.bf16.mxu1 %v4240_v37 }
 0x38a   : > { %2201 = vadd.xlane.f32.xlu0 %v2200_v49  ;;  %v2416_v63 = vpop.permute.xlu0 %2415  ;;  %v5456_v62 = vpop.permute.xlu1 %2460 }
 0x38b   : > { %v3971_v59 = vpop.f32.mrb[0].mxu1 }
 0x38c   : > { %v3972_v56 = vpop.f32.mrb[1].mxu1  ;;  %4090 = vmatpush3.bf16.msra.mxu1 %v4240_v37 }
 0x38d   : > { %v3973_v7 = vadd.f32 %v3972_v56, %v3971_v59  ;;  %v3974_v9 = vpop.f32.mrb[2].mxu1 }
 0x38e   : > { %v3975_v22 = vpop.f32.mrb[3].mxu1  ;;  %v5458_v54 = vpop.permute.xlu0 %2425 }
 0x38f   : > { %v3976_v52 = vadd.f32 %v3975_v22, %v3974_v9  ;;  %v5443_v19 = vadd.f32 %v3973_v7, %v2527_v58  ;;  %v5460_v27 = vpop.permute.xlu1 %2470 }
 0x391   : > { %v5445_v32 = vadd.f32 %v3976_v52, %v2528_v12  ;;  %v2531_v12 = vmul.f32 0.0, %v2406_v10 }
 0x392   : > { %v5462_v41 = vpop.permute.xlu0 %2435 }
 0x393   : > { %v3977_v33 = vpop.f32.mrb[4].mxu1  ;;  %v5470_v38 = vpop.permute.xlu1 %2480 }
 0x394   : > { %v3978_v46 = vpop.f32.mrb[5].mxu1 }
 0x395   : > { %v3979_v3 = vadd.f32 %v3978_v46, %v3977_v33  ;;  %v3980_v13 = vpop.f32.mrb[6].mxu1  ;;  %v2236_v46 = vmul.f32 0.0, %v5197_v29  ;;  %v2523_v29 = vmul.f32 0.0, %v5407_v31 }
 0x396   : > { %v3981_v47 = vpop.f32.mrb[7].mxu1  ;;  %v5472_v18 = vpop.permute.xlu0 %2445 }
 0x397   : > { %v3982_v21 = vadd.f32 %v3981_v47, %v3980_v13  ;;  %v5449_v39 = vadd.f32 %v3979_v3, %v2529_v45  ;;  %v5477_v49 = vpop.permute.xlu1 %2490  ;;  %v2532_v13 = vmul.f32 0.0, %v5424_v30 }
 0x399   : > { %5965 = vst [vmem:[#allocation10_spill] sm:$0xff] %v5449_v39  ;;  %v5451_v60 = vadd.f32 %v3982_v21, %v2530_v25 }
 0x39a   : > { %v5479_v24 = vpop.permute.xlu0 %2455 }
 0x39b   : > { %5966 = vst [vmem:[#allocation11_spill] sm:$0xff] %v5451_v60  ;;  %v5481_v23 = vpop.permute.xlu1 %2500 }
 0x39c   : > { %5967 = vst [vmem:[#allocation49_spill] sm:$0xff] %v5481_v23  ;;  %v2533_v23 = vmul.f32 0.0, %v2416_v63 }
 0x39e   : > { %v5483_v59 = vpop.permute.xlu0 %2465 }
 0x39f   : > { %v5485_v56 = vpop.permute.xlu1 %2510 }
 0x3a2   : > { %v5487_v58 = vpop.permute.xlu0 %2475 }
 0x3a3   : > { %v5489_v7 = vpop.permute.xlu1 %2520 }
 0x3a6   : > { %v5491_v22 = vpop.permute.xlu0 %2485 }
 0x3aa   : > { %v5499_v53 = vpop.permute.xlu0 %2495 }
 0x3ae   : > { %v5510_v31 = vpop.permute.xlu0 %2505 }
 0x3c0   : > { %v3983_v9 = vpop.f32.mrb[8].mxu1 }
 0x3c1   : > { %v3984_v50 = vpop.f32.mrb[9].mxu1 }
 0x3c2   : > { %v3985_v52 = vadd.f32 %v3984_v50, %v3983_v9  ;;  %v3986_v33 = vpop.f32.mrb[10].mxu1 }
 0x3c3   : > { %v3987_v45 = vpop.f32.mrb[11].mxu1  ;;  %v2112_v3 = vpop.xlane.xlu1 %2111 }
 0x3c4   : > { %v3988_v47 = vadd.f32 %v3987_v45, %v3986_v33  ;;  %v2268_v25 = vadd.f32 %v2236_v46, %v2112_v3  ;;  %v5495_v21 = vadd.f32 %v3985_v52, %v2531_v12  ;;  %v2534_v12 = vmul.f32 0.0, %v5433_v14 }
 0x3c5   : > { %v2524_v52 = vmul.f32 0.0, %v5427_v16 }
 0x3c6   : > { %4371 = vrcp.f32 %v2268_v25  ;;  %v5497_v61 = vadd.f32 %v3988_v47, %v2532_v13 }
 0x3c7   : > { %v2121_v48 = vpop.xlane.xlu1 %2120 }
 0x3c8   : > { %5968 = vst [vmem:[#allocation18_spill] sm:$0xff] %v5497_v61  ;;  %v3959_v37 = vpop.f32.mrb[64].mxu0  ;;  %v3989_v10 = vpop.f32.mrb[12].mxu1 }
 0x3c9   : > { %v3960_v9 = vpop.f32.mrb[65].mxu0  ;;  %v3990_v50 = vpop.f32.mrb[13].mxu1 }
 0x3ca   : > { %v3961_v60 = vadd.f32 %v3960_v9, %v3959_v37  ;;  %v3991_v39 = vadd.f32 %v3990_v50, %v3989_v10  ;;  %v3962_v30 = vpop.f32.mrb[66].mxu0  ;;  %v3992_v33 = vpop.f32.mrb[14].mxu1  ;;  %v4241_v50 = vld [vmem:[%s5797_s3 + $0x30] sm:$0xff]  }
 0x3cb   : > { %v3963_v46 = vpop.f32.mrb[67].mxu0  ;;  %v3993_v45 = vpop.f32.mrb[15].mxu1  ;;  %4091 = vmatprep.subr.bf16.mxu1 %v4241_v50 }
 0x3cc   : > { %v3964_v3 = vadd.f32 %v3963_v46, %v3962_v30  ;;  %v3994_v13 = vadd.f32 %v3993_v45, %v3992_v33  ;;  %v5504_v47 = vpop.xlane.xlu1 %2126  ;;  %v5506_v25 = vadd.f32 %v3961_v60, %v2523_v29  ;;  %v5508_v61 = vadd.f32 %v3991_v39, %v2533_v23  ;;  %v5522_v29 = vpop.permute.xlu0 %2515  ;;  %4092 = vmatpush3.bf16.msra.mxu1 %v4241_v50 }
 0x3cd   : > { %v2535_v60 = vmul.f32 0.0, %v5458_v54  ;;  %5970 = vst [vmem:[#allocation19_spill] sm:$0xff] %v5522_v29  ;;  %v2536_v33 = vmul.f32 0.0, %v5436_v4  ;;  %v2235_v45 = vmul.f32 0.0, %v5168_v57  ;;  %v2537_v50 = vmul.f32 0.0, %v5462_v41 }
 0x3ce   : > { %v5512_v63 = vadd.f32 %v3964_v3, %v2524_v52  ;;  %v5514_v37 = vadd.f32 %v3994_v13, %v2534_v12 }
 0x3d0   : > { %5969 = vst [vmem:[#allocation16_spill] sm:$0xff] %v5514_v37  ;;  %v4372_v10 = vpop.eup %4371  ;;  %v5516_v14 = vpop.xlane.xlu1 %2132 }
 0x3d1   : > { %v3995_v16 = vpop.f32.mrb[16].mxu1  ;;  %3011 = vperm.xlu1 %4186, %v4372_v10  }
 0x3d2   : > { %v3996_v9 = vpop.f32.mrb[17].mxu1 }
 0x3d3   : > { %v3997_v39 = vadd.f32 %v3996_v9, %v3995_v16  ;;  %v3998_v23 = vpop.f32.mrb[18].mxu1  ;;  %v4242_v16 = vld [vmem:[%s5797_s3 + $0x38] sm:$0xff]  }
 0x3d4   : > { %v3999_v30 = vpop.f32.mrb[19].mxu1  ;;  %v5525_v12 = vpop.xlane.xlu1 %2138  ;;  %4093 = vmatprep.subr.bf16.mxu1 %v4242_v16 }
 0x3d5   : > { %v4000_v52 = vadd.f32 %v3999_v30, %v3998_v23  ;;  %v5527_v46 = vadd.f32 %v3997_v39, %v2535_v60  ;;  %v2237_v23 = vmul.f32 0.0, %v5178_v6  ;;  %v2239_v60 = vmul.f32 0.0, %v5200_v34  ;;  %4094 = vmatpush3.bf16.msra.mxu1 %v4242_v16 }
 0x3d6   : > { %v2538_v6 = vmul.f32 0.0, %v5441_v2 }
 0x3d7   : > { %5971 = vst [vmem:[#allocation17_spill] sm:$0xff] %v5527_v46  ;;  %v5530_v3 = vadd.f32 %v4000_v52, %v2536_v33  ;;  %v2109_v13 = vpop.xlane.xlu0 %2108 }
 0x3d8   : > { %v2267_v54 = vadd.f32 %v2235_v45, %v2109_v13  ;;  %v5535_v9 = vpop.xlane.xlu1 %2144  ;;  %v2525_v45 = vmul.f32 0.0, %v5410_v42  ;;  %v2271_v13 = vadd.f32 %v2239_v60, %v2121_v48 }
 0x3d9   : > { %5972 = vst [vmem:[#allocation22_spill] sm:$0xff] %v5530_v3  ;;  %v4001_v10 = vpop.f32.mrb[20].mxu1 }
 0x3da   : > { %4373 = vrcp.f32 %v2267_v54  ;;  %v4002_v4 = vpop.f32.mrb[21].mxu1  ;;  %v2238_v54 = vmul.f32 0.0, %v5184_v8 }
 0x3db   : > { %v4003_v57 = vadd.f32 %v4002_v4, %v4001_v10  ;;  %v4004_v39 = vpop.f32.mrb[22].mxu1  ;;  %v2115_v30 = vpop.xlane.xlu0 %2114  ;;  %v2526_v4 = vmul.f32 0.0, %v5414_v20  ;;  %v2240_v20 = vmul.f32 0.0, %v5193_v51 }
 0x3dc   : > { %v2269_v33 = vadd.f32 %v2237_v23, %v2115_v30  ;;  %v3965_v52 = vpop.f32.mrb[68].mxu0  ;;  %v4005_v29 = vpop.f32.mrb[23].mxu1  ;;  %v2241_v23 = vmul.f32 0.0, %v5203_v40  ;;  %v2539_v40 = vmul.f32 0.0, %v5472_v18  ;;  %v2242_v18 = vmul.f32 0.0, %v5205_v11 }
 0x3dd   : > { %v3966_v3 = vpop.f32.mrb[69].mxu0  ;;  %v5542_v46 = vadd.f32 %v4003_v57, %v2537_v50  ;;  %v4006_v34 = vadd.f32 %v4005_v29, %v4004_v39  ;;  %v5547_v42 = vpop.xlane.xlu1 %2150  ;;  %v2243_v57 = vmul.f32 0.0, %v5207_v28  ;;  %v2245_v28 = vmul.f32 0.0, %v5217_v15 }
 0x3de   : > { %4375 = vrcp.f32 %v2269_v33  ;;  %v3967_v41 = vadd.f32 %v3966_v3, %v3965_v52  ;;  %v3968_v10 = vpop.f32.mrb[70].mxu0  ;;  %v2273_v2 = vadd.f32 %v2241_v23, %v5504_v47  ;;  %v2247_v11 = vmul.f32 0.0, %v5224_v44 }
 0x3df   : > { %v3969_v16 = vpop.f32.mrb[71].mxu0  ;;  %v2118_v30 = vpop.xlane.xlu0 %2117  ;;  %v5551_v8 = vadd.f32 %v4006_v34, %v2538_v6  ;;  %4377 = vrcp.f32 %v2271_v13  ;;  %v2275_v47 = vadd.f32 %v2243_v57, %v5516_v14 }
 0x3e0   : > { %v3970_v48 = vadd.f32 %v3969_v16, %v3968_v10  ;;  %v2270_v60 = vadd.f32 %v2238_v54, %v2118_v30  ;;  %v5549_v37 = vadd.f32 %v3967_v41, %v2525_v45  ;;  %v2540_v54 = vmul.f32 0.0, %v5447_v35 }
 0x3e1   : > { %v4007_v29 = vpop.f32.mrb[24].mxu1  ;;  %v2157_v41 = vpop.xlane.xlu1 %2156  ;;  %v2277_v16 = vadd.f32 %v2245_v28, %v5525_v12 }
 0x3e2   : > { %4379 = vrcp.f32 %v2270_v60  ;;  %v4008_v3 = vpop.f32.mrb[25].mxu1  ;;  %v5555_v50 = vadd.f32 %v3970_v48, %v2526_v4  ;;  %v2244_v48 = vmul.f32 0.0, %v5214_v17 }
 0x3e3   : > { %v4009_v39 = vadd.f32 %v4008_v3, %v4007_v29  ;;  %v4010_v33 = vpop.f32.mrb[26].mxu1  ;;  %v2124_v52 = vpop.xlane.xlu0 %2123  ;;  %4381 = vrcp.f32 %v2273_v2  ;;  %v2541_v2 = vmul.f32 0.0, %v5479_v24  ;;  %v5973_v24 = vld [vmem:[#allocation53_spill] sm:$0xff] }
 0x3e4   : > { %v4374_v45 = vpop.eup %4373  ;;  %v2272_v13 = vadd.f32 %v2240_v20, %v2124_v52  ;;  %v4011_v6 = vpop.f32.mrb[27].mxu1  ;;  %v2246_v44 = vmul.f32 0.0, %v5973_v24 }
 0x3e5   : > { %v4012_v34 = vadd.f32 %v4011_v6, %v4010_v33  ;;  %3006 = vperm.xlu0 %4185, %v4374_v45   ;;  %v5561_v51 = vadd.f32 %v4009_v39, %v2539_v40  ;;  %v2542_v40 = vmul.f32 0.0, %v5456_v62  ;;  %v2163_v57 = vpop.xlane.xlu1 %2162  ;;  %v2279_v33 = vadd.f32 %v2247_v11, %v5535_v9 }
 0x3e6   : > { %4383 = vrcp.f32 %v2272_v13 }
 0x3e7   : > { %v2130_v10 = vpop.xlane.xlu0 %2129  ;;  %v5565_v4 = vadd.f32 %v4012_v34, %v2540_v54  ;;  %4385 = vrcp.f32 %v2275_v47  ;;  %v5974_v54 = vld [vmem:[#allocation55_spill] sm:$0xff] }
 0x3e8   : > { %v4376_v23 = vpop.eup %4375  ;;  %v2274_v35 = vadd.f32 %v2242_v18, %v2130_v10  ;;  %v2249_v13 = vmul.f32 0.0, %v5974_v54 }
 0x3e9   : > { %v4013_v30 = vpop.f32.mrb[28].mxu1  ;;  %3016 = vperm.xlu0 %4185, %v4376_v23   ;;  %v4378_v60 = vpop.eup %4377  ;;  %v5975_v23 = vld [vmem:[#allocation54_spill] sm:$0xff] }
 0x3ea   : > { %4387 = vrcp.f32 %v2274_v35  ;;  %v4014_v14 = vpop.f32.mrb[29].mxu1  ;;  %v2281_v18 = vadd.f32 %v2249_v13, %v5547_v42  ;;  %v2169_v28 = vpop.xlane.xlu1 %2168  ;;  %v2248_v35 = vmul.f32 0.0, %v5975_v23  ;;  %v5977_v13 = vld [vmem:[#allocation48_spill] sm:$0xff] }
 0x3eb   : > { %v4015_v15 = vadd.f32 %v4014_v14, %v4013_v30  ;;  %v4016_v29 = vpop.f32.mrb[30].mxu1  ;;  %v2136_v3 = vpop.xlane.xlu0 %2135  ;;  %4389 = vrcp.f32 %v2277_v16  ;;  %v2543_v30 = vmul.f32 0.0, %v5483_v59  ;;  %v2251_v14 = vmul.f32 0.0, %v5241_v55 }
 0x3ec   : > { %v4380_v20 = vpop.eup %4379  ;;  %v2276_v39 = vadd.f32 %v2244_v48, %v2136_v3  ;;  %v4017_v12 = vpop.f32.mrb[31].mxu1  ;;  %v2253_v55 = vmul.f32 0.0, %v5256_v36  ;;  %v2255_v36 = vmul.f32 0.0, %v5269_v5 }
 0x3ed   : > { %v4018_v52 = vadd.f32 %v4017_v12, %v4016_v29  ;;  %3026 = vperm.xlu0 %4185, %v4378_v60   ;;  %3021 = vperm.xlu1 %4186, %v4380_v20   ;;  %v5573_v17 = vadd.f32 %v4015_v15, %v2541_v2  ;;  %v4382_v45 = vpop.eup %4381  ;;  %v2544_v15 = vmul.f32 0.0, %v5460_v27  ;;  %v2283_v3 = vadd.f32 %v2251_v14, %v2157_v41 }
 0x3ee   : > { %4391 = vrcp.f32 %v2276_v39  ;;  %v5976_v39 = vld [vmem:[#allocation56_spill] sm:$0xff]  ;;  %v2175_v27 = vpop.xlane.xlu1 %2174 }
 0x3ef   : > { %v2142_v6 = vpop.xlane.xlu0 %2141  ;;  %v5577_v47 = vadd.f32 %v4018_v52, %v2542_v40  ;;  %4393 = vrcp.f32 %v2279_v33  ;;  %v2250_v59 = vmul.f32 0.0, %v5976_v39  ;;  %v5979_v39 = vld [vmem:[#allocation14_spill] sm:$0xff] }
 0x3f0   : > { %v4384_v62 = vpop.eup %4383  ;;  %v2278_v34 = vadd.f32 %v2246_v44, %v2142_v6  ;;  %v2252_v6 = vmul.f32 0.0, %v5977_v13 }
 0x3f1   : > { %v4019_v9 = vpop.f32.mrb[32].mxu1  ;;  %3036 = vperm.xlu0 %4185, %v4382_v45   ;;  %3031 = vperm.xlu1 %4186, %v4384_v62   ;;  %v4386_v16 = vpop.eup %4385  ;;  %v2285_v45 = vadd.f32 %v2253_v55, %v2163_v57  ;;  %v2547_v55 = vmul.f32 0.0, %v5491_v22  ;;  %v5981_v22 = vld [vmem:[#allocation15_spill] sm:$0xff] }
 0x3f2   : > { %4395 = vrcp.f32 %v2278_v34  ;;  %v4020_v10 = vpop.f32.mrb[33].mxu1  ;;  %v2545_v34 = vmul.f32 0.0, %v5487_v58  ;;  %v5978_v58 = vld [vmem:[#allocation50_spill] sm:$0xff] }
 0x3f3   : > { %v4021_v48 = vadd.f32 %v4020_v10, %v4019_v9  ;;  %v4022_v60 = vpop.f32.mrb[34].mxu1  ;;  %v2148_v2 = vpop.xlane.xlu0 %2147  ;;  %4397 = vrcp.f32 %v2281_v18 }
 0x3f4   : > { %v4388_v11 = vpop.eup %4387  ;;  %v2280_v42 = vadd.f32 %v2248_v35, %v2148_v2  ;;  %v4023_v29 = vpop.f32.mrb[35].mxu1  ;;  %v2546_v35 = vmul.f32 0.0, %v5470_v38  ;;  %v2254_v2 = vmul.f32 0.0, %v5978_v58  ;;  %v5982_v58 = vld [vmem:[#allocation13_spill] sm:$0xff] }
 0x3f5   : > { %v4024_v20 = vadd.f32 %v4023_v29, %v4022_v60  ;;  %3046 = vperm.xlu0 %4185, %v4386_v16   ;;  %3041 = vperm.xlu1 %4186, %v4388_v11   ;;  %v5584_v40 = vadd.f32 %v4021_v48, %v2543_v30  ;;  %v4390_v12 = vpop.eup %4389  ;;  %v2287_v30 = vadd.f32 %v2255_v36, %v2169_v28  ;;  %v2181_v60 = vpop.xlane.xlu1 %2180  ;;  %v2257_v11 = vmul.f32 0.0, %v5280_v1 }
 0x3f6   : > { %4399 = vrcp.f32 %v2280_v42 }
 0x3f7   : > { %v2154_v33 = vpop.xlane.xlu0 %2153  ;;  %v5588_v52 = vadd.f32 %v4024_v20, %v2544_v15  ;;  %4401 = vrcp.f32 %v2283_v3  ;;  %v2289_v3 = vadd.f32 %v2257_v11, %v2175_v27  ;;  %v2549_v11 = vmul.f32 0.0, %v5499_v53 }
 0x3f8   : > { %v4392_v24 = vpop.eup %4391  ;;  %v2282_v44 = vadd.f32 %v2250_v59, %v2154_v33  ;;  %v2256_v59 = vmul.f32 0.0, %v5979_v39  ;;  %v5980_v33 = vld [vmem:[#allocation12_spill] sm:$0xff] }
 0x3f9   : > { %v4025_v41 = vpop.f32.mrb[36].mxu1  ;;  %3056 = vperm.xlu0 %4185, %v4390_v12   ;;  %3051 = vperm.xlu1 %4186, %v4392_v24   ;;  %v4394_v62 = vpop.eup %4393  ;;  %v2259_v24 = vmul.f32 0.0, %v5980_v33 }
 0x3fa   : > { %4403 = vrcp.f32 %v2282_v44  ;;  %v4026_v54 = vpop.f32.mrb[37].mxu1  ;;  %v2187_v13 = vpop.xlane.xlu1 %2186 }
 0x3fb   : > { %v4027_v18 = vadd.f32 %v4026_v54, %v4025_v41  ;;  %v4028_v9 = vpop.f32.mrb[38].mxu1  ;;  %v2160_v10 = vpop.xlane.xlu0 %2159  ;;  %4405 = vrcp.f32 %v2285_v45  ;;  %v2548_v54 = vmul.f32 0.0, %v5477_v49 }
 0x3fc   : > { %v4396_v23 = vpop.eup %4395  ;;  %v2284_v16 = vadd.f32 %v2252_v6, %v2160_v10  ;;  %v4029_v57 = vpop.f32.mrb[39].mxu1  ;;  %v2261_v10 = vmul.f32 0.0, %v5378_v0  ;;  %v2263_v0 = vmul.f32 0.0, %v5383_v26 }
 0x3fd   : > { %v4030_v14 = vadd.f32 %v4029_v57, %v4028_v9  ;;  %3066 = vperm.xlu0 %4185, %v4394_v62   ;;  %3061 = vperm.xlu1 %4186, %v4396_v23   ;;  %v5594_v48 = vadd.f32 %v4027_v18, %v2545_v34  ;;  %v4398_v5 = vpop.eup %4397  ;;  %v2291_v62 = vadd.f32 %v2259_v24, %v2181_v60  ;;  %v2258_v18 = vmul.f32 0.0, %v5981_v22 }
 0x3fe   : > { %4407 = vrcp.f32 %v2284_v16  ;;  %v2293_v57 = vadd.f32 %v2261_v10, %v2187_v13  ;;  %v5984_v13 = vld [vmem:[#allocation8_spill] sm:$0xff] }
 0x3ff   : > { %v2166_v15 = vpop.xlane.xlu0 %2165  ;;  %v5598_v42 = vadd.f32 %v4030_v14, %v2546_v35  ;;  %4409 = vrcp.f32 %v2287_v30  ;;  %v2193_v14 = vpop.xlane.xlu1 %2192 }
 0x400   : > { %v4400_v38 = vpop.eup %4399  ;;  %v2286_v29 = vadd.f32 %v2254_v2, %v2166_v15  ;;  %v2260_v2 = vmul.f32 0.0, %v5982_v58  ;;  %v2295_v39 = vadd.f32 %v2263_v0, %v2193_v14 }
 0x401   : > { %v4031_v28 = vpop.f32.mrb[40].mxu1  ;;  %3076 = vperm.xlu0 %4185, %v4398_v5   ;;  %3071 = vperm.xlu1 %4186, %v4400_v38   ;;  %v4402_v12 = vpop.eup %4401 }
 0x402   : > { %4411 = vrcp.f32 %v2286_v29  ;;  %v4032_v20 = vpop.f32.mrb[41].mxu1 }
 0x403   : > { %v4033_v1 = vadd.f32 %v4032_v20, %v4031_v28  ;;  %v4034_v44 = vpop.f32.mrb[42].mxu1  ;;  %v2172_v45 = vpop.xlane.xlu0 %2171  ;;  %4413 = vrcp.f32 %v2289_v3 }
 0x404   : > { %v4404_v41 = vpop.eup %4403  ;;  %v2288_v27 = vadd.f32 %v2256_v59, %v2172_v45  ;;  %v4035_v6 = vpop.f32.mrb[43].mxu1  ;;  %v2265_v45 = vmul.f32 0.0, %v5388_v43 }
 0x405   : > { %v4036_v34 = vadd.f32 %v4035_v6, %v4034_v44  ;;  %3086 = vperm.xlu0 %4185, %v4402_v12   ;;  %3081 = vperm.xlu1 %4186, %v4404_v41   ;;  %v5604_v36 = vadd.f32 %v4033_v1, %v2547_v55  ;;  %v4406_v9 = vpop.eup %4405  ;;  %v5983_v55 = vld [vmem:[#allocation51_spill] sm:$0xff] }
 0x406   : > { %4415 = vrcp.f32 %v2288_v27  ;;  %v2262_v33 = vmul.f32 0.0, %v5983_v55  ;;  %v2264_v27 = vmul.f32 0.0, %v5984_v13  ;;  %v2554_v55 = vmul.f32 0.0, %v5489_v7 }
 0x407   : > { %v2178_v23 = vpop.xlane.xlu0 %2177  ;;  %v5608_v35 = vadd.f32 %v4036_v34, %v2548_v54  ;;  %4417 = vrcp.f32 %v2291_v62  ;;  %v2551_v62 = vmul.f32 0.0, %v5510_v31 }
 0x408   : > { %v4408_v49 = vpop.eup %4407  ;;  %v2290_v16 = vadd.f32 %v2258_v18, %v2178_v23 }
 0x409   : > { %v4037_v30 = vpop.f32.mrb[44].mxu1  ;;  %3096 = vperm.xlu0 %4185, %v4406_v9   ;;  %3091 = vperm.xlu1 %4186, %v4408_v49   ;;  %v4410_v5 = vpop.eup %4409 }
 0x40a   : > { %4419 = vrcp.f32 %v2290_v16  ;;  %v4038_v60 = vpop.f32.mrb[45].mxu1  ;;  %v2552_v16 = vmul.f32 0.0, %v5485_v56 }
 0x40b   : > { %v4039_v15 = vadd.f32 %v4038_v60, %v4037_v30  ;;  %v4040_v38 = vpop.f32.mrb[46].mxu1  ;;  %v2184_v29 = vpop.xlane.xlu0 %2183  ;;  %4421 = vrcp.f32 %v2293_v57  ;;  %v5985_v30 = vld [vmem:[#allocation9_spill] sm:$0xff] }
 0x40c   : > { %v4412_v3 = vpop.eup %4411  ;;  %v2292_v28 = vadd.f32 %v2260_v2, %v2184_v29  ;;  %v4041_v20 = vpop.f32.mrb[47].mxu1  ;;  %v2266_v14 = vmul.f32 0.0, %v5985_v30 }
 0x40d   : > { %v5613_v59 = vadd.f32 %v4041_v20, %v4040_v38  ;;  %3106 = vperm.xlu0 %4185, %v4410_v5   ;;  %3101 = vperm.xlu1 %4186, %v4412_v3   ;;  %v5615_v12 = vadd.f32 %v4039_v15, %v2549_v11  ;;  %v4414_v53 = vpop.eup %4413 }
 0x40e   : > { %4423 = vrcp.f32 %v2292_v28 }
 0x40f   : > { %v2190_v24 = vpop.xlane.xlu0 %2189  ;;  %4425 = vrcp.f32 %v2295_v39 }
 0x410   : > { %v4416_v26 = vpop.eup %4415  ;;  %v2294_v1 = vadd.f32 %v2262_v33, %v2190_v24 }
 0x411   : > { %v4043_v44 = vpop.f32.mrb[48].mxu1  ;;  %3116 = vperm.xlu0 %4185, %v4414_v53   ;;  %3111 = vperm.xlu1 %4186, %v4416_v26   ;;  %v4418_v6 = vpop.eup %4417 }
 0x412   : > { %4427 = vrcp.f32 %v2294_v1  ;;  %v4044_v41 = vpop.f32.mrb[49].mxu1  ;;  %v2199_v54 = vpop.xlane.xlu1 %2198 }
 0x413   : > { %v4045_v34 = vadd.f32 %v4044_v41, %v4043_v44  ;;  %v2297_v22 = vadd.f32 %v2265_v45, %v2199_v54  ;;  %v4046_v18 = vpop.f32.mrb[50].mxu1  ;;  %v2196_v9 = vpop.xlane.xlu0 %2195 }
 0x414   : > { %v4420_v10 = vpop.eup %4419  ;;  %v2296_v23 = vadd.f32 %v2264_v27, %v2196_v9  ;;  %v4047_v49 = vpop.f32.mrb[51].mxu1 }
 0x415   : > { %4429 = vrcp.f32 %v2297_v22  ;;  %v4048_v57 = vadd.f32 %v4047_v49, %v4046_v18  ;;  %3126 = vperm.xlu0 %4185, %v4418_v6   ;;  %3121 = vperm.xlu1 %4186, %v4420_v10   ;;  %v5622_v43 = vadd.f32 %v4045_v34, %v2551_v62  ;;  %v4422_v60 = vpop.eup %4421  ;;  %v5986_v10 = vld [vmem:[#allocation10_spill] sm:$0xff]  ;;  %v5987_v49 = vld [vmem:[#allocation11_spill] sm:$0xff] }
 0x416   : > { %4431 = vrcp.f32 %v2296_v23 }
 0x417   : > { %v2202_v31 = vpop.xlane.xlu0 %2201  ;;  %v5625_v58 = vadd.f32 %v4048_v57, %v2552_v16 }
 0x418   : > { %v4424_v2 = vpop.eup %4423  ;;  %v2298_v5 = vadd.f32 %v2266_v14, %v2202_v31  ;;  %v5988_v14 = vld [vmem:[#allocation18_spill] sm:$0xff] }
 0x419   : > { %3136 = vperm.xlu0 %4185, %v4422_v60   ;;  %3131 = vperm.xlu1 %4186, %v4424_v2   ;;  %v4426_v11 = vpop.eup %4425 }
 0x41a   : > { %4433 = vrcp.f32 %v2298_v5  ;;  %v5989_v5 = vld [vmem:[#allocation16_spill] sm:$0xff] }
 0x41c   : > { %v4428_v56 = vpop.eup %4427 }
 0x41d   : > { %3146 = vperm.xlu0 %4185, %v4426_v11   ;;  %3141 = vperm.xlu1 %4186, %v4428_v56  }
 0x41f   : > { %v4430_v0 = vpop.eup %4429 }
 0x420   : > { %v4432_v15 = vpop.eup %4431 }
 0x421   : > { %3156 = vperm.xlu0 %4185, %v4430_v0   ;;  %3151 = vperm.xlu1 %4186, %v4432_v15  }
 0x424   : > { %v4434_v38 = vpop.eup %4433 }
 0x425   : > { %3161 = vperm.xlu1 %4186, %v4434_v38   ;;  %v5990_v38 = vld [vmem:[#allocation17_spill] sm:$0xff] }
 0x450   : > { %v3012_v24 = vpop.permute.xlu1 %3011 }
 0x451   : > { %v3165_v1 = vmul.f32 %v3012_v24, %v5512_v63 }
 0x455   : > { %v4049_v29 = vpop.f32.mrb[52].mxu1 }
 0x456   : > { %v4050_v3 = vpop.f32.mrb[53].mxu1 }
 0x457   : > { %v5627_v28 = vadd.f32 %v4050_v3, %v4049_v29  ;;  %v4052_v20 = vpop.f32.mrb[54].mxu1  ;;  %v5991_v3 = vld [vmem:[#allocation22_spill] sm:$0xff] }
 0x458   : > { %v4053_v39 = vpop.f32.mrb[55].mxu1 }
 0x459   : > { %v4054_v33 = vadd.f32 %v4053_v39, %v4052_v20 }
 0x45b   : > { %v5630_v53 = vadd.f32 %v4054_v33, %v2554_v55 }
 0x464   : > { %v3007_v26 = vpop.permute.xlu0 %3006 }
 0x465   : > { %v3164_v44 = vmul.f32 %v3007_v26, %v5506_v25 }
 0x467   : > { %v3196_v45 = vpack.c.bf16 %v3165_v1, %v3164_v44 }
 0x468   : > { %v3017_v41 = vpop.permute.xlu0 %3016 }
 0x469   : > { %4095 = vmatprep.mubr.bf16.mxu1 %v3196_v45  ;;  %v3166_v27 = vmul.f32 %v3017_v41, %v5549_v37 }
 0x46c   : > { %v3022_v54 = vpop.permute.xlu1 %3021  ;;  %v3027_v13 = vpop.permute.xlu0 %3026 }
 0x46d   : > { %v3167_v6 = vmul.f32 %v3022_v54, %v5555_v50  ;;  %v3168_v22 = vmul.f32 %v3027_v13, %v5443_v19 }
 0x46f   : > { %v3197_v62 = vpack.c.bf16 %v3167_v6, %v3166_v27 }
 0x470   : > { %v3032_v7 = vpop.permute.xlu1 %3031  ;;  %v3037_v34 = vpop.permute.xlu0 %3036 }
 0x471   : > { %v3169_v18 = vmul.f32 %v3032_v7, %v5445_v32  ;;  %4096 = vmatmul.mubr.bf16.vlgmr.msra.gmra.mrb[56].mxu1 %v3197_v62  ;;  %v3170_v23 = vmul.f32 %v3037_v34, %v5986_v10 }
 0x473   : > { %v3198_v63 = vpack.c.bf16 %v3169_v18, %v3168_v22 }
 0x474   : > { %v3042_v9 = vpop.permute.xlu1 %3041  ;;  %v3047_v25 = vpop.permute.xlu0 %3046 }
 0x475   : > { %v3171_v16 = vmul.f32 %v3042_v9, %v5987_v49  ;;  %4099 = vmatprep.mubr.bf16.mxu1 %v3198_v63  ;;  %v3172_v50 = vmul.f32 %v3047_v25, %v5495_v21  ;;  %v5992_v25 = vld [vmem:[#allocation49_spill] sm:$0xff] }
 0x476   : > { %v2550_v10 = vmul.f32 0.0, %v5992_v25 }
 0x477   : > { %v3199_v57 = vpack.c.bf16 %v3171_v16, %v3170_v23 }
 0x478   : > { %v3052_v37 = vpop.permute.xlu1 %3051  ;;  %v3057_v30 = vpop.permute.xlu0 %3056  ;;  %v2839_v49 = vadd.f32 %v5613_v59, %v2550_v10 }
 0x479   : > { %v3173_v60 = vmul.f32 %v3052_v37, %v5988_v14  ;;  %4100 = vmatmul.mubr.bf16.gmra.mrb[60].mxu1 %v3199_v57  ;;  %v3174_v2 = vmul.f32 %v3057_v30, %v5508_v61 }
 0x47b   : > { %v3200_v19 = vpack.c.bf16 %v3173_v60, %v3172_v50  ;;  %v5993_v50 = vld [vmem:[#allocation19_spill] sm:$0xff] }
 0x47c   : > { %v3062_v31 = vpop.permute.xlu1 %3061  ;;  %v3067_v32 = vpop.permute.xlu0 %3066  ;;  %v2553_v14 = vmul.f32 0.0, %v5993_v50 }
 0x47d   : > { %v3175_v11 = vmul.f32 %v3062_v31, %v5989_v5  ;;  %4103 = vmatprep.mubr.bf16.mxu1 %v3200_v19  ;;  %v3176_v29 = vmul.f32 %v3067_v32, %v5990_v38  ;;  %v5669_v5 = vld [vmem:[%s5798_s4] ss:$0 sm:$0xff] }
 0x47e   : > { %v2842_v31 = vadd.f32 %v5627_v28, %v2553_v14 }
 0x47f   : > { %v3201_v56 = vpack.c.bf16 %v3175_v11, %v3174_v2 }
 0x480   : > { %v3072_v0 = vpop.permute.xlu1 %3071  ;;  %v3077_v15 = vpop.permute.xlu0 %3076 }
 0x481   : > { %v3177_v20 = vmul.f32 %v3072_v0, %v5991_v3  ;;  %4104 = vmatmul.mubr.bf16.gmra.mrb[64].mxu1 %v3201_v56  ;;  %v3178_v33 = vmul.f32 %v3077_v15, %v5542_v46 }
 0x483   : > { %v3202_v21 = vpack.c.bf16 %v3177_v20, %v3176_v29 }
 0x484   : > { %v3082_v39 = vpop.permute.xlu1 %3081  ;;  %v3087_v55 = vpop.permute.xlu0 %3086 }
 0x485   : > { %v3179_v24 = vmul.f32 %v3082_v39, %v5551_v8  ;;  %4107 = vmatprep.mubr.bf16.mxu1 %v3202_v21  ;;  %v3180_v44 = vmul.f32 %v3087_v55, %v5561_v51 }
 0x487   : > { %v3203_v61 = vpack.c.bf16 %v3179_v24, %v3178_v33 }
 0x488   : > { %v3092_v26 = vpop.permute.xlu1 %3091  ;;  %v3097_v1 = vpop.permute.xlu0 %3096 }
 0x489   : > { %v3181_v45 = vmul.f32 %v3092_v26, %v5565_v4  ;;  %4108 = vmatmul.mubr.bf16.gmra.mrb[68].mxu1 %v3203_v61  ;;  %v3182_v27 = vmul.f32 %v3097_v1, %v5573_v17 }
 0x48b   : > { %v3204_v41 = vpack.c.bf16 %v3181_v45, %v3180_v44 }
 0x48c   : > { %v3102_v54 = vpop.permute.xlu1 %3101  ;;  %v3107_v13 = vpop.permute.xlu0 %3106 }
 0x48d   : > { %v3183_v6 = vmul.f32 %v3102_v54, %v5577_v47  ;;  %4111 = vmatprep.mubr.bf16.mxu1 %v3204_v41  ;;  %v3184_v7 = vmul.f32 %v3107_v13, %v5584_v40 }
 0x48f   : > { %v3205_v46 = vpack.c.bf16 %v3183_v6, %v3182_v27 }
 0x490   : > { %v3112_v62 = vpop.permute.xlu1 %3111  ;;  %v3117_v8 = vpop.permute.xlu0 %3116 }
 0x491   : > { %v3185_v34 = vmul.f32 %v3112_v62, %v5588_v52  ;;  %4112 = vmatmul.mubr.bf16.gmra.mrb[72].mxu1 %v3205_v46  ;;  %v3186_v18 = vmul.f32 %v3117_v8, %v5594_v48 }
 0x493   : > { %v3206_v51 = vpack.c.bf16 %v3185_v34, %v3184_v7 }
 0x494   : > { %v3122_v22 = vpop.permute.xlu1 %3121  ;;  %v3127_v4 = vpop.permute.xlu0 %3126 }
 0x495   : > { %v3187_v63 = vmul.f32 %v3122_v22, %v5598_v42  ;;  %4115 = vmatprep.mubr.bf16.mxu1 %v3206_v51  ;;  %v3188_v23 = vmul.f32 %v3127_v4, %v5604_v36 }
 0x497   : > { %v3207_v17 = vpack.c.bf16 %v3187_v63, %v3186_v18 }
 0x498   : > { %v3132_v9 = vpop.permute.xlu1 %3131  ;;  %v3137_v47 = vpop.permute.xlu0 %3136 }
 0x499   : > { %v3189_v40 = vmul.f32 %v3132_v9, %v5608_v35  ;;  %4116 = vmatmul.mubr.bf16.gmra.mrb[76].mxu1 %v3207_v17  ;;  %v3190_v48 = vmul.f32 %v3137_v47, %v5615_v12 }
 0x49b   : > { %v3208_v52 = vpack.c.bf16 %v3189_v40, %v3188_v23 }
 0x49c   : > { %v3142_v16 = vpop.permute.xlu1 %3141  ;;  %v3147_v57 = vpop.permute.xlu0 %3146 }
 0x49d   : > { %v3191_v37 = vmul.f32 %v3142_v16, %v2839_v49  ;;  %4119 = vmatprep.mubr.bf16.mxu1 %v3208_v52  ;;  %v3192_v60 = vmul.f32 %v3147_v57, %v5622_v43 }
 0x49f   : > { %v3209_v42 = vpack.c.bf16 %v3191_v37, %v3190_v48 }
 0x4a0   : > { %v3152_v30 = vpop.permute.xlu1 %3151  ;;  %v3157_v35 = vpop.permute.xlu0 %3156 }
 0x4a1   : > { %v3193_v36 = vmul.f32 %v3152_v30, %v5625_v58  ;;  %4120 = vmatmul.mubr.bf16.gmra.mrb[80].mxu1 %v3209_v42  ;;  %v3194_v32 = vmul.f32 %v3157_v35, %v2842_v31 }
 0x4a3   : > { %v3210_v19 = vpack.c.bf16 %v3193_v36, %v3192_v60 }
 0x4a4   : > { %v3162_v59 = vpop.permute.xlu1 %3161 }
 0x4a5   : > { %v3195_v2 = vmul.f32 %v3162_v59, %v5630_v53  ;;  %4123 = vmatprep.mubr.bf16.mxu1 %v3210_v19 }
 0x4a7   : > { %v3211_v12 = vpack.c.bf16 %v3195_v2, %v3194_v32 }
 0x4a9   : > { %4124 = vmatmul.mubr.bf16.gmra.mrb[84].mxu1 %v3211_v12 }
 0x544   : > { %v4097_v43 = vpop.f32.mrb[56].mxu1 }
 0x545   : > { %v3317_v11 = vpop.f32.mrb[57].mxu1  ;;  %v3326_v38 = vadd.f32 %v4097_v43, %v5669_v5 }
 0x546   : > { %v3318_v58 = vadd.f32 %v5669_v5, %v3317_v11  ;;  %v4098_v56 = vpop.f32.mrb[58].mxu1 }
 0x547   : > { %v3320_v0 = vpop.f32.mrb[59].mxu1  ;;  %v3329_v20 = vadd.f32 %v4098_v56, %v5669_v5  ;;  %v3510_v56 = vld [vmem:[%s5708_s18 + $0x10] sm:$0xff] }
 0x548   : > { %3444 = vxpose.xlu0.b32.start [1/16] %v3318_v58, 128  ;;  %v3321_v28 = vadd.f32 %v5669_v5, %v3320_v0 }
 0x54c   : > { %3445 = vxpose.xlu0.b32.cont [2/16] %v3321_v28, 128  ;;  %v4101_v15 = vpop.f32.mrb[60].mxu1 }
 0x54d   : > { %v3333_v53 = vpop.f32.mrb[61].mxu1  ;;  %v3342_v44 = vadd.f32 %v4101_v15, %v5669_v5  ;;  %v3512_v15 = vld [vmem:[%s5708_s18 + $0x20] sm:$0xff] }
 0x54e   : > { %v4102_v29 = vpop.f32.mrb[62].mxu1  ;;  %v3334_v55 = vadd.f32 %v5669_v5, %v3333_v53 }
 0x54f   : > { %v3336_v3 = vpop.f32.mrb[63].mxu1  ;;  %v3345_v54 = vadd.f32 %v4102_v29, %v5669_v5  ;;  %v3514_v29 = vld [vmem:[%s5708_s18 + $0x30] sm:$0xff] }
 0x550   : > { %3446 = vxpose.xlu0.b32.cont [3/16] %v3326_v38, 128  ;;  %v3337_v61 = vadd.f32 %v5669_v5, %v3336_v3 }
 0x554   : > { %3447 = vxpose.xlu0.b32.cont [4/16] %v3329_v20, 128  ;;  %v4105_v21 = vpop.f32.mrb[64].mxu1 }
 0x555   : > { %v3349_v39 = vpop.f32.mrb[65].mxu1  ;;  %v3358_v4 = vadd.f32 %v4105_v21, %v5669_v5  ;;  %v3516_v21 = vld [vmem:[%s5708_s18 + $0x40] sm:$0xff] }
 0x556   : > { %v4106_v33 = vpop.f32.mrb[66].mxu1  ;;  %v3350_v6 = vadd.f32 %v5669_v5, %v3349_v39 }
 0x557   : > { %v3352_v24 = vpop.f32.mrb[67].mxu1  ;;  %v3361_v9 = vadd.f32 %v4106_v33, %v5669_v5  ;;  %v3518_v33 = vld [vmem:[%s5708_s18 + $0x50] sm:$0xff] }
 0x558   : > { %3448 = vxpose.xlu0.b32.cont [5/16] %v3334_v55, 128  ;;  %v3353_v7 = vadd.f32 %v5669_v5, %v3352_v24 }
 0x55c   : > { %3449 = vxpose.xlu0.b32.cont [6/16] %v3337_v61, 128  ;;  %v4109_v26 = vpop.f32.mrb[68].mxu1 }
 0x55d   : > { %v3365_v1 = vpop.f32.mrb[69].mxu1  ;;  %v3374_v36 = vadd.f32 %v4109_v26, %v5669_v5  ;;  %v3520_v26 = vld [vmem:[%s5708_s18 + $0x60] sm:$0xff] }
 0x55e   : > { %v4110_v45 = vpop.f32.mrb[70].mxu1  ;;  %v3366_v40 = vadd.f32 %v5669_v5, %v3365_v1 }
 0x55f   : > { %v3368_v41 = vpop.f32.mrb[71].mxu1  ;;  %v3377_v12 = vadd.f32 %v4110_v45, %v5669_v5  ;;  %v3522_v45 = vld [vmem:[%s5708_s18 + $0x70] sm:$0xff] }
 0x560   : > { %3450 = vxpose.xlu0.b32.cont [7/16] %v3342_v44, 128  ;;  %v3369_v42 = vadd.f32 %v5669_v5, %v3368_v41 }
 0x564   : > { %3451 = vxpose.xlu0.b32.cont [8/16] %v3345_v54, 128  ;;  %v4113_v13 = vpop.f32.mrb[72].mxu1 }
 0x565   : > { %v3381_v27 = vpop.f32.mrb[73].mxu1  ;;  %v3390_v18 = vadd.f32 %v4113_v13, %v5669_v5  ;;  %v3509_v13 = vld [vmem:[%s5708_s18 + $0x8] sm:$0xff] }
 0x566   : > { %v3382_v46 = vadd.f32 %v5669_v5, %v3381_v27  ;;  %v4114_v62 = vpop.f32.mrb[74].mxu1  ;;  %v3524_v27 = vld [vmem:[%s5708_s18 + $0x80] sm:$0xff] }
 0x567   : > { %v3384_v8 = vpop.f32.mrb[75].mxu1  ;;  %v3393_v47 = vadd.f32 %v4114_v62, %v5669_v5 }
 0x568   : > { %3452 = vxpose.xlu0.b32.cont [9/16] %v3350_v6, 128  ;;  %3476 = vxpose.xlu1.b32.start [1/16] %v3382_v46, 128  ;;  %v3385_v34 = vadd.f32 %v5669_v5, %v3384_v8 }
 0x56c   : > { %3453 = vxpose.xlu0.b32.cont [10/16] %v3353_v7, 128  ;;  %3477 = vxpose.xlu1.b32.cont [2/16] %v3385_v34, 128  ;;  %v4117_v51 = vpop.f32.mrb[76].mxu1  ;;  %v3511_v7 = vld [vmem:[%s5708_s18 + $0x18] sm:$0xff]  ;;  %v3526_v34 = vld [vmem:[%s5708_s18 + $0x90] sm:$0xff] }
 0x56d   : > { %v3397_v22 = vpop.f32.mrb[77].mxu1  ;;  %v3406_v35 = vadd.f32 %v4117_v51, %v5669_v5 }
 0x56e   : > { %v4118_v63 = vpop.f32.mrb[78].mxu1  ;;  %v3398_v52 = vadd.f32 %v5669_v5, %v3397_v22 }
 0x56f   : > { %v3400_v17 = vpop.f32.mrb[79].mxu1  ;;  %v3409_v43 = vadd.f32 %v4118_v63, %v5669_v5  ;;  %v3513_v63 = vld [vmem:[%s5708_s18 + $0x28] sm:$0xff] }
 0x570   : > { %3454 = vxpose.xlu0.b32.cont [11/16] %v3358_v4, 128  ;;  %3478 = vxpose.xlu1.b32.cont [3/16] %v3390_v18, 128  ;;  %v3401_v30 = vadd.f32 %v5669_v5, %v3400_v17  ;;  %v3528_v17 = vld [vmem:[%s5708_s18 + $0xa0] sm:$0xff] }
 0x574   : > { %3455 = vxpose.xlu0.b32.cont [12/16] %v3361_v9, 128  ;;  %3479 = vxpose.xlu1.b32.cont [4/16] %v3393_v47, 128  ;;  %v4121_v25 = vpop.f32.mrb[80].mxu1 }
 0x575   : > { %v3422_v10 = vadd.f32 %v4121_v25, %v5669_v5  ;;  %v3413_v23 = vpop.f32.mrb[81].mxu1 }
 0x576   : > { %v3414_v49 = vadd.f32 %v5669_v5, %v3413_v23  ;;  %v4122_v16 = vpop.f32.mrb[82].mxu1  ;;  %v3515_v23 = vld [vmem:[%s5708_s18 + $0x38] sm:$0xff] }
 0x577   : > { %v3425_v57 = vadd.f32 %v4122_v16, %v5669_v5  ;;  %v3416_v48 = vpop.f32.mrb[83].mxu1 }
 0x578   : > { %v3417_v37 = vadd.f32 %v5669_v5, %v3416_v48  ;;  %3456 = vxpose.xlu0.b32.cont [13/16] %v3366_v40, 128  ;;  %3480 = vxpose.xlu1.b32.cont [5/16] %v3398_v52, 128  ;;  %v3530_v40 = vld [vmem:[%s5708_s18 + $0xb0] sm:$0xff]  ;;  %v3517_v48 = vld [vmem:[%s5708_s18 + $0x48] sm:$0xff] }
 0x57c   : > { %3457 = vxpose.xlu0.b32.cont [14/16] %v3369_v42, 128  ;;  %3481 = vxpose.xlu1.b32.cont [6/16] %v3401_v30, 128  ;;  %v4125_v50 = vpop.f32.mrb[84].mxu1 }
 0x57d   : > { %v3438_v14 = vadd.f32 %v4125_v50, %v5669_v5  ;;  %v3429_v60 = vpop.f32.mrb[85].mxu1 }
 0x57e   : > { %v3430_v19 = vadd.f32 %v5669_v5, %v3429_v60  ;;  %v4126_v31 = vpop.f32.mrb[86].mxu1  ;;  %v3519_v60 = vld [vmem:[%s5708_s18 + $0x58] sm:$0xff] }
 0x57f   : > { %v3441_v59 = vadd.f32 %v4126_v31, %v5669_v5  ;;  %v3432_v32 = vpop.f32.mrb[87].mxu1 }
 0x580   : > { %v3433_v2 = vadd.f32 %v5669_v5, %v3432_v32  ;;  %3458 = vxpose.xlu0.b32.cont [15/16] %v3374_v36, 128  ;;  %3482 = vxpose.xlu1.b32.cont [7/16] %v3406_v35, 128  ;;  %v3508_v5 = vld [vmem:[%s5708_s18] sm:$0xff]  ;;  %v3534_v36 = vld [vmem:[%s5708_s18 + $0xd0] sm:$0xff]  ;;  %v3521_v32 = vld [vmem:[%s5708_s18 + $0x68] sm:$0xff] }
 0x584   : > { %3459 = vxpose.xlu0.b32.end [16/16] %v3377_v12, 128  ;;  %3483 = vxpose.xlu1.b32.cont [8/16] %v3409_v43, 128 }
 0x588   : > { %3484 = vxpose.xlu1.b32.cont [9/16] %v3414_v49, 128 }
 0x58c   : > { %3485 = vxpose.xlu1.b32.cont [10/16] %v3417_v37, 128  ;;  %v3532_v37 = vld [vmem:[%s5708_s18 + $0xc0] sm:$0xff] }
 0x590   : > { %3486 = vxpose.xlu1.b32.cont [11/16] %v3422_v10, 128 }
 0x594   : > { %3487 = vxpose.xlu1.b32.cont [12/16] %v3425_v57, 128 }
 0x598   : > { %3488 = vxpose.xlu1.b32.cont [13/16] %v3430_v19, 128 }
 0x59c   : > { %3489 = vxpose.xlu1.b32.cont [14/16] %v3433_v2, 128  ;;  %v3536_v2 = vld [vmem:[%s5708_s18 + $0xe0] sm:$0xff] }
 0x5a0   : > { %3490 = vxpose.xlu1.b32.cont [15/16] %v3438_v14, 128 }
 0x5a4   : > { %3491 = vxpose.xlu1.b32.end [16/16] %v3441_v59, 128 }
 0x5c8   : > { %v3460_v11 = vpop.trf.xlu0 }
 0x5c9   : > { %v3540_v58 = vadd.f32 %v3508_v5, %v3460_v11 }
 0x5cb   : > { %3572 = vst [vmem:[%s5714_s28] sm:$0xff] %v3540_v58  ;;  %v3523_v58 = vld [vmem:[%s5708_s18 + $0x78] sm:$0xff] }
 0x5cc   : > { %v3461_v0 = vpop.trf.xlu0 }
 0x5cd   : > { %v3542_v28 = vadd.f32 %v3510_v56, %v3461_v0  ;;  %v3538_v56 = vld [vmem:[%s5708_s18 + $0xf0] sm:$0xff] }
 0x5cf   : > { %3574 = vst [vmem:[%s5714_s28 + $0x10] sm:$0xff] %v3542_v28 }
 0x5d0   : > { %v3462_v53 = vpop.trf.xlu0 }
 0x5d1   : > { %v3544_v38 = vadd.f32 %v3512_v15, %v3462_v53 }
 0x5d3   : > { %3576 = vst [vmem:[%s5714_s28 + $0x20] sm:$0xff] %v3544_v38  ;;  %v3525_v38 = vld [vmem:[%s5708_s18 + $0x88] sm:$0xff] }
 0x5d4   : > { %v3463_v3 = vpop.trf.xlu0 }
 0x5d5   : > { %v3546_v20 = vadd.f32 %v3514_v29, %v3463_v3 }
 0x5d7   : > { %3578 = vst [vmem:[%s5714_s28 + $0x30] sm:$0xff] %v3546_v20  ;;  %v3527_v20 = vld [vmem:[%s5708_s18 + $0x98] sm:$0xff] }
 0x5d8   : > { %v3464_v39 = vpop.trf.xlu0 }
 0x5d9   : > { %v3548_v55 = vadd.f32 %v3516_v21, %v3464_v39 }
 0x5db   : > { %3580 = vst [vmem:[%s5714_s28 + $0x40] sm:$0xff] %v3548_v55  ;;  %v3529_v55 = vld [vmem:[%s5708_s18 + $0xa8] sm:$0xff] }
 0x5dc   : > { %v3465_v24 = vpop.trf.xlu0 }
 0x5dd   : > { %v3550_v61 = vadd.f32 %v3518_v33, %v3465_v24 }
 0x5df   : > { %3582 = vst [vmem:[%s5714_s28 + $0x50] sm:$0xff] %v3550_v61  ;;  %v3531_v61 = vld [vmem:[%s5708_s18 + $0xb8] sm:$0xff] }
 0x5e0   : > { %v3466_v1 = vpop.trf.xlu0 }
 0x5e1   : > { %v3552_v44 = vadd.f32 %v3520_v26, %v3466_v1 }
 0x5e3   : > { %3584 = vst [vmem:[%s5714_s28 + $0x60] sm:$0xff] %v3552_v44  ;;  %v3533_v44 = vld [vmem:[%s5708_s18 + $0xc8] sm:$0xff] }
 0x5e4   : > { %v3467_v41 = vpop.trf.xlu0 }
 0x5e5   : > { %v3554_v54 = vadd.f32 %v3522_v45, %v3467_v41 }
 0x5e7   : > { %3586 = vst [vmem:[%s5714_s28 + $0x70] sm:$0xff] %v3554_v54  ;;  %v3535_v54 = vld [vmem:[%s5708_s18 + $0xd8] sm:$0xff] }
 0x5e8   : > { %v3492_v6 = vpop.trf.xlu1  ;;  %v3468_v46 = vpop.trf.xlu0 }
 0x5e9   : > { %v3541_v62 = vadd.f32 %v3509_v13, %v3492_v6  ;;  %v3556_v8 = vadd.f32 %v3524_v27, %v3468_v46  ;;  %v3537_v6 = vld [vmem:[%s5708_s18 + $0xe8] sm:$0xff] }
 0x5eb   : > { %3573 = vst [vmem:[%s5714_s28 + $0x8] sm:$0xff] %v3541_v62  ;;  %3588 = vst [vmem:[%s5714_s28 + $0x80] sm:$0xff] %v3556_v8  ;;  %v3539_v8 = vld [vmem:[%s5708_s18 + $0xf8] sm:$0xff] }
 0x5ec   : > { %v3493_v51 = vpop.trf.xlu1  ;;  %v3469_v22 = vpop.trf.xlu0 }
 0x5ed   : > { %v3543_v4 = vadd.f32 %v3511_v7, %v3493_v51  ;;  %v3558_v18 = vadd.f32 %v3526_v34, %v3469_v22 }
 0x5ef   : > { %3575 = vst [vmem:[%s5714_s28 + $0x18] sm:$0xff] %v3543_v4  ;;  %3590 = vst [vmem:[%s5714_s28 + $0x90] sm:$0xff] %v3558_v18 }
 0x5f0   : > { %v3494_v9 = vpop.trf.xlu1  ;;  %v3470_v47 = vpop.trf.xlu0 }
 0x5f1   : > { %v3545_v25 = vadd.f32 %v3513_v63, %v3494_v9  ;;  %v3560_v10 = vadd.f32 %v3528_v17, %v3470_v47 }
 0x5f3   : > { %3577 = vst [vmem:[%s5714_s28 + $0x28] sm:$0xff] %v3545_v25  ;;  %3592 = vst [vmem:[%s5714_s28 + $0xa0] sm:$0xff] %v3560_v10 }
 0x5f4   : > { %v3495_v52 = vpop.trf.xlu1  ;;  %v3471_v49 = vpop.trf.xlu0 }
 0x5f5   : > { %v3547_v16 = vadd.f32 %v3515_v23, %v3495_v52  ;;  %v3562_v57 = vadd.f32 %v3530_v40, %v3471_v49 }
 0x5f7   : > { %3579 = vst [vmem:[%s5714_s28 + $0x38] sm:$0xff] %v3547_v16  ;;  %3594 = vst [vmem:[%s5714_s28 + $0xb0] sm:$0xff] %v3562_v57 }
 0x5f8   : > { %v3496_v42 = vpop.trf.xlu1  ;;  %v3472_v30 = vpop.trf.xlu0 }
 0x5f9   : > { %v3549_v50 = vadd.f32 %v3517_v48, %v3496_v42  ;;  %v3564_v14 = vadd.f32 %v3532_v37, %v3472_v30 }
 0x5fb   : > { %3581 = vst [vmem:[%s5714_s28 + $0x48] sm:$0xff] %v3549_v50  ;;  %3596 = vst [vmem:[%s5714_s28 + $0xc0] sm:$0xff] %v3564_v14 }
 0x5fc   : > { %v3497_v35 = vpop.trf.xlu1  ;;  %v3473_v19 = vpop.trf.xlu0 }
 0x5fd   : > { %v3551_v31 = vadd.f32 %v3519_v60, %v3497_v35  ;;  %v3566_v59 = vadd.f32 %v3534_v36, %v3473_v19 }
 0x5ff   : > { %3583 = vst [vmem:[%s5714_s28 + $0x58] sm:$0xff] %v3551_v31  ;;  %3598 = vst [vmem:[%s5714_s28 + $0xd0] sm:$0xff] %v3566_v59 }
 0x600   : > { %v3498_v12 = vpop.trf.xlu1  ;;  %v3474_v43 = vpop.trf.xlu0 }
 0x601   : > { %v3553_v5 = vadd.f32 %v3521_v32, %v3498_v12  ;;  %v3568_v11 = vadd.f32 %v3536_v2, %v3474_v43 }
 0x603   : > { %3585 = vst [vmem:[%s5714_s28 + $0x68] sm:$0xff] %v3553_v5  ;;  %3600 = vst [vmem:[%s5714_s28 + $0xe0] sm:$0xff] %v3568_v11 }
 0x604   : > { %v3499_v0 = vpop.trf.xlu1  ;;  %v3475_v28 = vpop.trf.xlu0 }
 0x605   : > { %v3555_v15 = vadd.f32 %v3523_v58, %v3499_v0  ;;  %v3570_v53 = vadd.f32 %v3538_v56, %v3475_v28 }
 0x607   : > { %3587 = vst [vmem:[%s5714_s28 + $0x78] sm:$0xff] %v3555_v15  ;;  %3602 = vst [vmem:[%s5714_s28 + $0xf0] sm:$0xff] %v3570_v53 }
 0x608   : > { %v3500_v29 = vpop.trf.xlu1 }
 0x609   : > { %v3557_v3 = vadd.f32 %v3525_v38, %v3500_v29 }
 0x60b   : > { %3589 = vst [vmem:[%s5714_s28 + $0x88] sm:$0xff] %v3557_v3 }
 0x60c   : > { %v3501_v21 = vpop.trf.xlu1 }
 0x60d   : > { %v3559_v39 = vadd.f32 %v3527_v20, %v3501_v21 }
 0x60f   : > { %3591 = vst [vmem:[%s5714_s28 + $0x98] sm:$0xff] %v3559_v39 }
 0x610   : > { %v3502_v33 = vpop.trf.xlu1 }
 0x611   : > { %v3561_v24 = vadd.f32 %v3529_v55, %v3502_v33 }
 0x613   : > { %3593 = vst [vmem:[%s5714_s28 + $0xa8] sm:$0xff] %v3561_v24 }
 0x614   : > { %v3503_v26 = vpop.trf.xlu1 }
 0x615   : > { %v3563_v1 = vadd.f32 %v3531_v61, %v3503_v26 }
 0x617   : > { %3595 = vst [vmem:[%s5714_s28 + $0xb8] sm:$0xff] %v3563_v1 }
 0x618   : > { %v3504_v45 = vpop.trf.xlu1 }
 0x619   : > { %v3565_v41 = vadd.f32 %v3533_v44, %v3504_v45 }
 0x61b   : > { %3597 = vst [vmem:[%s5714_s28 + $0xc8] sm:$0xff] %v3565_v41 }
 0x61c   : > { %v3505_v13 = vpop.trf.xlu1 }
 0x61d   : > { %v3567_v27 = vadd.f32 %v3535_v54, %v3505_v13 }
 0x61f   : > { %3599 = vst [vmem:[%s5714_s28 + $0xd8] sm:$0xff] %v3567_v27 }
 0x620   : > { %v3506_v46 = vpop.trf.xlu1 }
 0x621   : > { %v3569_v62 = vadd.f32 %v3537_v6, %v3506_v46 }
 0x623   : > { %3601 = vst [vmem:[%s5714_s28 + $0xe8] sm:$0xff] %v3569_v62 }
 0x624   : > { %v3507_v7 = vpop.trf.xlu1 }
 0x625   : > { %v3571_v34 = vadd.f32 %v3539_v8, %v3507_v7 }
 0x627   : > { %3603 = vst [vmem:[%s5714_s28 + $0xf8] sm:$0xff] %v3571_v34 }
 0x628 PF: > { %s16_s25 = sadd.s32 1, %s4473_s25   ;;  %s5994_s21 = smov %s4461_s22 }
 0x629   : > { %p13_p10 = scmp.ge.s32.totalorder %s16_s25, 4   ;;  %s5995_s22 = smov %s4550_s30 }
 0x62a   : > { %s5996_s23 = smov %s4469_s24  ;;  %s5997_s24 = smov %s5999_s26 }
 0x62b   :  { %15 = sbr.rel (!%p13_p10) target bundleno = 3 (0x3), region = 221 }

</bundles_post_ra>
